<compile_context>
chip_gen: v5e
topology: v5e:2x2
jax: 0.10.0
libtpu: 0.0.40
codegen_flags: <defaults>
</compile_context>

<pallas_src>
import jax
import jax.numpy as jnp
from jax import lax
from jax.experimental import pallas as pl
from jax.experimental.pallas import tpu as pltpu

_SQRT_HALF = 0.7071067811865476


def _ara_kernel(q_ref, mem_ref, w1q_ref, w1m_ref, b1_ref, w2_ref, out_ref):
    TB, Dq = q_ref.shape
    _, M, F = mem_ref.shape
    H = b1_ref.shape[-1]
    A = out_ref.shape[-1] - 1

    mem = mem_ref[...]                                         # (TB, M, F)

    # fc1, query part: one small matmul per board, broadcast over memory slots
    # (cheaper than physically concatenating q into every memory row).
    hq = jnp.dot(q_ref[...], w1q_ref[...],
                 preferred_element_type=jnp.float32)           # (TB, H)

    # fc1, memory part: contract the FULL memory block; the weight's action /
    # result rows are zero (prepared host-side) so their contribution vanishes
    # exactly.  M == 8 -> the reshape is sublane-aligned (a pure view).
    hm = jnp.dot(mem.reshape(TB * M, F), w1m_ref[...],
                 preferred_element_type=jnp.float32)           # (TB*M, H)
    h = hm.reshape(TB, M, H) + hq[:, None, :] + b1_ref[...]    # (TB, M, H)

    # exact erf-GELU (parity with torch.nn.functional.gelu default)
    h = 0.5 * h * (1.0 + lax.erf(h * _SQRT_HALF))

    # fc2 (output width 1): VPU multiply + lane reduce instead of an N=1 MXU
    # matmul.  b2 is dropped: adding a constant before softmax is a no-op.
    scores = jnp.sum(h * w2_ref[...], axis=-1)                 # (TB, M)

    # Softmax over the memory axis.  Exact divide: the approx reciprocal saved
    # nothing at this size and broke the action-output tolerance.
    mx = jnp.max(scores, axis=1, keepdims=True)
    e = jnp.exp(scores - mx)
    w = e / jnp.sum(e, axis=1, keepdims=True)                  # (TB, M)

    # Packed weighted reduction: tail = [actions (A) | result (1)].
    # torch .long() truncation applies to the action columns only; the static
    # column mask stays in-vreg (no lane-shifting slices/concat needed).
    tail = mem[..., Dq:]                                       # (TB, M, A + 1)
    col = lax.broadcasted_iota(jnp.int32, tail.shape, 2)
    tail = jnp.where(col < A, jnp.trunc(tail), tail)
    out_ref[...] = jnp.sum(tail * w[:, :, None], axis=1)       # (TB, A + 1)


def prepare_params(params, query_dim, key_dim, num_actions):
    """One-time parameter repack (hoisted out of the per-call path)."""
    w1, b1, w2 = params["w1"], params["b1"], params["w2"]
    H = w1.shape[0]
    w1t = jnp.transpose(w1).astype(jnp.float32)                # (Dq + Dk, H)
    w1q = w1t[:query_dim]                                      # (Dq, H) query rows
    # Memory-side weight laid out like relevant_memory columns
    # [feats | actions | result]; action/result rows are zero.
    w1m = jnp.concatenate(
        [w1t[query_dim:query_dim + key_dim],
         jnp.zeros((num_actions + 1, H), jnp.float32)], axis=0)  # (F, H)
    return {
        "w1q": jnp.asarray(w1q),
        "w1m": jnp.asarray(w1m),
        "b1": b1.reshape(1, H).astype(jnp.float32),
        "w2": w2.reshape(1, H).astype(jnp.float32),
        # b2 intentionally dropped (softmax-invariant constant shift).
    }


def action_result_attention(query, relevant_memory, prepared, *, block_b=None):
    """Pallas forward of ActionResultAttention.

    block_b=None (default) -> the whole (padded) batch is one grid step, which
    is fastest for this latency-bound kernel.  If a tiled path is requested,
    block_b should be a multiple of 8 (sublane tile).
    """
    query = query.astype(jnp.float32)
    relevant_memory = relevant_memory.astype(jnp.float32)
    B, Dq = query.shape
    _, M, F = relevant_memory.shape
    A = F - Dq - 1
    H = prepared["b1"].shape[-1]

    if block_b is None:
        tb, Bp = B, B                              # single grid step, no padding
    else:
        tb = min(block_b, B)
        Bp = pl.cdiv(B, tb) * tb
        if Bp != B:                                # pad batch to a block multiple
            query = jnp.pad(query, ((0, Bp - B), (0, 0)))
            relevant_memory = jnp.pad(relevant_memory,
                                      ((0, Bp - B), (0, 0), (0, 0)))

    packed = pl.pallas_call(
        _ara_kernel,
        out_shape=jax.ShapeDtypeStruct((Bp, A + 1), jnp.float32),
        grid_spec=pltpu.PrefetchScalarGridSpec(
            num_scalar_prefetch=0,
            grid=(Bp // tb,),
            in_specs=[
                pl.BlockSpec((tb, Dq), lambda i: (i, 0)),       # query
                pl.BlockSpec((tb, M, F), lambda i: (i, 0, 0)),  # relevant_memory
                pl.BlockSpec((Dq, H), lambda i: (0, 0)),        # w1 (query rows)
                pl.BlockSpec((F, H), lambda i: (0, 0)),         # w1 (memory rows, zero-padded)
                pl.BlockSpec((1, H), lambda i: (0, 0)),         # b1
                pl.BlockSpec((1, H), lambda i: (0, 0)),         # w2 row
            ],
            out_specs=pl.BlockSpec((tb, A + 1), lambda i: (i, 0)),
        ),
        compiler_params=pltpu.CompilerParams(
            dimension_semantics=("arbitrary",)),
    )(query, relevant_memory, prepared["w1q"], prepared["w1m"],
      prepared["b1"], prepared["w2"])

    weighted_actions = packed[:B, :A]
    weighted_results = packed[:B, A:A + 1]
    return weighted_results, weighted_actions


def _reference(query, relevant_memory, params, feature_size):
    """Pure-JAX reference mirroring the PyTorch forward (including b2)."""
    w1, b1, w2, b2 = params["w1"], params["b1"], params["w2"], params["b2"]
    feats = relevant_memory[..., :feature_size]
    actions = jnp.trunc(relevant_memory[..., feature_size:-1])
    results = relevant_memory[..., -1]
    M = feats.shape[1]
    q_exp = jnp.broadcast_to(query[:, None, :],
                             (query.shape[0], M, query.shape[1]))
    combined = jnp.concatenate([q_exp, feats], axis=2)
    h = combined @ w1.T + b1
    h = 0.5 * h * (1.0 + lax.erf(h * _SQRT_HALF))
    scores = (h @ w2.T + b2)[..., 0]
    wts = jax.nn.softmax(scores, axis=1)
    wact = jnp.sum(actions * wts[..., None], axis=1)
    wres = jnp.sum(results * wts, axis=1)[:, None]
    return wres, wact


if __name__ == "__main__":
    # key_dim == query_dim (== feature_size), as the torch module assumes.
    B, Dq, Dk, M, A, H = 16, 32, 32, 8, 4, 256

    key = jax.random.PRNGKey(0)
    k_q, k_f, k_a, k_r, k_w1, k_b1, k_w2, k_b2 = jax.random.split(key, 8)

    query = jax.random.normal(k_q, (B, Dq), dtype=jnp.float32)
    mem_feats = jax.random.normal(k_f, (B, M, Dq), dtype=jnp.float32)
    mem_actions = jax.random.randint(k_a, (B, M, A), 0, 64).astype(jnp.float32)
    mem_results = jax.random.normal(k_r, (B, M, 1), dtype=jnp.float32)
    relevant_memory = jnp.concatenate([mem_feats, mem_actions, mem_results], axis=-1)

    params = {
        "w1": 0.05 * jax.random.normal(k_w1, (H, Dq + Dk), dtype=jnp.float32),
        "b1": 0.05 * jax.random.normal(k_b1, (H,), dtype=jnp.float32),
        "w2": 0.05 * jax.random.normal(k_w2, (1, H), dtype=jnp.float32),
        "b2": 0.05 * jax.random.normal(k_b2, (1,), dtype=jnp.float32),
    }

    # Parameter repack done ONCE, outside the per-call path.
    prepared = prepare_params(params, Dq, Dk, A)

    fwd = jax.jit(action_result_attention)
    wres, wact = fwd(query, relevant_memory, prepared)
    jax.block_until_ready((wres, wact))

    wres_ref, wact_ref = _reference(query, relevant_memory, params, Dq)
    assert wres.shape == (B, 1) and wact.shape == (B, A)
    # Exact softmax divide -> only f32 rounding differences remain.
    assert jnp.allclose(wres, wres_ref, atol=1e-4, rtol=1e-3)
    assert jnp.allclose(wact, wact_ref, atol=1e-3, rtol=1e-3)

    print("KERNEL_OK")
</pallas_src>

<mosaic_0001>
module attributes {stable_mosaic.version = 11 : i64} {
  func.func @_ara_kernel(%arg0: i32, %arg1: memref<16x32xf32, #tpu.memory_space<vmem>>, %arg2: memref<16x8x37xf32, #tpu.memory_space<vmem>>, %arg3: memref<32x256xf32, #tpu.memory_space<vmem>>, %arg4: memref<37x256xf32, #tpu.memory_space<vmem>>, %arg5: memref<1x256xf32, #tpu.memory_space<vmem>>, %arg6: memref<1x256xf32, #tpu.memory_space<vmem>>, %arg7: memref<16x5xf32, #tpu.memory_space<vmem>>) attributes {dimension_semantics = [#tpu.dimension_semantics<arbitrary>], iteration_bounds = array<i64: 1>, scalar_prefetch = 0 : i64, scratch_operands = 0 : i64, tpu.core_type = #tpu.core_type<tc>, window_params = [{transform_indices = @transform_0, window_bounds = array<i64: 16, 32>}, {transform_indices = @transform_1, window_bounds = array<i64: 16, 8, 37>}, {pipeline_mode = #tpu.pipeline_mode<synchronous>, transform_indices = @transform_2, window_bounds = array<i64: 32, 256>}, {pipeline_mode = #tpu.pipeline_mode<synchronous>, transform_indices = @transform_3, window_bounds = array<i64: 37, 256>}, {pipeline_mode = #tpu.pipeline_mode<synchronous>, transform_indices = @transform_4, window_bounds = array<i64: 1, 256>}, {pipeline_mode = #tpu.pipeline_mode<synchronous>, transform_indices = @transform_5, window_bounds = array<i64: 1, 256>}, {transform_indices = @transform_6, window_bounds = array<i64: 16, 5>}]} {
    %c0 = arith.constant 0 : index
    %c0_0 = arith.constant 0 : index
    %c0_1 = arith.constant 0 : index
    %0 = vector.load %arg2[%c0, %c0_0, %c0_1] : memref<16x8x37xf32, #tpu.memory_space<vmem>>, vector<16x8x37xf32>
    %c0_2 = arith.constant 0 : index
    %c0_3 = arith.constant 0 : index
    %1 = vector.load %arg1[%c0_2, %c0_3] : memref<16x32xf32, #tpu.memory_space<vmem>>, vector<16x32xf32>
    %c0_4 = arith.constant 0 : index
    %c0_5 = arith.constant 0 : index
    %2 = vector.load %arg3[%c0_4, %c0_5] : memref<32x256xf32, #tpu.memory_space<vmem>>, vector<32x256xf32>
    %cst = arith.constant dense<0.000000e+00> : vector<16x256xf32>
    %3 = tpu.matmul %1, %2, %cst {dimension_numbers = #tpu.dot_dimension_numbers<[1], [0], [0], [1], [0, 0, 1, 1], [], []>} : vector<16x32xf32>, vector<32x256xf32>, vector<16x256xf32> -> vector<16x256xf32>
    %4 = vector.shape_cast %0 : vector<16x8x37xf32> to vector<128x37xf32>
    %c0_6 = arith.constant 0 : index
    %c0_7 = arith.constant 0 : index
    %5 = vector.load %arg4[%c0_6, %c0_7] : memref<37x256xf32, #tpu.memory_space<vmem>>, vector<37x256xf32>
    %cst_8 = arith.constant dense<0.000000e+00> : vector<128x256xf32>
    %6 = tpu.matmul %4, %5, %cst_8 {dimension_numbers = #tpu.dot_dimension_numbers<[1], [0], [0], [1], [0, 0, 1, 1], [], []>} : vector<128x37xf32>, vector<37x256xf32>, vector<128x256xf32> -> vector<128x256xf32>
    %7 = vector.shape_cast %6 : vector<128x256xf32> to vector<16x8x256xf32>
    %8 = vector.shape_cast %3 : vector<16x256xf32> to vector<16x1x256xf32>
    %9 = vector.broadcast %8 : vector<16x1x256xf32> to vector<16x8x256xf32>
    %10 = arith.addf %7, %9 : vector<16x8x256xf32>
    %c0_9 = arith.constant 0 : index
    %c0_10 = arith.constant 0 : index
    %11 = vector.load %arg5[%c0_9, %c0_10] : memref<1x256xf32, #tpu.memory_space<vmem>>, vector<1x256xf32>
    %12 = vector.shape_cast %11 : vector<1x256xf32> to vector<1x1x256xf32>
    %13 = vector.broadcast %12 : vector<1x1x256xf32> to vector<16x8x256xf32>
    %14 = arith.addf %10, %13 : vector<16x8x256xf32>
    %cst_11 = arith.constant 5.000000e-01 : f32
    %15 = vector.broadcast %cst_11 : f32 to vector<16x8x256xf32>
    %16 = arith.mulf %15, %14 : vector<16x8x256xf32>
    %cst_12 = arith.constant 0.707106769 : f32
    %17 = vector.broadcast %cst_12 : f32 to vector<16x8x256xf32>
    %18 = arith.mulf %14, %17 : vector<16x8x256xf32>
    %19 = math.erf %18 : vector<16x8x256xf32>
    %cst_13 = arith.constant 1.000000e+00 : f32
    %20 = vector.broadcast %cst_13 : f32 to vector<16x8x256xf32>
    %21 = arith.addf %20, %19 : vector<16x8x256xf32>
    %22 = arith.mulf %16, %21 : vector<16x8x256xf32>
    %c0_14 = arith.constant 0 : index
    %c0_15 = arith.constant 0 : index
    %23 = vector.load %arg6[%c0_14, %c0_15] : memref<1x256xf32, #tpu.memory_space<vmem>>, vector<1x256xf32>
    %24 = vector.shape_cast %23 : vector<1x256xf32> to vector<1x1x256xf32>
    %25 = vector.broadcast %24 : vector<1x1x256xf32> to vector<16x8x256xf32>
    %26 = arith.mulf %22, %25 : vector<16x8x256xf32>
    %cst_16 = arith.constant dense<0.000000e+00> : vector<16x8xf32>
    %27 = vector.multi_reduction <add>, %26, %cst_16 [2] : vector<16x8x256xf32> to vector<16x8xf32>
    %cst_17 = arith.constant dense<0xFF800000> : vector<16xf32>
    %28 = vector.multi_reduction <maximumf>, %27, %cst_17 [1] : vector<16x8xf32> to vector<16xf32>
    %29 = vector.shape_cast %28 : vector<16xf32> to vector<16x1xf32>
    %30 = vector.broadcast %29 : vector<16x1xf32> to vector<16x8xf32>
    %31 = arith.subf %27, %30 : vector<16x8xf32>
    %32 = math.exp %31 : vector<16x8xf32>
    %cst_18 = arith.constant dense<0.000000e+00> : vector<16xf32>
    %33 = vector.multi_reduction <add>, %32, %cst_18 [1] : vector<16x8xf32> to vector<16xf32>
    %34 = vector.shape_cast %33 : vector<16xf32> to vector<16x1xf32>
    %35 = vector.broadcast %34 : vector<16x1xf32> to vector<16x8xf32>
    %36 = arith.divf %32, %35 : vector<16x8xf32>
    %37 = vector.extract_strided_slice %0 {offsets = [0, 0, 32], sizes = [16, 8, 5], strides = [1, 1, 1]} : vector<16x8x37xf32> to vector<16x8x5xf32>
    %38 = tpu.iota {dimensions = array<i32: 2>} : vector<16x8x5xi32>
    %c4_i32 = arith.constant 4 : i32
    %39 = vector.broadcast %c4_i32 : i32 to vector<16x8x5xi32>
    %40 = arith.cmpi slt, %38, %39 : vector<16x8x5xi32>
    %cst_19 = arith.constant 0.000000e+00 : f32
    %41 = vector.broadcast %cst_19 : f32 to vector<16x8x5xf32>
    %42 = arith.cmpf olt, %37, %41 : vector<16x8x5xf32>
    %43 = math.ceil %37 : vector<16x8x5xf32>
    %44 = math.floor %37 : vector<16x8x5xf32>
    %45 = arith.select %42, %43, %44 : vector<16x8x5xi1>, vector<16x8x5xf32>
    %46 = arith.select %40, %45, %37 : vector<16x8x5xi1>, vector<16x8x5xf32>
    %47 = vector.shape_cast %36 : vector<16x8xf32> to vector<16x8x1xf32>
    %48 = vector.broadcast %47 : vector<16x8x1xf32> to vector<16x8x5xf32>
    %49 = arith.mulf %46, %48 : vector<16x8x5xf32>
    %cst_20 = arith.constant dense<0.000000e+00> : vector<16x5xf32>
    %50 = vector.multi_reduction <add>, %49, %cst_20 [1] : vector<16x8x5xf32> to vector<16x5xf32>
    %c0_21 = arith.constant 0 : index
    %c0_22 = arith.constant 0 : index
    %51 = vector.load %arg7[%c0_21, %c0_22] : memref<16x5xf32, #tpu.memory_space<vmem>>, vector<16x5xf32>
    tpu.vector_store %arg7[%c0_21, %c0_22], %50 {strides = array<i32>} : memref<16x5xf32, #tpu.memory_space<vmem>>, vector<16x5xf32>,
    return
  }
  func.func @transform_0(%arg0: i32) -> (i32, i32) {
    %c0_i32 = arith.constant 0 : i32
    %c0_i32_0 = arith.constant 0 : i32
    return %arg0, %c0_i32 : i32, i32
  }
  func.func @transform_1(%arg0: i32) -> (i32, i32, i32) {
    %c0_i32 = arith.constant 0 : i32
    %c0_i32_0 = arith.constant 0 : i32
    %c0_i32_1 = arith.constant 0 : i32
    return %arg0, %c0_i32, %c0_i32_0 : i32, i32, i32
  }
  func.func @transform_2(%arg0: i32) -> (i32, i32) {
    %c0_i32 = arith.constant 0 : i32
    %c0_i32_0 = arith.constant 0 : i32
    %c0_i32_1 = arith.constant 0 : i32
    return %c0_i32, %c0_i32_0 : i32, i32
  }
  func.func @transform_3(%arg0: i32) -> (i32, i32) {
    %c0_i32 = arith.constant 0 : i32
    %c0_i32_0 = arith.constant 0 : i32
    %c0_i32_1 = arith.constant 0 : i32
    return %c0_i32, %c0_i32_0 : i32, i32
  }
  func.func @transform_4(%arg0: i32) -> (i32, i32) {
    %c0_i32 = arith.constant 0 : i32
    %c0_i32_0 = arith.constant 0 : i32
    %c0_i32_1 = arith.constant 0 : i32
    return %c0_i32, %c0_i32_0 : i32, i32
  }
  func.func @transform_5(%arg0: i32) -> (i32, i32) {
    %c0_i32 = arith.constant 0 : i32
    %c0_i32_0 = arith.constant 0 : i32
    %c0_i32_1 = arith.constant 0 : i32
    return %c0_i32, %c0_i32_0 : i32, i32
  }
  func.func @transform_6(%arg0: i32) -> (i32, i32) {
    %c0_i32 = arith.constant 0 : i32
    %c0_i32_0 = arith.constant 0 : i32
    return %arg0, %c0_i32 : i32, i32
  }
}

</mosaic_0001>

<bundles_post_ra>
// kernel: action_result_attention.1
= control target key start
LH: loop header
LB: loop body
LE: loop exit
PB: predicated region body
PF: predicated region fallthrough
CT: control target
= control target key end

     0   :  { %11 = vsyncpa [#allocation3], 0  ;;  %s5656_s0 = inlined_call_operand.hbm [shape: f32[16,32], index: 0, kind: input, shape index: {}]   ;;  %s5657_s1 = inlined_call_operand.hbm [shape: f32[16,8,37], index: 1, kind: input, shape index: {}]   ;;  %s5658_s2 = inlined_call_operand.hbm [shape: f32[32,256], index: 2, kind: input, shape index: {}]   ;;  %s5659_s3 = inlined_call_operand.hbm [shape: f32[37,256], index: 3, kind: input, shape index: {}]   ;;  %s5660_s4 = inlined_call_operand.vmem [shape: f32[1,256], index: 4, kind: input, shape index: {}]   ;;  %s5661_s5 = inlined_call_operand.hbm [shape: f32[1,256], index: 5, kind: input, shape index: {}]   ;;  %s5662_s6 = inlined_call_operand.vmem [shape: f32[16,5], index: 6, kind: output, shape index: {}]  }
   0x1   :  { %12 = vsyncpa [#allocation5], 0 }
   0x2   :  { %13 = vsyncpa [#allocation8], 0  ;;  %s31_s23 = sshll.u32 %s5657_s1, 4  ;;  %s3369_s24 = smov [#allocation4]   ;;  %s32_s23 = int_to_ptr.hbm [resolvable:$true] %s31_s23 }
   0x3   :  { %s33_s25 = sshll.u32 %s3369_s24, 4  ;;  %s3370_s26 = smov 128   ;;  %s34_s25 = int_to_ptr.vmem [resolvable:$true] %s33_s25 }
   0x4   :  { %s3371_s27 = smov 8   ;;  %s57_s30 = sshll.u32 %s5659_s3, 4  ;;  %s58_s30 = int_to_ptr.hbm [resolvable:$true] %s57_s30 }
   0x5   :  { %39 = dma.hbm_to_vmem [thread:$0]  %s32_s23, 2048, %s34_s25, [#allocation5], %s3370_s26, %s3370_s26, %s3371_s27  }
   0x6   :  { %s3372_s7 = smov [#allocation7]   ;;  %s18_s11 = sshll.u32 %s5656_s0, 4  ;;  %s19_s11 = int_to_ptr.hbm [resolvable:$true] %s18_s11 }
   0x7   :  { %s59_s8 = sshll.u32 %s3372_s7, 4  ;;  %s3373_s1 = smov 256   ;;  %s60_s8 = int_to_ptr.vmem [resolvable:$true] %s59_s8 }
   0x8   :  { %s3374_s12 = smov 16   ;;  %s44_s15 = sshll.u32 %s5658_s2, 4  ;;  %s45_s15 = int_to_ptr.hbm [resolvable:$true] %s44_s15 }
   0x9   :  { %65 = dma.hbm_to_vmem [thread:$0]  %s58_s30, 1280, %s60_s8, [#allocation8], %s3373_s1, %s3373_s1, %s3374_s12  }
   0xa   :  { %s3375_s16 = smov [#allocation2]   ;;  %s3376_s3 = smov [#allocation6]  }
   0xb   :  { %s20_s17 = sshll.u32 %s3375_s16, 4  ;;  %s46_s18 = sshll.u32 %s3376_s3, 4  ;;  %s21_s17 = int_to_ptr.vmem [resolvable:$true] %s20_s17  ;;  %s47_s18 = int_to_ptr.vmem [resolvable:$true] %s46_s18 }
   0xc   :  { %26 = dma.hbm_to_vmem [thread:$0]  %s19_s11, 256, %s21_s17, [#allocation3], %s3370_s26, %s3370_s26, %s3371_s27  }
   0xd   :  { %s73_s0 = sshll.u32 %s5661_s5, 4  ;;  %s3377_s21 = smov [#allocation9]   ;;  %s74_s0 = int_to_ptr.hbm [resolvable:$true] %s73_s0 }
   0xe   :  { %52 = dma.hbm_to_vmem [thread:$0]  %s45_s15, 1024, %s47_s18, [#allocation5], %s3373_s1, %s3373_s1, %s3374_s12  }
   0xf   :  { %s75_s22 = sshll.u32 %s3377_s21, 4  ;;  %s76_s22 = int_to_ptr.vmem [resolvable:$true] %s75_s22 }
  0x10   :  { %78 = dma.hbm_to_vmem [thread:$0]  %s74_s0, 32, %s76_s22, [#allocation8]  }
  0x11   :  { %3363 = dma.done.wait [#allocation3], 256  }
  0x12   :  { %3364 = vsyncadd [#allocation3], 4294967040 }
  0x13   :  { %3365 = dma.done.wait [#allocation5], 3072  }
  0x14   :  { %3366 = vsyncadd [#allocation5], 4294964224 }
  0x15   :  { %3367 = dma.done.wait [#allocation8], 1312  }
  0x16   :  { %3368 = vsyncadd [#allocation8], 4294965984  ;;  %vm237_vm0 = vcmask 1044480   ;;  %v123_v0 = vld [vmem:[#allocation6 + $0x30] sm:$0xff]  ;;  %v124_v1 = vld [vmem:[#allocation6 + $0x38] sm:$0xff]  ;;  %vm125_vm1 = vcmask 261120  }
  0x17   :  { %v186_v2 = vld [vmem:[#allocation7 + $0x40] sm:$0x1f]  ;;  %144 = vmatpush.msra.mxu0 %v123_v0  ;;  %167 = vmatpush.msra.mxu1 %v124_v1  ;;  %v187_v3 = vld [vmem:[#allocation7 + $0x48] sm:$0x1f]  ;;  %v184_v6 = vld [vmem:[#allocation7 + $0x30] sm:$0xff]  ;;  %vm188_vm2 = vcmask 302080  }
  0x18   :  { %v121_v4 = vld [vmem:[#allocation6 + $0x20] sm:$0xff]  ;;  %v122_v5 = vld [vmem:[#allocation6 + $0x28] sm:$0xff]  ;;  %3075 = vmatpush.msk.msra.mxu2 %vm237_vm0, %v186_v2  ;;  %3080 = vmatpush.msk.msra.mxu3 %vm237_vm0, %v187_v3  ;;  %v185_v7 = vld [vmem:[#allocation7 + $0x38] sm:$0xff]  ;;  %s3378_s2 = smov 96   ;;  %vm400_vm8 = vcmask 1046528   ;;  %vm380_vm9 = vcmask 1040384  }
  0x19   :  { %v119_v8 = vld [vmem:[#allocation6 + $0x10] sm:$0xff]  ;;  %145 = vmatpush.msra.mxu0 %v121_v4  ;;  %168 = vmatpush.msra.mxu1 %v122_v5  ;;  %v120_v9 = vld [vmem:[#allocation6 + $0x18] sm:$0xff]  ;;  %v182_v10 = vld [vmem:[#allocation7 + $0x20] sm:$0xff]  ;;  %vm5713_vm11 = vcmask 1041409   ;;  %vm5712_vm12 = vcmask 1042434   ;;  %vm5711_vm13 = vcmask 1043459  }
  0x1a   :  { %v183_v11 = vld [vmem:[#allocation7 + $0x28] sm:$0xff]  ;;  %3076 = vmatpush.msra.mxu2 %v184_v6  ;;  %3081 = vmatpush.msra.mxu3 %v185_v7  ;;  %v117_v12 = vld [vmem:[#allocation6] sm:$0xff]  ;;  %v180_v14 = vld [vmem:[#allocation7 + $0x10] sm:$0xff]  ;;  %vm5710_vm14 = vcmask 1044484  }
  0x1b   :  { %v118_v13 = vld [vmem:[#allocation6 + $0x8] sm:$0xff]  ;;  %146 = vmatpush.msra.mxu0 %v119_v8  ;;  %169 = vmatpush.msra.mxu1 %v120_v9  ;;  %v181_v15 = vld [vmem:[#allocation7 + $0x18] sm:$0xff]  ;;  %v115_v16 = vld [vmem:[#allocation2] sm:$0xff] }
  0x1c   :  { %3077 = vmatpush.msra.mxu2 %v182_v10  ;;  %3082 = vmatpush.msra.mxu3 %v183_v11  ;;  %v178_v17 = vld [vmem:[#allocation7] sm:$0xff]  ;;  %v179_v18 = vld [vmem:[#allocation7 + $0x8] sm:$0xff]  ;;  %v3434_v19 = vld [vmem:[#allocation4 + $0x38] sm:$0xff] }
  0x1d   :  { %147 = vmatpush.msra.mxu0 %v117_v12  ;;  %170 = vmatpush.msra.mxu1 %v118_v13  ;;  %v116_v20 = vld [vmem:[#allocation2 + $0x8] sm:$0xff]  ;;  %v107_v21 = vld [vmem:[#allocation4 + $0x40] sm:$0xff]  ;;  %v108_v23 = vld [vmem:[#allocation4 + $0x48] sm:$0xff]  ;;  %vm2570_vm15 = vcmp.lt.f32.partialorder %v3434_v19, 0.0 }
  0x1e   :  { %3078 = vmatpush.msra.mxu2 %v180_v14  ;;  %3083 = vmatpush.msra.mxu3 %v181_v15  ;;  %v99_v22 = vld [vmem:[#allocation4] sm:$0xff]  ;;  %v100_v24 = vld [vmem:[#allocation4 + $0x8] sm:$0xff]  ;;  %v109_v25 = vld [vmem:[#allocation4 + $0x50] sm:$0xff] }
  0x1f   :  { %3005 = vmatmul.msk.f32.vlgmr.msra.gmra.mxu0 %vm125_vm1, %v115_v16  ;;  %3007 = vmatmul.msk.f32.vlgmr.msra.gmra.mxu1 %vm125_vm1, %v115_v16  ;;  %v101_v26 = vld [vmem:[#allocation4 + $0x10] sm:$0xff]  ;;  %v110_v27 = vld [vmem:[#allocation4 + $0x58] sm:$0xff]  ;;  %vm2563_vm3 = vcmp.lt.f32.partialorder %v99_v22, 0.0  ;;  %v2579_v28 = vceil.f32 %v99_v22  ;;  %v2595_v29 = vfloor.f32 %v99_v22  ;;  %v2580_v32 = vceil.f32 %v100_v24  ;;  %v111_v34 = vld [vmem:[#allocation4 + $0x60] sm:$0xff] }
  0x20   :  { %3009 = vmatpush.msk.msrb.mxu0 %vm237_vm0, %v186_v2  ;;  %3026 = vmatpush.msk.msrb.mxu1 %vm237_vm0, %v187_v3  ;;  %v102_v30 = vld [vmem:[#allocation4 + $0x18] sm:$0xff]  ;;  %v2596_v33 = vfloor.f32 %v100_v24  ;;  %vm2564_vm4 = vcmp.lt.f32.partialorder %v100_v24, 0.0  ;;  %v103_v36 = vld [vmem:[#allocation4 + $0x20] sm:$0xff]  ;;  %v112_v37 = vld [vmem:[#allocation4 + $0x68] sm:$0xff]  ;;  %v2581_v42 = vceil.f32 %v101_v26  ;;  %v2597_v43 = vfloor.f32 %v101_v26 }
  0x21   :  { %3079 = vmatpush.msra.mxu2 %v178_v17  ;;  %3084 = vmatpush.msra.mxu3 %v179_v18  ;;  %v2611_v31 = vsel %vm2563_vm3, %v2579_v28, %v2595_v29  ;;  %v104_v38 = vld [vmem:[#allocation4 + $0x28] sm:$0xff]  ;;  %v113_v39 = vld [vmem:[#allocation4 + $0x70] sm:$0xff]  ;;  %v114_v41 = vld [vmem:[#allocation4 + $0x78] sm:$0xff]  ;;  %vm2565_vm5 = vcmp.lt.f32.partialorder %v101_v26, 0.0  ;;  %v2582_v45 = vceil.f32 %v102_v30  ;;  %v2598_v46 = vfloor.f32 %v102_v30 }
  0x22   :  { %3017 = vmatmul.msk.f32.vlgmr.msra.gmra.mxu2 %vm188_vm2, %v3434_v19  ;;  %3034 = vmatmul.msk.f32.vlgmr.msra.gmra.mxu3 %vm188_vm2, %v3434_v19  ;;  %v2612_v35 = vsel %vm2564_vm4, %v2580_v32, %v2596_v33  ;;  %v3472_v40 = vld [vmem:[#allocation4 + $0x30] sm:$0xff]  ;;  %v2613_v44 = vsel %vm2565_vm5, %v2581_v42, %v2597_v43  ;;  %vm2566_vm6 = vcmp.lt.f32.partialorder %v102_v30, 0.0  ;;  %v2583_v48 = vceil.f32 %v103_v36 }
  0x23   :  { %256 = vmatpush.msrb.mxu0 %v184_v6  ;;  %321 = vmatpush.msrb.mxu1 %v185_v7  ;;  %v2614_v47 = vsel %vm2566_vm6, %v2582_v45, %v2598_v46  ;;  %v2599_v49 = vfloor.f32 %v103_v36  ;;  %vm2567_vm7 = vcmp.lt.f32.partialorder %v103_v36, 0.0  ;;  %v514_v56 = vld [vmem:[%s5660_s4] sm:$0x3]  ;;  %v2584_v63 = vceil.f32 %v104_v38 }
  0x24   :  { %2643 = vrot.lane.b32.xlu1 %v2611_v31, %s3378_s2  ;;  %v3495_v61 = vperm.slane %v514_v56, 0  ;;  %v3497_v62 = vperm.slane %v514_v56, 1  ;;  %v2600_v0 = vfloor.f32 %v104_v38  ;;  %vm2568_vm10 = vcmp.lt.f32.partialorder %v104_v38, 0.0 }
  0x25   :  { %257 = vmatpush.msrb.mxu0 %v182_v10  ;;  %322 = vmatpush.msrb.mxu1 %v183_v11  ;;  %v2615_v50 = vsel %vm2567_vm7, %v2583_v48, %v2599_v49  ;;  %vm2569_vm0 = vcmp.lt.f32.partialorder %v3472_v40, 0.0 }
  0x26   :  { %v2616_v6 = vsel %vm2568_vm10, %v2584_v63, %v2600_v0 }
  0x27   :  { %3006 = vmatmul.msk.f32.gmra.mxu0 %vm125_vm1, %v116_v20  ;;  %3008 = vmatmul.msk.f32.gmra.mxu1 %vm125_vm1, %v116_v20  ;;  %vm5709_vm1 = vcmask 1045509  }
  0x28   :  { %258 = vmatpush.msrb.mxu0 %v180_v14  ;;  %323 = vmatpush.msrb.mxu1 %v181_v15 }
  0x2a   :  { %3018 = vmatmul.msk.f32.gmra.mxu2 %vm188_vm2, %v107_v21  ;;  %3035 = vmatmul.msk.f32.gmra.mxu3 %vm188_vm2, %v107_v21 }
  0x2b   :  { %259 = vmatpush.msrb.mxu0 %v178_v17  ;;  %324 = vmatpush.msrb.mxu1 %v179_v18 }
  0x2c   :  { %2645 = vrot.lane.b32.xlu1 %v2612_v35, %s3378_s2 }
  0x2f   :  { %3010 = vmatmul.msk.f32.vlgmr.msrb.gmra.mxu0 %vm188_vm2, %v99_v22  ;;  %3027 = vmatmul.msk.f32.vlgmr.msrb.gmra.mxu1 %vm188_vm2, %v99_v22 }
  0x32   :  { %3019 = vmatmul.msk.f32.gmra.mxu2 %vm188_vm2, %v108_v23  ;;  %3036 = vmatmul.msk.f32.gmra.mxu3 %vm188_vm2, %v108_v23 }
  0x34   :  { %2647 = vrot.lane.b32.xlu1 %v2613_v44, %s3378_s2 }
  0x37   :  { %3011 = vmatmul.msk.f32.gmra.mxu0 %vm188_vm2, %v100_v24  ;;  %3028 = vmatmul.msk.f32.gmra.mxu1 %vm188_vm2, %v100_v24 }
  0x3a   :  { %3020 = vmatmul.msk.f32.gmra.mxu2 %vm188_vm2, %v109_v25  ;;  %3037 = vmatmul.msk.f32.gmra.mxu3 %vm188_vm2, %v109_v25 }
  0x3c   :  { %2649 = vrot.lane.b32.xlu1 %v2614_v47, %s3378_s2 }
  0x3f   :  { %3012 = vmatmul.msk.f32.gmra.mxu0 %vm188_vm2, %v101_v26  ;;  %3029 = vmatmul.msk.f32.gmra.mxu1 %vm188_vm2, %v101_v26 }
  0x42   :  { %3021 = vmatmul.msk.f32.gmra.mxu2 %vm188_vm2, %v110_v27  ;;  %3038 = vmatmul.msk.f32.gmra.mxu3 %vm188_vm2, %v110_v27 }
  0x44   :  { %2651 = vrot.lane.b32.xlu1 %v2615_v50, %s3378_s2 }
  0x47   :  { %3013 = vmatmul.msk.f32.gmra.mxu0 %vm188_vm2, %v102_v30  ;;  %3030 = vmatmul.msk.f32.gmra.mxu1 %vm188_vm2, %v102_v30 }
  0x4a   :  { %3022 = vmatmul.msk.f32.gmra.mxu2 %vm188_vm2, %v111_v34  ;;  %3039 = vmatmul.msk.f32.gmra.mxu3 %vm188_vm2, %v111_v34 }
  0x4c   :  { %2653 = vrot.lane.b32.xlu1 %v2616_v6, %s3378_s2 }
  0x4f   :  { %3014 = vmatmul.msk.f32.gmra.mxu0 %vm188_vm2, %v103_v36  ;;  %3031 = vmatmul.msk.f32.gmra.mxu1 %vm188_vm2, %v103_v36 }
  0x52   :  { %3023 = vmatmul.msk.f32.gmra.mxu2 %vm188_vm2, %v112_v37  ;;  %3040 = vmatmul.msk.f32.gmra.mxu3 %vm188_vm2, %v112_v37 }
  0x57   :  { %3015 = vmatmul.msk.f32.gmra.mxu0 %vm188_vm2, %v104_v38  ;;  %3032 = vmatmul.msk.f32.gmra.mxu1 %vm188_vm2, %v104_v38 }
  0x5a   :  { %3024 = vmatmul.msk.f32.gmra.mxu2 %vm188_vm2, %v113_v39  ;;  %3041 = vmatmul.msk.f32.gmra.mxu3 %vm188_vm2, %v113_v39 }
  0x5f   :  { %3016 = vmatmul.msk.f32.gmra.mxu0 %vm188_vm2, %v3472_v40  ;;  %3033 = vmatmul.msk.f32.gmra.mxu1 %vm188_vm2, %v3472_v40 }
  0x62   :  { %3025 = vmatmul.msk.f32.gmra.mxu2 %vm188_vm2, %v114_v41  ;;  %3042 = vmatmul.msk.f32.gmra.mxu3 %vm188_vm2, %v114_v41  ;;  %vm5708_vm2 = vcmask 1046534  }
  0x9c   :  { %v3483_v51 = vpop.f32.mrf.mxu0  ;;  %v172_v52 = vpop.f32.mrf.mxu1 }
  0x9d   :  { %v3485_v53 = vrot.slane %v172_v52, 7 }
  0x9f   :  { %v401_v54 = vsel %vm400_vm8, %v3485_v53, %v3483_v51  ;;  %v381_v9 = vsel %vm380_vm9, %v3483_v51, %v3485_v53  ;;  %v383_v26 = vsel %vm5713_vm11, %v3483_v51, %v3485_v53 }
  0xa0   :  { %v402_v55 = vrot.slane %v401_v54, 7  ;;  %v418_v13 = vperm.slane %v381_v9, 0  ;;  %v419_v14 = vperm.slane %v381_v9, 1  ;;  %v384_v36 = vrot.slane %v383_v26, 1 }
  0xa2   :  { %v432_v57 = vperm.slane %v402_v55, 0  ;;  %v433_v58 = vperm.slane %v402_v55, 1  ;;  %v420_v48 = vperm.slane %v384_v36, 0 }
  0xa4   :  { %v3493_v59 = vpop.f32.mrf.mxu0  ;;  %v175_v60 = vpop.f32.mrf.mxu1 }
  0xa5   :  { %5715 = vst [vmem:[#allocation13_spill] sm:$0xff] %v3493_v59  ;;  %v3499_v1 = vrot.slane %v175_v60, 7  ;;  %v282_v2 = vpop.f32.mrf.mxu2  ;;  %v347_v3 = vpop.f32.mrf.mxu3 }
  0xa6   :  { %v496_v4 = vadd.f32 %v432_v57, %v282_v2  ;;  %v497_v5 = vadd.f32 %v433_v58, %v347_v3  ;;  %v386_v57 = vsel %vm5712_vm12, %v3483_v51, %v3485_v53 }
  0xa7   :  { %5716 = vst [vmem:[#allocation14_spill] sm:$0xff] %v3499_v1  ;;  %v403_v10 = vsel %vm380_vm9, %v3493_v59, %v3499_v1  ;;  %v404_v42 = vsel %vm5713_vm11, %v3493_v59, %v3499_v1  ;;  %v387_v9 = vrot.slane %v386_v57, 2 }
  0xa8   :  { %v3503_v7 = vadd.f32 %v3495_v61, %v496_v4  ;;  %v3506_v8 = vadd.f32 %v3497_v62, %v497_v5  ;;  %v434_v18 = vperm.slane %v403_v10, 0  ;;  %v435_v21 = vperm.slane %v403_v10, 1 }
  0xa9   :  { %v405_v52 = vrot.slane %v404_v42, 1  ;;  %v389_v10 = vsel %vm5711_vm13, %v3483_v51, %v3485_v53  ;;  %v3599_v26 = vperm.slane %v387_v9, 1 }
  0xaa   :  { %v3513_v11 = vmul.f32 0.70710677, %v3503_v7  ;;  %v3516_v12 = vmul.f32 0.70710677, %v3506_v8 }
  0xab   :  { %v436_v4 = vperm.slane %v405_v52, 0 }
  0xac   :  { %v1176_v15 = vmul.f32 %v3513_v11, %v3513_v11  ;;  %v1216_v16 = vmul.f32 %v3516_v12, %v3516_v12  ;;  %v261_v17 = vpop.f32.mrf.mxu0  ;;  %v326_v20 = vpop.f32.mrf.mxu1 }
  0xad   :  { %v482_v22 = vadd.f32 %v418_v13, %v261_v17  ;;  %v285_v23 = vpop.f32.mrf.mxu2  ;;  %v483_v24 = vadd.f32 %v419_v14, %v326_v20  ;;  %v350_v25 = vpop.f32.mrf.mxu3  ;;  %v3591_v17 = vsel %vm5710_vm14, %v3483_v51, %v3485_v53 }
  0xae   :  { %v3525_v27 = vmin.f32 %v1176_v15, 16.0  ;;  %v3527_v28 = vmin.f32 %v1216_v16, 16.0  ;;  %v498_v29 = vadd.f32 %v434_v18, %v285_v23  ;;  %v499_v30 = vadd.f32 %v435_v21, %v350_v25 }
  0xaf   :  { %v3530_v31 = vadd.f32 %v3495_v61, %v482_v22  ;;  %v3533_v32 = vadd.f32 %v3497_v62, %v483_v24  ;;  %v421_v21 = vperm.slane %v384_v36, 1  ;;  %v390_v22 = vrot.slane %v389_v10, 3 }
  0xb0   :  { %5717 = vst [vmem:[#allocation15_spill] sm:$0xff] %v3525_v27  ;;  %v1178_v33 = vmul.f32 2.1237322e-06, %v3525_v27  ;;  %v1218_v34 = vmul.f32 2.1237322e-06, %v3527_v28  ;;  %v3538_v35 = vadd.f32 %v3495_v61, %v498_v29  ;;  %v3547_v39 = vadd.f32 %v3497_v62, %v499_v30 }
  0xb1   :  { %5718 = vst [vmem:[#allocation16_spill] sm:$0xff] %v3527_v28  ;;  %v3541_v37 = vmul.f32 0.70710677, %v3530_v31  ;;  %v3544_v38 = vmul.f32 0.70710677, %v3533_v32  ;;  %v3597_v25 = vperm.slane %v387_v9, 0  ;;  %v408_v36 = vsel %vm5711_vm13, %v3493_v59, %v3499_v1 }
  0xb2   :  { %v1179_v41 = vadd.f32 0.00028619796, %v1178_v33  ;;  %v3555_v44 = vmul.f32 0.70710677, %v3538_v35  ;;  %v1219_v45 = vadd.f32 0.00028619796, %v1218_v34  ;;  %v406_v34 = vsel %vm5712_vm12, %v3493_v59, %v3499_v1 }
  0xb3   :  { %v616_v43 = vmul.f32 %v3541_v37, %v3541_v37  ;;  %v656_v46 = vmul.f32 %v3544_v38, %v3544_v38  ;;  %v3561_v50 = vmul.f32 0.70710677, %v3547_v39 }
  0xb4   :  { %v264_v47 = vpop.f32.mrf.mxu0  ;;  %v1180_v49 = vmul.f32 %v1179_v41, %v3525_v27  ;;  %v1256_v55 = vmul.f32 %v3555_v44, %v3555_v44  ;;  %v1220_v58 = vmul.f32 %v1219_v45, %v3527_v28  ;;  %v329_v30 = vpop.f32.mrf.mxu1  ;;  %v5663_v41 = vrot.slane %v3591_v17, 4 }
  0xb5   :  { %v3563_v54 = vmin.f32 %v616_v43, 16.0  ;;  %v484_v56 = vadd.f32 %v420_v48, %v264_v47  ;;  %v3571_v60 = vmin.f32 %v656_v46, 16.0  ;;  %v288_v0 = vpop.f32.mrf.mxu2  ;;  %v1296_v3 = vmul.f32 %v3561_v50, %v3561_v50  ;;  %v353_v33 = vpop.f32.mrf.mxu3 }
  0xb6   :  { %v1181_v2 = vadd.f32 0.0036580483, %v1180_v49  ;;  %v3579_v6 = vmin.f32 %v1256_v55, 16.0  ;;  %v500_v13 = vadd.f32 %v436_v4, %v288_v0  ;;  %v1221_v14 = vadd.f32 0.0036580483, %v1220_v58 }
  0xb7   :  { %5719 = vst [vmem:[#allocation17_spill] sm:$0xff] %v3563_v54  ;;  %v3574_v63 = vadd.f32 %v3495_v61, %v484_v56  ;;  %v618_v5 = vmul.f32 2.1237322e-06, %v3563_v54  ;;  %v658_v15 = vmul.f32 2.1237322e-06, %v3571_v60  ;;  %v3594_v20 = vmin.f32 %v1296_v3, 16.0 }
  0xb8   :  { %5720 = vst [vmem:[#allocation18_spill] sm:$0xff] %v3571_v60  ;;  %v1182_v18 = vmul.f32 %v1181_v2, %v3525_v27  ;;  %v1258_v24 = vmul.f32 2.1237322e-06, %v3579_v6  ;;  %v3602_v29 = vadd.f32 %v3495_v61, %v500_v13  ;;  %v1222_v42 = vmul.f32 %v1221_v14, %v3527_v28 }
  0xb9   :  { %v3586_v16 = vmul.f32 0.70710677, %v3574_v63  ;;  %v619_v23 = vadd.f32 0.00028619796, %v618_v5  ;;  %v659_v43 = vadd.f32 0.00028619796, %v658_v15  ;;  %v485_v58 = vadd.f32 %v421_v21, %v329_v30 }
  0xba   :  { %v437_v46 = vperm.slane %v405_v52, 1  ;;  %v1183_v47 = vadd.f32 0.05243302, %v1182_v18  ;;  %v1298_v48 = vmul.f32 2.1237322e-06, %v3594_v20  ;;  %v3615_v49 = vperm.slane %v390_v22, 0 }
  0xbb   :  { %v696_v45 = vmul.f32 %v3586_v16, %v3586_v16  ;;  %v3617_v55 = vperm.slane %v390_v22, 1  ;;  %v620_v56 = vmul.f32 %v619_v23, %v3563_v54  ;;  %v1259_v57 = vadd.f32 0.00028619796, %v1258_v24 }
  0xbc   :  { %v501_v0 = vadd.f32 %v437_v46, %v353_v33  ;;  %v3621_v2 = vmul.f32 0.70710677, %v3602_v29  ;;  %v407_v3 = vrot.slane %v406_v34, 2  ;;  %v409_v4 = vrot.slane %v408_v36, 3  ;;  %v332_v36 = vpop.f32.mrf.mxu1 }
  0xbd   :  { %v3625_v52 = vperm.slane %v5663_v41, 0  ;;  %v1223_v5 = vadd.f32 0.05243302, %v1222_v42  ;;  %v660_v9 = vmul.f32 %v659_v43, %v3571_v60  ;;  %v3628_v10 = vmin.f32 %v696_v45, 16.0 }
  0xbe   :  { %v3633_v13 = vsel %vm5710_vm14, %v3493_v59, %v3499_v1  ;;  %v3636_v14 = vmul.f32 0.5, %v3503_v7  ;;  %v1184_v15 = vmul.f32 %v1183_v47, %v3525_v27  ;;  %v3640_v18 = vmul.f32 0.5, %v3506_v8 }
  0xbf   :  { %v1299_v21 = vadd.f32 0.00028619796, %v1298_v48  ;;  %v621_v22 = vadd.f32 0.0036580483, %v620_v56  ;;  %v1260_v23 = vmul.f32 %v1259_v57, %v3579_v6  ;;  %v3644_v24 = vadd.f32 %v3497_v62, %v485_v58 }
  0xc0   :  { %5721 = vst [vmem:[#allocation19_spill] sm:$0xff] %v3636_v14  ;;  %v3647_v30 = vadd.f32 %v3497_v62, %v501_v0  ;;  %v1336_v33 = vmul.f32 %v3621_v2, %v3621_v2  ;;  %v438_v7 = vperm.slane %v407_v3, 0  ;;  %v439_v34 = vperm.slane %v407_v3, 1 }
  0xc1   :  { %5722 = vst [vmem:[#allocation20_spill] sm:$0xff] %v3640_v18  ;;  %v1224_v8 = vmul.f32 %v1223_v5, %v3527_v28  ;;  %v661_v42 = vadd.f32 0.0036580483, %v660_v9  ;;  %v698_v43 = vmul.f32 2.1237322e-06, %v3628_v10  ;;  %v3654_v45 = vperm.slane %v409_v4, 0  ;;  %v267_v5 = vpop.f32.mrf.mxu0  ;;  %v291_v9 = vpop.f32.mrf.mxu2 }
  0xc2   :  { %v1185_v46 = vadd.f32 0.18741608, %v1184_v15  ;;  %v3657_v47 = vmul.f32 0.5, %v3530_v31  ;;  %v1300_v48 = vmul.f32 %v1299_v21, %v3594_v20  ;;  %v3660_v56 = vperm.slane %v409_v4, 1 }
  0xc3   :  { %v622_v57 = vmul.f32 %v621_v22, %v3563_v54  ;;  %v1261_v58 = vadd.f32 0.0036580483, %v1260_v23  ;;  %v3664_v0 = vmul.f32 0.70710677, %v3644_v24  ;;  %v3667_v3 = vmul.f32 0.70710677, %v3647_v30 }
  0xc4   :  { %5723 = vst [vmem:[#allocation21_spill] sm:$0xff] %v3657_v47  ;;  %v3670_v15 = vmul.f32 0.5, %v3538_v35  ;;  %v3673_v31 = vmul.f32 0.5, %v3533_v32  ;;  %v3676_v4 = vmul.f32 0.5, %v3547_v39  ;;  %v3678_v21 = vmin.f32 %v1336_v33, 16.0 }
  0xc5   :  { %v1225_v22 = vadd.f32 0.18741608, %v1224_v8  ;;  %v662_v23 = vmul.f32 %v661_v42, %v3571_v60  ;;  %v699_v41 = vadd.f32 0.00028619796, %v698_v43  ;;  %v1186_v18 = vmul.f32 %v1185_v46, %v3525_v27 }
  0xc6   :  { %5724 = vst [vmem:[#allocation22_spill] sm:$0xff] %v3670_v15  ;;  %v736_v35 = vmul.f32 %v3664_v0, %v3664_v0  ;;  %v486_v32 = vadd.f32 %v3597_v25, %v267_v5  ;;  %v356_v15 = vpop.f32.mrf.mxu3  ;;  %v623_v39 = vadd.f32 0.05243302, %v622_v57  ;;  %v1262_v33 = vmul.f32 %v1261_v58, %v3579_v6 }
  0xc7   :  { %5725 = vst [vmem:[#allocation23_spill] sm:$0xff] %v3673_v31  ;;  %v502_v31 = vadd.f32 %v438_v7, %v291_v9  ;;  %v1376_v8 = vmul.f32 %v3667_v3, %v3667_v3  ;;  %v1338_v42 = vmul.f32 2.1237322e-06, %v3678_v21  ;;  %v487_v47 = vadd.f32 %v3599_v26, %v332_v36 }
  0xc8   :  { %5726 = vst [vmem:[#allocation24_spill] sm:$0xff] %v3676_v4  ;;  %v1301_v4 = vadd.f32 0.0036580483, %v1300_v48  ;;  %v3691_v43 = vadd.f32 %v3495_v61, %v486_v32  ;;  %v1226_v25 = vmul.f32 %v1225_v22, %v3527_v28  ;;  %v663_v7 = vadd.f32 0.05243302, %v662_v23 }
  0xc9   :  { %5727 = vst [vmem:[#allocation25_spill] sm:$0xff] %v3678_v21  ;;  %v3694_v46 = vadd.f32 %v3495_v61, %v502_v31  ;;  %v700_v57 = vmul.f32 %v699_v41, %v3628_v10  ;;  %v503_v58 = vadd.f32 %v439_v34, %v356_v15  ;;  %v1187_v48 = vadd.f32 1.1283791, %v1186_v18 }
  0xca   :  { %v3701_v5 = vmul.f32 0.5, %v3574_v63  ;;  %v3703_v9 = vmin.f32 %v736_v35, 16.0  ;;  %v3706_v32 = vmul.f32 0.70710677, %v3691_v43  ;;  %v624_v31 = vmul.f32 %v623_v39, %v3563_v54 }
  0xcb   :  { %v1302_v26 = vmul.f32 %v1301_v4, %v3594_v20  ;;  %v3710_v36 = vmin.f32 %v1376_v8, 16.0  ;;  %v3713_v41 = vmul.f32 0.70710677, %v3694_v46  ;;  %v1263_v34 = vadd.f32 0.05243302, %v1262_v33 }
  0xcc   :  { %5728 = vst [vmem:[#allocation26_spill] sm:$0xff] %v3701_v5  ;;  %v1339_v15 = vadd.f32 0.00028619796, %v1338_v42  ;;  %v776_v63 = vmul.f32 %v3706_v32, %v3706_v32  ;;  %v3718_v18 = vadd.f32 %v3497_v62, %v487_v47  ;;  %v1227_v22 = vadd.f32 1.1283791, %v1226_v25 }
  0xcd   :  { %5729 = vst [vmem:[#allocation27_spill] sm:$0xff] %v3703_v9  ;;  %v701_v23 = vadd.f32 0.0036580483, %v700_v57  ;;  %v1416_v35 = vmul.f32 %v3713_v41, %v3713_v41  ;;  %v3723_v4 = vadd.f32 %v3497_v62, %v503_v58  ;;  %v664_v39 = vmul.f32 %v663_v7, %v3571_v60 }
  0xce   :  { %5730 = vst [vmem:[#allocation28_spill] sm:$0xff] %v3710_v36  ;;  %v3727_v8 = vmul.f32 0.5, %v3602_v29  ;;  %v738_v33 = vmul.f32 2.1237322e-06, %v3703_v9  ;;  %v3731_v42 = vmul.f32 0.70710677, %v3718_v18  ;;  %v3734_v47 = vmul.f32 %v1187_v48, %v3513_v11 }
  0xcf   :  { %v1303_v25 = vadd.f32 0.05243302, %v1302_v26  ;;  %v1378_v57 = vmul.f32 2.1237322e-06, %v3710_v36  ;;  %v3737_v5 = vmin.f32 %v776_v63, 16.0  ;;  %v1264_v14 = vmul.f32 %v1263_v34, %v3579_v6 }
  0xd0   :  { %5731 = vst [vmem:[#allocation29_spill] sm:$0xff] %v3727_v8  ;;  %v625_v58 = vadd.f32 0.18741608, %v624_v31  ;;  %v1340_v7 = vmul.f32 %v1339_v15, %v3678_v21  ;;  %v816_v29 = vmul.f32 %v3731_v42, %v3731_v42  ;;  %v3744_v8 = vmul.f32 %v1227_v22, %v3516_v12 }
  0xd1   :  { %5732 = vst [vmem:[#allocation30_spill] sm:$0xff] %v3731_v42  ;;  %v702_v28 = vmul.f32 %v701_v23, %v3628_v10  ;;  %v3747_v11 = vmin.f32 %v1416_v35, 16.0  ;;  %v3750_v48 = vmul.f32 0.70710677, %v3723_v4  ;;  %v665_v26 = vadd.f32 0.18741608, %v664_v39 }
  0xd2   :  { %5733 = vst [vmem:[#allocation31_spill] sm:$0xff] %v3734_v47  ;;  %v739_v63 = vadd.f32 0.00028619796, %v738_v33  ;;  %v3752_v31 = vmin.f32 %v816_v29, 16.0  ;;  %v2602_v34 = vfloor.f32 %v3434_v19  ;;  %v1304_v15 = vmul.f32 %v1303_v25, %v3594_v20  ;;  %v270_v33 = vpop.f32.mrf.mxu0 }
  0xd3   :  { %5734 = vst [vmem:[#allocation32_spill] sm:$0xff] %v3737_v5  ;;  %v1379_v47 = vadd.f32 0.00028619796, %v1378_v57  ;;  %v778_v27 = vmul.f32 2.1237322e-06, %v3737_v5  ;;  %v1456_v12 = vmul.f32 %v3750_v48, %v3750_v48  ;;  %v626_v22 = vmul.f32 %v625_v58, %v3563_v54 }
  0xd4   :  { %5735 = vst [vmem:[#allocation33_spill] sm:$0xff] %v3744_v8  ;;  %v1265_v23 = vadd.f32 0.18741608, %v1264_v14  ;;  %v1341_v35 = vadd.f32 0.0036580483, %v1340_v7  ;;  %v5739_v8 = vceil.f32 %v3434_v19  ;;  %v740_v57 = vmul.f32 %v739_v63, %v3703_v9 }
  0xd5   :  { %5736 = vst [vmem:[#allocation34_spill] sm:$0xff] %v3747_v11  ;;  %v703_v29 = vadd.f32 0.05243302, %v702_v28  ;;  %v1418_v59 = vmul.f32 2.1237322e-06, %v3747_v11  ;;  %v3765_v25 = vmin.f32 %v1456_v12, 16.0  ;;  %v2585_v58 = vceil.f32 %v3472_v40  ;;  %v294_v12 = vpop.f32.mrf.mxu2 }
  0xd6   :  { %5737 = vst [vmem:[#allocation35_spill] sm:$0xff] %v3750_v48  ;;  %v2618_v39 = vsel %vm2570_vm15, %v5739_v8, %v2602_v34  ;;  %v818_v14 = vmul.f32 2.1237322e-06, %v3752_v31  ;;  %v2601_v7 = vfloor.f32 %v3472_v40  ;;  %v666_v19 = vmul.f32 %v665_v26, %v3571_v60 }
  0xd7   :  { %5738 = vst [vmem:[#allocation36_spill] sm:$0xff] %v3752_v31  ;;  %2657 = vrot.lane.b32.xlu0 %v2618_v39, %s3378_s2  ;;  %v1380_v28 = vmul.f32 %v1379_v47, %v3710_v36  ;;  %v779_v8 = vadd.f32 0.00028619796, %v778_v27  ;;  %v488_v34 = vadd.f32 %v3615_v49, %v270_v33  ;;  %v1305_v54 = vadd.f32 0.18741608, %v1304_v15  ;;  %v335_v27 = vpop.f32.mrf.mxu1 }
  0xd8   :  { %5740 = vst [vmem:[#allocation37_spill] sm:$0xff] %v3765_v25  ;;  %v3777_v39 = vmul.f32 0.5, %v3644_v24  ;;  %v1458_v63 = vmul.f32 2.1237322e-06, %v3765_v25  ;;  %v2617_v48 = vsel %vm2569_vm0, %v2585_v58, %v2601_v7  ;;  %v704_v1 = vmul.f32 %v703_v29, %v3628_v10 }
  0xd9   :  { %v1342_v42 = vmul.f32 %v1341_v35, %v3678_v21  ;;  %v1419_v40 = vadd.f32 0.00028619796, %v1418_v59  ;;  %2655 = vrot.lane.b32.xlu2 %v2617_v48, %s3378_s2  ;;  %v3784_v47 = vadd.f32 %v3495_v61, %v488_v34  ;;  %v1266_v49 = vmul.f32 %v1265_v23, %v3579_v6 }
  0xda   :  { %5741 = vst [vmem:[#allocation38_spill] sm:$0xff] %v3777_v39  ;;  %v741_v26 = vadd.f32 0.0036580483, %v740_v57  ;;  %v819_v15 = vadd.f32 0.00028619796, %v818_v14  ;;  %v504_v24 = vadd.f32 %v3654_v45, %v294_v12  ;;  %v3789_v58 = vmul.f32 0.5, %v3647_v30  ;;  %v359_v39 = vpop.f32.mrf.mxu3 }
  0xdb   :  { %v627_v33 = vadd.f32 1.1283791, %v626_v22  ;;  %v1381_v29 = vadd.f32 0.0036580483, %v1380_v28  ;;  %v780_v35 = vmul.f32 %v779_v8, %v3737_v5  ;;  %v667_v59 = vadd.f32 1.1283791, %v666_v19 }
  0xdc   :  { %5742 = vst [vmem:[#allocation39_spill] sm:$0xff] %v3789_v58  ;;  %v1306_v48 = vmul.f32 %v1305_v54, %v3594_v20  ;;  %v1459_v7 = vadd.f32 0.00028619796, %v1458_v63  ;;  %v489_v34 = vadd.f32 %v3617_v55, %v335_v27  ;;  %v705_v60 = vadd.f32 0.18741608, %v704_v1 }
  0xdd   :  { %v1343_v23 = vadd.f32 0.05243302, %v1342_v42  ;;  %v1420_v57 = vmul.f32 %v1419_v40, %v3747_v11  ;;  %v3796_v45 = vmul.f32 0.70710677, %v3784_v47  ;;  %v1267_v22 = vadd.f32 1.1283791, %v1266_v49 }
  0xde   :  { %v742_v30 = vmul.f32 %v741_v26, %v3703_v9  ;;  %v820_v14 = vmul.f32 %v819_v15, %v3752_v31  ;;  %v3801_v19 = vadd.f32 %v3495_v61, %v504_v24  ;;  %v1382_v54 = vmul.f32 %v1381_v29, %v3710_v36 }
  0xdf   :  { %v781_v28 = vadd.f32 0.0036580483, %v780_v35  ;;  %v856_v1 = vmul.f32 %v3796_v45, %v3796_v45  ;;  %v505_v55 = vadd.f32 %v3660_v56, %v359_v39  ;;  %v3808_v42 = vmul.f32 %v627_v33, %v3541_v37  ;;  %v273_v35 = vpop.f32.mrf.mxu0 }
  0xe0   :  { %v1307_v8 = vadd.f32 1.1283791, %v1306_v48  ;;  %v1460_v12 = vmul.f32 %v1459_v7, %v3765_v25  ;;  %v3812_v63 = vadd.f32 %v3497_v62, %v489_v34  ;;  %v706_v40 = vmul.f32 %v705_v60, %v3628_v10 }
  0xe1   :  { %5743 = vst [vmem:[#allocation40_spill] sm:$0xff] %v3808_v42  ;;  %v1344_v27 = vmul.f32 %v1343_v23, %v3678_v21  ;;  %v1421_v49 = vadd.f32 0.0036580483, %v1420_v57  ;;  %v3816_v26 = vmin.f32 %v856_v1, 16.0  ;;  %v3819_v15 = vmul.f32 %v667_v59, %v3544_v38 }
  0xe2   :  { %v821_v56 = vadd.f32 0.0036580483, %v820_v14  ;;  %v3822_v37 = vmul.f32 0.70710677, %v3801_v19  ;;  %v3825_v39 = vadd.f32 %v3497_v62, %v505_v55  ;;  %v3828_v24 = vmul.f32 %v1267_v22, %v3555_v44 }
  0xe3   :  { %5744 = vst [vmem:[#allocation41_spill] sm:$0xff] %v3816_v26  ;;  %v743_v33 = vadd.f32 0.05243302, %v742_v30  ;;  %v1383_v60 = vadd.f32 0.05243302, %v1382_v54  ;;  %v782_v29 = vmul.f32 %v781_v28, %v3737_v5  ;;  %v3832_v48 = vmul.f32 %v1307_v8, %v3561_v50  ;;  %v297_v54 = vpop.f32.mrf.mxu2 }
  0xe4   :  { %5745 = vst [vmem:[#allocation42_spill] sm:$0xff] %v3819_v15  ;;  %v1461_v38 = vadd.f32 0.0036580483, %v1460_v12  ;;  %v858_v59 = vmul.f32 2.1237322e-06, %v3816_v26  ;;  %v3839_v57 = vmul.f32 0.5, %v3691_v43  ;;  %v1422_v44 = vmul.f32 %v1421_v49, %v3747_v11 }
  0xe5   :  { %5746 = vst [vmem:[#allocation43_spill] sm:$0xff] %v3832_v48  ;;  %v3836_v7 = vmul.f32 0.70710677, %v3812_v63  ;;  %v707_v34 = vadd.f32 1.1283791, %v706_v40  ;;  %v822_v22 = vmul.f32 %v821_v56, %v3752_v31  ;;  %v1496_v30 = vmul.f32 %v3822_v37, %v3822_v37 }
  0xe6   :  { %v1345_v23 = vadd.f32 0.18741608, %v1344_v27  ;;  %5747 = vst [vmem:[#allocation44_spill] sm:$0xff] %v3839_v57  ;;  %v3846_v50 = vmul.f32 0.70710677, %v3825_v39  ;;  %v490_v14 = vadd.f32 %v3625_v52, %v273_v35  ;;  %v744_v28 = vmul.f32 %v743_v33, %v3703_v9 }
  0xe7   :  { %v1384_v1 = vmul.f32 %v1383_v60, %v3710_v36  ;;  %v783_v55 = vadd.f32 0.05243302, %v782_v29  ;;  %v5748_v43 = vrot.slane %v3633_v13, 4  ;;  %v1462_v12 = vmul.f32 %v1461_v38, %v3765_v25 }
  0xe8   :  { %v859_v40 = vadd.f32 0.00028619796, %v858_v59  ;;  %v896_v27 = vmul.f32 %v3836_v7, %v3836_v7  ;;  %v3857_v49 = vadd.f32 %v3495_v61, %v490_v14  ;;  %v1346_v52 = vmul.f32 %v1345_v23, %v3678_v21 }
  0xe9   :  { %v442_v8 = vperm.slane %v5748_v43, 0  ;;  %v1423_v56 = vadd.f32 0.05243302, %v1422_v44  ;;  %v1536_v33 = vmul.f32 %v3846_v50, %v3846_v50  ;;  %v3863_v29 = vmul.f32 0.5, %v3694_v46 }
  0xea   :  { %v823_v35 = vadd.f32 0.05243302, %v822_v22  ;;  %v3865_v43 = vmin.f32 %v1496_v30, 16.0  ;;  %v3868_v38 = vmul.f32 0.70710677, %v3857_v49  ;;  %v784_v14 = vmul.f32 %v783_v55, %v3737_v5 }
  0xeb   :  { %v506_v60 = vadd.f32 %v442_v8, %v297_v54  ;;  %5749 = vst [vmem:[#allocation45_spill] sm:$0xff] %v3863_v29  ;;  %v745_v59 = vadd.f32 0.18741608, %v744_v28  ;;  %v1385_v57 = vadd.f32 0.18741608, %v1384_v1  ;;  %v860_v58 = vmul.f32 %v859_v40, %v3816_v26 }
  0xec   :  { %v1463_v44 = vadd.f32 0.05243302, %v1462_v12  ;;  %v3875_v54 = vmin.f32 %v896_v27, 16.0  ;;  %v936_v46 = vmul.f32 %v3868_v38, %v3868_v38  ;;  %v1347_v22 = vadd.f32 1.1283791, %v1346_v52  ;;  %v338_v27 = vpop.f32.mrf.mxu1 }
  0xed   :  { %v3872_v23 = vadd.f32 %v3495_v61, %v506_v60  ;;  %v1424_v30 = vmul.f32 %v1423_v56, %v3747_v11  ;;  %v3881_v8 = vmul.f32 0.5, %v3718_v18  ;;  %v3883_v28 = vmin.f32 %v1536_v33, 16.0 }
  0xee   :  { %v824_v1 = vmul.f32 %v823_v35, %v3752_v31  ;;  %v3887_v55 = vmul.f32 0.5, %v3723_v4  ;;  %v1498_v12 = vmul.f32 2.1237322e-06, %v3865_v43  ;;  %v3890_v40 = vmin.f32 %v936_v46, 16.0 }
  0xef   :  { %5750 = vst [vmem:[#allocation46_spill] sm:$0xff] %v3881_v8  ;;  %v746_v60 = vmul.f32 %v745_v59, %v3703_v9  ;;  %v785_v52 = vadd.f32 0.18741608, %v784_v14  ;;  %v3894_v56 = vmul.f32 0.70710677, %v3872_v23  ;;  %v5752_v18 = vrot.slane %v3591_v17, 4  ;;  %v362_v8 = vpop.f32.mrf.mxu3 }
  0xf0   :  { %5751 = vst [vmem:[#allocation47_spill] sm:$0xff] %v3887_v55  ;;  %v1386_v29 = vmul.f32 %v1385_v57, %v3710_v36  ;;  %v1464_v35 = vmul.f32 %v1463_v44, %v3765_v25  ;;  %v861_v4 = vadd.f32 0.0036580483, %v860_v58  ;;  %v898_v55 = vmul.f32 2.1237322e-06, %v3875_v54 }
  0xf1   :  { %v427_v33 = vperm.slane %v5752_v18, 1  ;;  %v1425_v46 = vadd.f32 0.18741608, %v1424_v30  ;;  %v1538_v15 = vmul.f32 2.1237322e-06, %v3883_v28  ;;  %v5753_v59 = vrot.slane %v3633_v13, 4 }
  0xf2   :  { %v3905_v21 = vmul.f32 %v707_v34, %v3586_v16  ;;  %v825_v17 = vadd.f32 0.18741608, %v824_v1  ;;  %v1499_v18 = vadd.f32 0.00028619796, %v1498_v12  ;;  %v938_v57 = vmul.f32 2.1237322e-06, %v3890_v40 }
  0xf3   :  { %v491_v42 = vadd.f32 %v427_v33, %v338_v27  ;;  %v443_v14 = vperm.slane %v5753_v59, 1  ;;  %v747_v36 = vadd.f32 1.1283791, %v746_v60  ;;  %v786_v58 = vmul.f32 %v785_v52, %v3737_v5 }
  0xf4   :  { %5754 = vst [vmem:[#allocation48_spill] sm:$0xff] %v3905_v21  ;;  %v1576_v44 = vmul.f32 %v3894_v56, %v3894_v56  ;;  %v1387_v48 = vadd.f32 1.1283791, %v1386_v29  ;;  %v1465_v9 = vadd.f32 0.18741608, %v1464_v35  ;;  %v862_v27 = vmul.f32 %v861_v4, %v3816_v26 }
  0xf5   :  { %v507_v30 = vadd.f32 %v443_v14, %v362_v8  ;;  %v899_v13 = vadd.f32 0.00028619796, %v898_v55  ;;  %v3913_v33 = vmul.f32 %v1347_v22, %v3621_v2  ;;  %v1426_v16 = vmul.f32 %v1425_v46, %v3747_v11 }
  0xf6   :  { %v1539_v34 = vadd.f32 0.00028619796, %v1538_v15  ;;  %v3917_v1 = vadd.f32 %v3497_v62, %v491_v42  ;;  %v826_v12 = vmul.f32 %v825_v17, %v3752_v31  ;;  %v3921_v60 = vmul.f32 0.5, %v3784_v47 }
  0xf7   :  { %5755 = vst [vmem:[#allocation49_spill] sm:$0xff] %v3913_v33  ;;  %v1500_v29 = vmul.f32 %v1499_v18, %v3865_v43  ;;  %v939_v8 = vadd.f32 0.00028619796, %v938_v57  ;;  %v3925_v52 = vmul.f32 %v747_v36, %v3664_v0  ;;  %v787_v55 = vadd.f32 1.1283791, %v786_v58 }
  0xf8   :  { %5756 = vst [vmem:[#allocation50_spill] sm:$0xff] %v3921_v60  ;;  %v3927_v2 = vmin.f32 %v1576_v44, 16.0  ;;  %v3930_v22 = vadd.f32 %v3497_v62, %v507_v30  ;;  %v3933_v42 = vmul.f32 %v1387_v48, %v3667_v3  ;;  %v1466_v15 = vmul.f32 %v1465_v9, %v3765_v25  ;;  %v300_v60 = vpop.f32.mrf.mxu2 }
  0xf9   :  { %5757 = vst [vmem:[#allocation51_spill] sm:$0xff] %v3925_v52  ;;  %v863_v35 = vadd.f32 0.05243302, %v862_v27  ;;  %v900_v47 = vmul.f32 %v899_v13, %v3875_v54  ;;  %v1427_v4 = vadd.f32 1.1283791, %v1426_v16  ;;  %v3938_v46 = vmul.f32 0.5, %v3801_v19 }
  0xfa   :  { %5758 = vst [vmem:[#allocation52_spill] sm:$0xff] %v3933_v42  ;;  %v1540_v0 = vmul.f32 %v1539_v34, %v3883_v28  ;;  %v3942_v36 = vmul.f32 0.70710677, %v3917_v1  ;;  %v827_v59 = vadd.f32 1.1283791, %v826_v12  ;;  %v3945_v17 = vmul.f32 0.5, %v3812_v63 }
  0xfb   :  { %5759 = vst [vmem:[#allocation53_spill] sm:$0xff] %v3938_v46  ;;  %v1501_v14 = vadd.f32 0.0036580483, %v1500_v29  ;;  %v940_v3 = vmul.f32 %v939_v8, %v3890_v40  ;;  %v3949_v9 = vmul.f32 %v787_v55, %v3706_v32  ;;  %v3952_v48 = vmul.f32 0.5, %v3825_v39  ;;  %v5764_v27 = vld [vmem:[#allocation30_spill] sm:$0xff]  ;;  %v5767_v29 = vld [vmem:[#allocation13_spill] sm:$0xff] }
  0xfc   :  { %5760 = vst [vmem:[#allocation54_spill] sm:$0xff] %v3945_v17  ;;  %v1578_v19 = vmul.f32 2.1237322e-06, %v3927_v2  ;;  %v3956_v18 = vmul.f32 0.70710677, %v3930_v22  ;;  %v864_v58 = vmul.f32 %v863_v35, %v3816_v26  ;;  %v3960_v63 = vmul.f32 %v1427_v4, %v3713_v41  ;;  %v5766_v12 = vld [vmem:[#allocation14_spill] sm:$0xff] }
  0xfd   :  { %5761 = vst [vmem:[#allocation55_spill] sm:$0xff] %v3949_v9  ;;  %v1467_v57 = vadd.f32 1.1283791, %v1466_v15  ;;  %v901_v44 = vadd.f32 0.0036580483, %v900_v47  ;;  %v976_v32 = vmul.f32 %v3942_v36, %v3942_v36  ;;  %v395_v39 = vsel %vm5709_vm1, %v3483_v51, %v3485_v53  ;;  %v5768_v47 = vld [vmem:[#allocation35_spill] sm:$0xff] }
  0xfe   :  { %5762 = vst [vmem:[#allocation56_spill] sm:$0xff] %v3952_v48  ;;  %v1541_v30 = vadd.f32 0.0036580483, %v1540_v0  ;;  %v3968_v13 = vmul.f32 %v827_v59, %v5764_v27  ;;  %v1502_v16 = vmul.f32 %v1501_v14, %v3865_v43  ;;  %v941_v34 = vadd.f32 0.0036580483, %v940_v3  ;;  %v276_v14 = vpop.f32.mrf.mxu0 }
  0xff   :  { %5763 = vst [vmem:[#allocation57_spill] sm:$0xff] %v3960_v63  ;;  %v412_v8 = vsel %vm5709_vm1, %v5767_v29, %v5766_v12  ;;  %v1579_v41 = vadd.f32 0.00028619796, %v1578_v19  ;;  %v1616_v55 = vmul.f32 %v3956_v18, %v3956_v18  ;;  %v396_v15 = vrot.slane %v395_v39, 5 }
 0x100   :  { %5765 = vst [vmem:[#allocation30_spill] sm:$0xff] %v3968_v13  ;;  %v413_v35 = vrot.slane %v412_v8, 5  ;;  %v3977_v4 = vmul.f32 %v1467_v57, %v5768_v47  ;;  %v865_v0 = vadd.f32 0.18741608, %v864_v58  ;;  %v902_v59 = vmul.f32 %v901_v44, %v3875_v54  ;;  %v341_v8 = vpop.f32.mrf.mxu1 }
 0x101   :  { %v3981_v27 = vmul.f32 0.5, %v3857_v49  ;;  %v1542_v3 = vmul.f32 %v1541_v30, %v3883_v28  ;;  %v3984_v17 = vmin.f32 %v976_v32, 16.0  ;;  %v428_v19 = vperm.slane %v396_v15, 0 }
 0x102   :  { %5769 = vst [vmem:[#allocation14_spill] sm:$0xff] %v3977_v4  ;;  %v444_v63 = vperm.slane %v413_v35, 0  ;;  %v1503_v48 = vadd.f32 0.05243302, %v1502_v16  ;;  %v942_v39 = vmul.f32 %v941_v34, %v3890_v40  ;;  %v429_v57 = vperm.slane %v396_v15, 1  ;;  %v365_v4 = vpop.f32.mrf.mxu3 }
 0x103   :  { %5770 = vst [vmem:[#allocation13_spill] sm:$0xff] %v3981_v27  ;;  %v445_v47 = vperm.slane %v413_v35, 1  ;;  %v1580_v58 = vmul.f32 %v1579_v41, %v3927_v2  ;;  %v3988_v44 = vmin.f32 %v1616_v55, 16.0  ;;  %v492_v49 = vadd.f32 %v428_v19, %v276_v14 }
 0x104   :  { %v508_v27 = vadd.f32 %v444_v63, %v300_v60  ;;  %v903_v46 = vadd.f32 0.05243302, %v902_v59  ;;  %v493_v30 = vadd.f32 %v429_v57, %v341_v8  ;;  %v1543_v13 = vadd.f32 0.05243302, %v1542_v3 }
 0x105   :  { %v509_v32 = vadd.f32 %v445_v47, %v365_v4  ;;  %v978_v9 = vmul.f32 2.1237322e-06, %v3984_v17  ;;  %v3992_v16 = vadd.f32 %v3495_v61, %v492_v49  ;;  %v943_v15 = vadd.f32 0.05243302, %v942_v39 }
 0x106   :  { %v3995_v34 = vadd.f32 %v3495_v61, %v508_v27  ;;  %v3998_v41 = vmul.f32 0.5, %v3872_v23  ;;  %v4001_v60 = vadd.f32 %v3497_v62, %v493_v30  ;;  %v1581_v55 = vadd.f32 0.0036580483, %v1580_v58  ;;  %v279_v58 = vpop.f32.mrf.mxu0 }
 0x107   :  { %v4004_v63 = vadd.f32 %v3497_v62, %v509_v32  ;;  %v1618_v35 = vmul.f32 2.1237322e-06, %v3988_v44  ;;  %v4008_v4 = vmul.f32 0.70710677, %v3992_v16  ;;  %v398_v59 = vsel %vm5708_vm2, %v3483_v51, %v3485_v53 }
 0x108   :  { %5771 = vst [vmem:[#allocation35_spill] sm:$0xff] %v3998_v41  ;;  %v866_v27 = vmul.f32 %v865_v0, %v3816_v26  ;;  %v1504_v23 = vmul.f32 %v1503_v48, %v3865_v43  ;;  %v904_v14 = vmul.f32 %v903_v46, %v3875_v54  ;;  %v4017_v3 = vmul.f32 0.70710677, %v3995_v34 }
 0x109   :  { %v1544_v19 = vmul.f32 %v1543_v13, %v3883_v28  ;;  %v979_v39 = vadd.f32 0.00028619796, %v978_v9  ;;  %v1016_v8 = vmul.f32 %v4008_v4, %v4008_v4  ;;  %v4023_v57 = vmul.f32 0.70710677, %v4001_v60 }
 0x10a   :  { %v944_v51 = vmul.f32 %v943_v15, %v3890_v40  ;;  %v1656_v53 = vmul.f32 %v4017_v3, %v4017_v3  ;;  %v4029_v48 = vmul.f32 0.70710677, %v4004_v63  ;;  %v399_v46 = vrot.slane %v398_v59, 6  ;;  %v368_v5 = vpop.f32.mrf.mxu3 }
 0x10b   :  { %v1582_v0 = vmul.f32 %v1581_v55, %v3927_v2  ;;  %v1619_v47 = vadd.f32 0.00028619796, %v1618_v35  ;;  %v4032_v13 = vmin.f32 %v1016_v8, 16.0  ;;  %v1056_v9 = vmul.f32 %v4023_v57, %v4023_v57 }
 0x10c   :  { %v4036_v49 = vmin.f32 %v1656_v53, 16.0  ;;  %v1696_v30 = vmul.f32 %v4029_v48, %v4029_v48  ;;  %v430_v32 = vperm.slane %v399_v46, 0  ;;  %v414_v15 = vsel %vm5708_vm2, %v5767_v29, %v5766_v12 }
 0x10d   :  { %5772 = vst [vmem:[#allocation58_spill] sm:$0xff] %v4032_v13  ;;  %v867_v59 = vadd.f32 1.1283791, %v866_v27  ;;  %v4044_v55 = vmul.f32 0.5, %v3917_v1  ;;  %v980_v35 = vmul.f32 %v979_v39, %v3984_v17  ;;  %v4047_v8 = vmin.f32 %v1056_v9, 16.0  ;;  %v303_v39 = vpop.f32.mrf.mxu2 }
 0x10e   :  { %v1505_v41 = vadd.f32 0.18741608, %v1504_v23  ;;  %v1018_v53 = vmul.f32 2.1237322e-06, %v4032_v13  ;;  %v494_v26 = vadd.f32 %v430_v32, %v279_v58  ;;  %v415_v25 = vrot.slane %v414_v15, 6  ;;  %v344_v32 = vpop.f32.mrf.mxu1 }
 0x10f   :  { %5773 = vst [vmem:[#allocation59_spill] sm:$0xff] %v4044_v55  ;;  %v905_v11 = vadd.f32 0.18741608, %v904_v14  ;;  %v1620_v42 = vmul.f32 %v1619_v47, %v3988_v44  ;;  %v1658_v33 = vmul.f32 2.1237322e-06, %v4036_v49  ;;  %v4052_v52 = vmin.f32 %v1696_v30, 16.0 }
 0x110   :  { %v1545_v27 = vadd.f32 0.18741608, %v1544_v19  ;;  %v945_v21 = vadd.f32 0.18741608, %v944_v51  ;;  %v1583_v1 = vadd.f32 0.05243302, %v1582_v0  ;;  %v4055_v55 = vadd.f32 %v3495_v61, %v494_v26 }
 0x111   :  { %v4058_v23 = vmul.f32 %v867_v59, %v3796_v45  ;;  %v981_v9 = vadd.f32 0.0036580483, %v980_v35  ;;  %v1058_v58 = vmul.f32 2.1237322e-06, %v4047_v8  ;;  %v446_v14 = vperm.slane %v415_v25, 0 }
 0x112   :  { %5774 = vst [vmem:[#allocation60_spill] sm:$0xff] %v4055_v55  ;;  %v1506_v47 = vmul.f32 %v1505_v41, %v3865_v43  ;;  %v1019_v15 = vadd.f32 0.00028619796, %v1018_v53  ;;  %v4063_v30 = vmul.f32 0.70710677, %v4055_v55  ;;  %v431_v19 = vperm.slane %v399_v46, 1 }
 0x113   :  { %5775 = vst [vmem:[#allocation61_spill] sm:$0xff] %v4058_v23  ;;  %v1621_v51 = vadd.f32 0.0036580483, %v1620_v42  ;;  %v1659_v0 = vadd.f32 0.00028619796, %v1658_v33  ;;  %v510_v31 = vadd.f32 %v446_v14, %v303_v39  ;;  %v1584_v45 = vmul.f32 %v1583_v1, %v3927_v2 }
 0x114   :  { %5776 = vst [vmem:[#allocation62_spill] sm:$0xff] %v4063_v30  ;;  %v1698_v26 = vmul.f32 2.1237322e-06, %v4052_v52  ;;  %v1096_v59 = vmul.f32 %v4063_v30, %v4063_v30  ;;  %v495_v35 = vadd.f32 %v431_v19, %v344_v32  ;;  %v447_v23 = vperm.slane %v415_v25, 1 }
 0x115   :  { %v906_v41 = vmul.f32 %v905_v11, %v3875_v54  ;;  %v982_v53 = vmul.f32 %v981_v9, %v3984_v17  ;;  %v1059_v55 = vadd.f32 0.00028619796, %v1058_v58  ;;  %v4072_v46 = vadd.f32 %v3495_v61, %v510_v31 }
 0x116   :  { %v1546_v33 = vmul.f32 %v1545_v27, %v3883_v28  ;;  %v1020_v42 = vmul.f32 %v1019_v15, %v4032_v13  ;;  %v4077_v39 = vadd.f32 %v3497_v62, %v495_v35  ;;  %v511_v1 = vadd.f32 %v447_v23, %v368_v5 }
 0x117   :  { %5777 = vst [vmem:[#allocation63_spill] sm:$0xff] %v4072_v46  ;;  %v1622_v14 = vmul.f32 %v1621_v51, %v3988_v44  ;;  %v1660_v25 = vmul.f32 %v1659_v0, %v4036_v49  ;;  %v1699_v32 = vadd.f32 0.00028619796, %v1698_v26  ;;  %v4082_v11 = vmul.f32 0.70710677, %v4072_v46 }
 0x118   :  { %5778 = vst [vmem:[#allocation64_spill] sm:$0xff] %v4077_v39  ;;  %v1507_v9 = vadd.f32 1.1283791, %v1506_v47  ;;  %v946_v31 = vmul.f32 %v945_v21, %v3890_v40  ;;  %v1585_v58 = vadd.f32 0.18741608, %v1584_v45  ;;  %v4085_v19 = vmin.f32 %v1096_v59, 16.0 }
 0x119   :  { %v983_v27 = vadd.f32 0.05243302, %v982_v53  ;;  %v1060_v15 = vmul.f32 %v1059_v55, %v4047_v8  ;;  %v1736_v5 = vmul.f32 %v4082_v11, %v4082_v11  ;;  %v4091_v23 = vmul.f32 0.70710677, %v4077_v39 }
 0x11a   :  { %v907_v51 = vadd.f32 1.1283791, %v906_v41  ;;  %v1547_v0 = vadd.f32 1.1283791, %v1546_v33  ;;  %v1021_v26 = vadd.f32 0.0036580483, %v1020_v42  ;;  %v4094_v35 = vadd.f32 %v3497_v62, %v511_v1 }
 0x11b   :  { %5779 = vst [vmem:[#allocation65_spill] sm:$0xff] %v4091_v23  ;;  %v1623_v47 = vadd.f32 0.05243302, %v1622_v14  ;;  %v1661_v21 = vadd.f32 0.0036580483, %v1660_v25  ;;  %v1700_v45 = vmul.f32 %v1699_v32, %v4052_v52  ;;  %v4097_v59 = vmin.f32 %v1736_v5, 16.0 }
 0x11c   :  { %5780 = vst [vmem:[#allocation66_spill] sm:$0xff] %v4094_v35  ;;  %v947_v53 = vadd.f32 1.1283791, %v946_v31  ;;  %v4100_v55 = vmul.f32 0.5, %v3930_v22  ;;  %v1098_v30 = vmul.f32 2.1237322e-06, %v4085_v19  ;;  %v1136_v41 = vmul.f32 %v4091_v23, %v4091_v23 }
 0x11d   :  { %v1586_v33 = vmul.f32 %v1585_v58, %v3927_v2  ;;  %v984_v42 = vmul.f32 %v983_v27, %v3984_v17  ;;  %v1061_v1 = vadd.f32 0.0036580483, %v1060_v15  ;;  %v1738_v14 = vmul.f32 2.1237322e-06, %v4097_v59 }
 0x11e   :  { %5781 = vst [vmem:[#allocation67_spill] sm:$0xff] %v4100_v55  ;;  %v4109_v25 = vmul.f32 %v1507_v9, %v3822_v37  ;;  %v4112_v32 = vmul.f32 %v907_v51, %v3836_v7  ;;  %v1022_v22 = vmul.f32 %v1021_v26, %v4032_v13  ;;  %v4116_v31 = vmul.f32 0.70710677, %v4094_v35 }
 0x11f   :  { %v4119_v5 = vmul.f32 %v1547_v0, %v3846_v50  ;;  %v1624_v58 = vmul.f32 %v1623_v47, %v3988_v44  ;;  %v1662_v27 = vmul.f32 %v1661_v21, %v4036_v49  ;;  %v1701_v15 = vadd.f32 0.0036580483, %v1700_v45 }
 0x120   :  { %5782 = vst [vmem:[#allocation68_spill] sm:$0xff] %v4112_v32  ;;  %v4124_v23 = vmul.f32 %v947_v53, %v3868_v38  ;;  %v1099_v37 = vadd.f32 0.00028619796, %v1098_v30  ;;  %v4126_v9 = vmin.f32 %v1136_v41, 16.0  ;;  %v1776_v7 = vmul.f32 %v4116_v31, %v4116_v31  ;;  %v5787_v41 = vld [vmem:[#allocation15_spill] sm:$0xff] }
 0x121   :  { %5783 = vst [vmem:[#allocation69_spill] sm:$0xff] %v4116_v31  ;;  %v1587_v51 = vadd.f32 1.1283791, %v1586_v33  ;;  %v985_v26 = vadd.f32 0.18741608, %v984_v42  ;;  %v1062_v35 = vmul.f32 %v1061_v1, %v4047_v8  ;;  %v4132_v0 = vmul.f32 0.5, %v3992_v16 }
 0x122   :  { %5784 = vst [vmem:[#allocation70_spill] sm:$0xff] %v4124_v23  ;;  %v1739_v50 = vadd.f32 0.00028619796, %v1738_v14  ;;  %v1023_v47 = vadd.f32 0.05243302, %v1022_v22  ;;  %v4135_v21 = vmul.f32 0.5, %v3995_v34  ;;  %v1702_v53 = vmul.f32 %v1701_v15, %v4052_v52 }
 0x123   :  { %5785 = vst [vmem:[#allocation71_spill] sm:$0xff] %v4132_v0  ;;  %v4137_v38 = vmin.f32 %v1776_v7, 16.0  ;;  %v1625_v30 = vadd.f32 0.18741608, %v1624_v58  ;;  %v1663_v45 = vadd.f32 0.05243302, %v1662_v27  ;;  %v1100_v42 = vmul.f32 %v1099_v37, %v4085_v19 }
 0x124   :  { %5786 = vst [vmem:[#allocation72_spill] sm:$0xff] %v4135_v21  ;;  %v1189_v39 = vmul.f32 3.8918573e-05, %v5787_v41  ;;  %v4142_v33 = vmul.f32 0.5, %v4001_v60  ;;  %v1138_v16 = vmul.f32 2.1237322e-06, %v4126_v9  ;;  %v986_v34 = vmul.f32 %v985_v26, %v3984_v17 }
 0x125   :  { %v5789_v1 = vld [vmem:[#allocation16_spill] sm:$0xff]  ;;  %v1063_v22 = vadd.f32 0.05243302, %v1062_v35  ;;  %v1740_v7 = vmul.f32 %v1739_v50, %v4097_v59  ;;  %v1024_v27 = vmul.f32 %v1023_v47, %v4032_v13  ;;  %v4151_v15 = vmul.f32 0.5, %v4004_v63 }
 0x126   :  { %5788 = vst [vmem:[#allocation15_spill] sm:$0xff] %v4142_v33  ;;  %v1229_v14 = vmul.f32 3.8918573e-05, %v5789_v1  ;;  %v1190_v58 = vadd.f32 0.001143296, %v1189_v39  ;;  %v1626_v37 = vmul.f32 %v1625_v30, %v3988_v44  ;;  %v1664_v33 = vmul.f32 %v1663_v45, %v4036_v49 }
 0x127   :  { %5790 = vst [vmem:[#allocation16_spill] sm:$0xff] %v4151_v15  ;;  %v1778_v60 = vmul.f32 2.1237322e-06, %v4137_v38  ;;  %v1703_v0 = vadd.f32 0.05243302, %v1702_v53  ;;  %v1064_v63 = vmul.f32 %v1063_v22, %v4047_v8 }
 0x128   :  { %v1230_v46 = vadd.f32 0.001143296, %v1229_v14  ;;  %v1191_v21 = vmul.f32 %v1190_v58, %v5787_v41  ;;  %v1101_v26 = vadd.f32 0.0036580483, %v1100_v42  ;;  %v1139_v35 = vadd.f32 0.00028619796, %v1138_v16 }
 0x129   :  { %v1269_v39 = vmul.f32 3.8918573e-05, %v3579_v6  ;;  %v987_v47 = vadd.f32 1.1283791, %v986_v34  ;;  %v1741_v15 = vadd.f32 0.0036580483, %v1740_v7  ;;  %v4161_v14 = vmul.f32 %v1587_v51, %v3894_v56 }
 0x12a   :  { %v1231_v50 = vmul.f32 %v1230_v46, %v5789_v1  ;;  %v1192_v23 = vadd.f32 0.014752088, %v1191_v21  ;;  %v1025_v30 = vadd.f32 0.18741608, %v1024_v27  ;;  %v1779_v32 = vadd.f32 0.00028619796, %v1778_v60 }
 0x12b   :  { %v1627_v53 = vadd.f32 1.1283791, %v1626_v37  ;;  %v1665_v55 = vadd.f32 0.18741608, %v1664_v33  ;;  %v1704_v42 = vmul.f32 %v1703_v0, %v4052_v52  ;;  %v1102_v46 = vmul.f32 %v1101_v26, %v4085_v19 }
 0x12c   :  { %v1232_v45 = vadd.f32 0.014752088, %v1231_v50  ;;  %v1193_v16 = vmul.f32 %v1192_v23, %v5787_v41  ;;  %v1140_v34 = vmul.f32 %v1139_v35, %v4126_v9  ;;  %v1270_v7 = vadd.f32 0.001143296, %v1269_v39  ;;  %v5791_v35 = vld [vmem:[#allocation17_spill] sm:$0xff] }
 0x12d   :  { %v1065_v21 = vadd.f32 0.18741608, %v1064_v63  ;;  %v1742_v56 = vmul.f32 %v1741_v15, %v4097_v59  ;;  %v1309_v58 = vmul.f32 3.8918573e-05, %v3594_v20  ;;  %v1026_v27 = vmul.f32 %v1025_v30, %v4032_v13 }
 0x12e   :  { %v1233_v22 = vmul.f32 %v1232_v45, %v5789_v1  ;;  %v1194_v51 = vadd.f32 0.112945676, %v1193_v16  ;;  %v1780_v33 = vmul.f32 %v1779_v32, %v4137_v38  ;;  %v1271_v23 = vmul.f32 %v1270_v7, %v3579_v6 }
 0x12f   :  { %v1705_v60 = vadd.f32 0.18741608, %v1704_v42  ;;  %v1310_v26 = vadd.f32 0.001143296, %v1309_v58  ;;  %v629_v50 = vmul.f32 3.8918573e-05, %v5791_v35  ;;  %v1666_v39 = vmul.f32 %v1665_v55, %v4036_v49 }
 0x130   :  { %v1234_v0 = vadd.f32 0.112945676, %v1233_v22  ;;  %v1195_v37 = vmul.f32 %v1194_v51, %v5787_v41  ;;  %v1103_v63 = vadd.f32 0.05243302, %v1102_v46  ;;  %v1141_v15 = vadd.f32 0.0036580483, %v1140_v34 }
 0x131   :  { %v1066_v16 = vmul.f32 %v1065_v21, %v4047_v8  ;;  %v1743_v30 = vadd.f32 0.05243302, %v1742_v56  ;;  %v1272_v32 = vadd.f32 0.014752088, %v1271_v23  ;;  %v1027_v22 = vadd.f32 1.1283791, %v1026_v27 }
 0x132   :  { %v1235_v45 = vmul.f32 %v1234_v0, %v5789_v1  ;;  %v1196_v13 = vadd.f32 0.4994258, %v1195_v37  ;;  %v1781_v31 = vadd.f32 0.0036580483, %v1780_v33  ;;  %v1311_v42 = vmul.f32 %v1310_v26, %v3594_v20 }
 0x133   :  { %v1706_v51 = vmul.f32 %v1705_v60, %v4052_v52  ;;  %v1273_v55 = vmul.f32 %v1272_v32, %v3579_v6  ;;  %v630_v46 = vadd.f32 0.001143296, %v629_v50  ;;  %v1104_v34 = vmul.f32 %v1103_v63, %v4085_v19  ;;  %v306_v32 = vpop.f32.mrf.mxu2 }
 0x134   :  { %v1236_v7 = vadd.f32 0.4994258, %v1235_v45  ;;  %v1197_v58 = vmul.f32 %v1196_v13, %v5787_v41  ;;  %v1142_v0 = vmul.f32 %v1141_v15, %v4126_v9  ;;  %v416_v56 = vsel %vm400_vm8, %v5766_v12, %v5767_v29 }
 0x135   :  { %v1667_v27 = vadd.f32 1.1283791, %v1666_v39  ;;  %v1067_v33 = vadd.f32 1.1283791, %v1066_v16  ;;  %v1744_v23 = vmul.f32 %v1743_v30, %v4097_v59  ;;  %v1782_v13 = vmul.f32 %v1781_v31, %v4137_v38 }
 0x136   :  { %v1237_v21 = vmul.f32 %v1236_v7, %v5789_v1  ;;  %v4189_v60 = vadd.f32 1.0, %v1197_v58  ;;  %v1274_v37 = vadd.f32 0.112945676, %v1273_v55  ;;  %v1312_v26 = vadd.f32 0.014752088, %v1311_v42  ;;  %v371_v58 = vpop.f32.mrf.mxu3 }
 0x137   :  { %v1707_v50 = vadd.f32 1.1283791, %v1706_v51  ;;  %v417_v1 = vrot.slane %v416_v56, 7  ;;  %v631_v63 = vmul.f32 %v630_v46, %v5791_v35  ;;  %v4197_v12 = vmul.f32 %v987_v47, %v3942_v36  ;;  %v5793_v47 = vld [vmem:[#allocation18_spill] sm:$0xff] }
 0x138   :  { %v4192_v41 = vadd.f32 1.0, %v1237_v21  ;;  %3099 = vrcp.f32 %v4189_v60  ;;  %v1105_v29 = vadd.f32 0.18741608, %v1104_v34  ;;  %v1143_v39 = vadd.f32 0.05243302, %v1142_v0 }
 0x139   :  { %v4201_v15 = vmul.f32 %v1627_v53, %v3956_v18  ;;  %v4204_v31 = vmul.f32 %v1027_v22, %v4008_v4  ;;  %v4207_v45 = vmul.f32 %v1667_v27, %v4017_v3  ;;  %v1745_v16 = vadd.f32 0.18741608, %v1744_v23 }
 0x13a   :  { %3101 = vrcp.f32 %v4192_v41  ;;  %v1783_v30 = vadd.f32 0.05243302, %v1782_v13  ;;  %v1275_v7 = vmul.f32 %v1274_v37, %v3579_v6  ;;  %v1313_v36 = vmul.f32 %v1312_v26, %v3594_v20 }
 0x13b   :  { %5792 = vst [vmem:[#allocation17_spill] sm:$0xff] %v4204_v31  ;;  %v669_v42 = vmul.f32 3.8918573e-05, %v5793_v47  ;;  %v4213_v51 = vmul.f32 %v1067_v33, %v4023_v57  ;;  %v4216_v18 = vmul.f32 %v1707_v50, %v4029_v48  ;;  %v448_v4 = vperm.slane %v417_v1, 0 }
 0x13c   :  { %v632_v53 = vadd.f32 0.014752088, %v631_v63  ;;  %v4219_v3 = vmul.f32 %v1105_v29, %v4085_v19  ;;  %v4222_v22 = vmul.f32 %v1143_v39, %v4126_v9  ;;  %v449_v55 = vperm.slane %v417_v1, 1 }
 0x13d   :  { %5794 = vst [vmem:[#allocation18_spill] sm:$0xff] %v4213_v51  ;;  %v1276_v46 = vadd.f32 0.4994258, %v1275_v7  ;;  %v4225_v0 = vmul.f32 %v1745_v16, %v4097_v59  ;;  %v512_v57 = vadd.f32 %v448_v4, %v306_v32  ;;  %v1314_v21 = vadd.f32 0.112945676, %v1313_v36 }
 0x13e   :  { %5795 = vst [vmem:[#allocation73_spill] sm:$0xff] %v4216_v18  ;;  %v3100_v34 = vpop.eup %3099  ;;  %v633_v48 = vmul.f32 %v632_v53, %v5791_v35  ;;  %v1784_v27 = vmul.f32 %v1783_v30, %v4137_v38  ;;  %v670_v13 = vadd.f32 0.001143296, %v669_v42  ;;  %v1208_v37 = vand.u32 2147483647, %v4189_v60  ;;  %v5829_v18 = vld [vmem:[#allocation48_spill] sm:$0xff] }
 0x13f   :  { %5796 = vst [vmem:[#allocation74_spill] sm:$0xff] %v4219_v3  ;;  %v1200_v33 = vmul.f32 %v3100_v34, %v4189_v60  ;;  %v1277_v23 = vmul.f32 %v1276_v46, %v3579_v6  ;;  %v513_v50 = vadd.f32 %v449_v55, %v371_v58  ;;  %v1315_v1 = vmul.f32 %v1314_v21, %v3594_v20 }
 0x140   :  { %v3102_v56 = vpop.eup %3101  ;;  %v1210_v29 = vand.u32 2147483648, %v4189_v60  ;;  %v634_v16 = vadd.f32 0.112945676, %v633_v48  ;;  %v1248_v30 = vand.u32 2147483647, %v4192_v41  ;;  %v4239_v7 = vadd.f32 %v3495_v61, %v512_v57 }
 0x141   :  { %v1240_v26 = vmul.f32 %v3102_v56, %v4192_v41  ;;  %v1201_v63 = vsub.f32 1.0, %v1200_v33  ;;  %v4235_v39 = vadd.f32 1.0, %v1277_v23  ;;  %v1316_v6 = vadd.f32 0.4994258, %v1315_v1 }
 0x142   :  { %5797 = vst [vmem:[#allocation75_spill] sm:$0xff] %v4239_v7  ;;  %vm1205_vm3 = vweird.f32 %v3100_v34  ;;  %v1250_v42 = vand.u32 2147483648, %v4192_v41  ;;  %vm1204_vm4 = vweird.f32 %v4189_v60  ;;  %vm1245_vm5 = vweird.f32 %v3102_v56 }
 0x143   :  { %v1241_v32 = vsub.f32 1.0, %v1240_v26  ;;  %v1202_v36 = vmul.f32 %v3100_v34, %v1201_v63  ;;  %3103 = vrcp.f32 %v4235_v39  ;;  %v4245_v53 = vadd.f32 %v3497_v62, %v513_v50  ;;  %vm1206_vm7 = vmor %vm1204_vm4, %vm1205_vm3  ;;  %v1960_v62 = vld [vmem:[#allocation9] sm:$0x3]  ;;  %v5801_v50 = vld [vmem:[#allocation31_spill] sm:$0xff] }
 0x144   :  { %vm1244_vm6 = vweird.f32 %v4192_v41  ;;  %v1317_v61 = vmul.f32 %v1316_v6, %v3594_v20  ;;  %v635_v55 = vmul.f32 %v634_v16, %v5791_v35  ;;  %vm1209_vm8 = vcmp.eq.f32.partialorder %v1208_v37, 8.507059e+37 }
 0x145   :  { %v1242_v4 = vmul.f32 %v3102_v56, %v1241_v32  ;;  %5798 = vst [vmem:[#allocation76_spill] sm:$0xff] %v4245_v53  ;;  %v1203_v58 = vadd.f32 %v3100_v34, %v1202_v36  ;;  %v1211_v46 = vor.u32 1.1754944e-38, %v1210_v29  ;;  %v4251_v21 = vmul.f32 0.70710677, %v4239_v7  ;;  %vm1246_vm9 = vmor %vm1244_vm6, %vm1245_vm5  ;;  %v5802_v29 = vld [vmem:[#allocation33_spill] sm:$0xff] }
 0x146   :  { %vm1249_vm10 = vcmp.eq.f32.partialorder %v1248_v30, 8.507059e+37  ;;  %v1251_v48 = vor.u32 1.1754944e-38, %v1250_v42  ;;  %v4253_v33 = vadd.f32 1.0, %v1317_v61  ;;  %v4256_v20 = vmul.f32 0.70710677, %v4245_v53  ;;  %v5812_v53 = vld [vmem:[#allocation25_spill] sm:$0xff] }
 0x147   :  { %v1243_v57 = vadd.f32 %v3102_v56, %v1242_v4  ;;  %5799 = vst [vmem:[#allocation77_spill] sm:$0xff] %v4251_v21  ;;  %v1207_v60 = vsel %vm1206_vm7, %v3100_v34, %v1203_v58  ;;  %v671_v26 = vmul.f32 %v670_v13, %v5793_v47  ;;  %v636_v34 = vadd.f32 0.4994258, %v635_v55 }
 0x148   :  { %v1212_v23 = vsel %vm1209_vm8, %v1211_v46, %v1207_v60  ;;  %5800 = vst [vmem:[#allocation78_spill] sm:$0xff] %v4256_v20  ;;  %3105 = vrcp.f32 %v4253_v33  ;;  %v4262_v32 = vperm.slane %v1960_v62, 0  ;;  %v1816_v30 = vmul.f32 %v4251_v21, %v4251_v21 }
 0x149   :  { %v1247_v41 = vsel %vm1246_vm9, %v3102_v56, %v1243_v57  ;;  %v3104_v37 = vpop.eup %3103  ;;  %v1213_v1 = vmul.f32 %v1212_v23, %v5801_v50  ;;  %v1785_v6 = vadd.f32 0.18741608, %v1784_v27  ;;  %v4267_v42 = vperm.slane %v1960_v62, 1  ;;  %v5803_v50 = vld [vmem:[#allocation19_spill] sm:$0xff] }
 0x14a   :  { %v1252_v63 = vsel %vm1249_vm10, %v1251_v48, %v1247_v41  ;;  %v1280_v56 = vmul.f32 %v3104_v37, %v4235_v39  ;;  %v1288_v13 = vand.u32 2147483647, %v4235_v39  ;;  %v1290_v61 = vand.u32 2147483648, %v4235_v39 }
 0x14b   :  { %v1253_v16 = vmul.f32 %v1252_v63, %v5802_v29  ;;  %v3057_v36 = vclamps-f32 %v1213_v1, 1.0  ;;  %v709_v55 = vmul.f32 3.8918573e-05, %v3628_v10  ;;  %v1856_v57 = vmul.f32 %v4256_v20, %v4256_v20  ;;  %v5813_v20 = vld [vmem:[#allocation28_spill] sm:$0xff] }
 0x14c   :  { %v1281_v58 = vsub.f32 1.0, %v1280_v56  ;;  %v637_v60 = vmul.f32 %v636_v34, %v5791_v35  ;;  %v672_v48 = vadd.f32 0.014752088, %v671_v26  ;;  %v4275_v27 = vmin.f32 %v1816_v30, 16.0 }
 0x14d   :  { %v3058_v4 = vclamps-f32 %v1253_v16, 1.0  ;;  %v1910_v46 = vadd.f32 1.0, %v3057_v36  ;;  %vm1285_vm15 = vweird.f32 %v3104_v37  ;;  %vm1284_vm0 = vweird.f32 %v4235_v39  ;;  %v5806_v16 = vld [vmem:[#allocation20_spill] sm:$0xff] }
 0x14e   :  { %v1282_v62 = vmul.f32 %v3104_v37, %v1281_v58  ;;  %v3106_v41 = vpop.eup %3105  ;;  %vm4279_vm3 = vcmp.eq.f32.partialorder %v1288_v13, 8.507059e+37  ;;  %v4283_v29 = vadd.f32 1.0, %v637_v60  ;;  %v1291_v26 = vor.u32 1.1754944e-38, %v1290_v61  ;;  %vm1286_vm4 = vmor %vm1284_vm0, %vm1285_vm15 }
 0x14f   :  { %v1911_v23 = vadd.f32 1.0, %v3058_v4  ;;  %v1942_v1 = vmul.f32 %v1910_v46, %v5803_v50  ;;  %v1320_v34 = vmul.f32 %v3106_v41, %v4253_v33  ;;  %v1328_v36 = vand.u32 2147483647, %v4253_v33 }
 0x150   :  { %v1283_v35 = vadd.f32 %v3104_v37, %v1282_v62  ;;  %3107 = vrcp.f32 %v4283_v29  ;;  %v673_v39 = vmul.f32 %v672_v48, %v5793_v47  ;;  %v1330_v46 = vand.u32 2147483648, %v4253_v33 }
 0x151   :  { %v1943_v56 = vmul.f32 %v1911_v23, %v5806_v16  ;;  %v1980_v30 = vmul.f32 %v4262_v32, %v1942_v1  ;;  %v1321_v58 = vsub.f32 1.0, %v1320_v34  ;;  %v4294_v60 = vadd.f32 1.1283791, %v4225_v0  ;;  %v5809_v34 = vld [vmem:[#allocation27_spill] sm:$0xff] }
 0x152   :  { %v1287_v4 = vsel %vm1286_vm4, %v3104_v37, %v1283_v35  ;;  %v4297_v61 = vmul.f32 %v1785_v6, %v4137_v38  ;;  %v4299_v23 = vmin.f32 %v1856_v57, 16.0  ;;  %vm1325_vm5 = vweird.f32 %v3106_v41 }
 0x153   :  { %v1981_v13 = vmul.f32 %v4267_v42, %v1943_v56  ;;  %v1292_v62 = vsel %vm4279_vm3, %v1291_v26, %v1287_v4  ;;  %v1322_v1 = vmul.f32 %v3106_v41, %v1321_v58  ;;  %v1818_v37 = vmul.f32 2.1237322e-06, %v4275_v27 }
 0x154   :  { %v1293_v48 = vmul.f32 %v1292_v62, %v3828_v24  ;;  %vm1324_vm6 = vweird.f32 %v4253_v33  ;;  %vm4306_vm7 = vcmp.eq.f32.partialorder %v1328_v36, 8.507059e+37  ;;  %v674_v6 = vadd.f32 0.112945676, %v673_v39  ;;  %v5810_v62 = vld [vmem:[#allocation43_spill] sm:$0xff] }
 0x155   :  { %v2019_v50 = vadd.f32 %v1981_v13, %v1980_v30  ;;  %v1323_v16 = vadd.f32 %v3106_v41, %v1322_v1  ;;  %v1331_v56 = vor.u32 1.1754944e-38, %v1330_v46  ;;  %v710_v63 = vadd.f32 0.001143296, %v709_v55  ;;  %vm1326_vm8 = vmor %vm1324_vm6, %vm1325_vm5 }
 0x156   :  { %v3059_v57 = vclamps-f32 %v1293_v48, 1.0  ;;  %v3108_v35 = vpop.eup %3107  ;;  %vm644_vm9 = vweird.f32 %v4283_v29  ;;  %v648_v24 = vand.u32 2147483647, %v4283_v29  ;;  %v675_v26 = vmul.f32 %v674_v6, %v5793_v47  ;;  %v5811_v48 = vld [vmem:[#allocation22_spill] sm:$0xff] }
 0x157   :  { %2020 = vadd.xlane.f32.xlu1 %v2019_v50  ;;  %v749_v33 = vmul.f32 3.8918573e-05, %v5809_v34  ;;  %v1327_v30 = vsel %vm1326_vm8, %v3106_v41, %v1323_v16  ;;  %v640_v13 = vmul.f32 %v3108_v35, %v4283_v29  ;;  %v650_v39 = vand.u32 2147483648, %v4283_v29 }
 0x158   :  { %v1912_v36 = vadd.f32 1.0, %v3059_v57  ;;  %v1332_v4 = vsel %vm4306_vm7, %v1331_v56, %v1327_v30  ;;  %v676_v55 = vadd.f32 0.4994258, %v675_v26  ;;  %v711_v58 = vmul.f32 %v710_v63, %v3628_v10 }
 0x159   :  { %v750_v46 = vadd.f32 0.001143296, %v749_v33  ;;  %v1333_v50 = vmul.f32 %v1332_v4, %v5810_v62  ;;  %v641_v6 = vsub.f32 1.0, %v640_v13  ;;  %v1349_v7 = vmul.f32 3.8918573e-05, %v5812_v53  ;;  %v5817_v62 = vld [vmem:[#allocation24_spill] sm:$0xff] }
 0x15a   :  { %v1944_v1 = vmul.f32 %v1912_v36, %v5811_v48  ;;  %v677_v41 = vmul.f32 %v676_v55, %v5793_v47  ;;  %v712_v57 = vadd.f32 0.014752088, %v711_v58  ;;  %v1389_v21 = vmul.f32 3.8918573e-05, %v5813_v20 }
 0x15b   :  { %v751_v16 = vmul.f32 %v750_v46, %v5809_v34  ;;  %v3060_v0 = vclamps-f32 %v1333_v50, 1.0  ;;  %v642_v56 = vmul.f32 %v3108_v35, %v641_v6  ;;  %vm645_vm10 = vweird.f32 %v3108_v35 }
 0x15c   :  { %v1350_v26 = vadd.f32 0.001143296, %v1349_v7  ;;  %vm4325_vm15 = vcmp.eq.f32.partialorder %v648_v24, 8.507059e+37  ;;  %v4329_v33 = vadd.f32 1.0, %v677_v41  ;;  %v713_v30 = vmul.f32 %v712_v57, %v3628_v10  ;;  %vm646_vm0 = vmor %vm644_vm9, %vm645_vm10  ;;  %v5816_v24 = vld [vmem:[#allocation32_spill] sm:$0xff] }
 0x15d   :  { %v752_v36 = vadd.f32 0.014752088, %v751_v16  ;;  %v1913_v13 = vadd.f32 1.0, %v3060_v0  ;;  %v643_v47 = vadd.f32 %v3108_v35, %v642_v56  ;;  %v651_v4 = vor.u32 1.1754944e-38, %v650_v39  ;;  %v5818_v0 = vld [vmem:[#allocation40_spill] sm:$0xff] }
 0x15e   :  { %v1351_v55 = vmul.f32 %v1350_v26, %v5812_v53  ;;  %v1982_v58 = vmul.f32 %v4262_v32, %v1944_v1  ;;  %3109 = vrcp.f32 %v4329_v33  ;;  %v1390_v7 = vadd.f32 0.001143296, %v1389_v21 }
 0x15f   :  { %v789_v46 = vmul.f32 3.8918573e-05, %v5816_v24  ;;  %v1945_v50 = vmul.f32 %v1913_v13, %v5817_v62  ;;  %v647_v48 = vsel %vm646_vm0, %v3108_v35, %v643_v47  ;;  %v714_v6 = vadd.f32 0.112945676, %v713_v30 }
 0x160   :  { %v753_v41 = vmul.f32 %v752_v36, %v5809_v34  ;;  %v1819_v57 = vadd.f32 0.00028619796, %v1818_v37  ;;  %v1858_v39 = vmul.f32 2.1237322e-06, %v4299_v23  ;;  %v652_v1 = vsel %vm4325_vm15, %v651_v4, %v647_v48  ;;  %v5819_v36 = vld [vmem:[#allocation36_spill] sm:$0xff] }
 0x161   :  { %v1352_v16 = vadd.f32 0.014752088, %v1351_v55  ;;  %v1983_v29 = vmul.f32 %v4267_v42, %v1945_v50  ;;  %v653_v56 = vmul.f32 %v652_v1, %v5818_v0  ;;  %v715_v21 = vmul.f32 %v714_v6, %v3628_v10 }
 0x162   :  { %v754_v26 = vadd.f32 0.112945676, %v753_v41  ;;  %v1391_v35 = vmul.f32 %v1390_v7, %v5813_v20  ;;  %v790_v30 = vadd.f32 0.001143296, %v789_v46  ;;  %v829_v37 = vmul.f32 3.8918573e-05, %v5819_v36 }
 0x163   :  { %v1353_v13 = vmul.f32 %v1352_v16, %v5812_v53  ;;  %v2022_v47 = vadd.f32 %v1983_v29, %v1982_v58  ;;  %v3043_v62 = vclamps-f32 %v653_v56, 1.0  ;;  %v716_v3 = vadd.f32 0.4994258, %v715_v21 }
 0x164   :  { %v755_v63 = vmul.f32 %v754_v26, %v5809_v34  ;;  %v3110_v4 = vpop.eup %3109  ;;  %v1392_v50 = vadd.f32 0.014752088, %v1391_v35  ;;  %v791_v48 = vmul.f32 %v790_v30, %v5816_v24  ;;  %v830_v1 = vadd.f32 0.001143296, %v829_v37 }
 0x165   :  { %v1354_v55 = vadd.f32 0.112945676, %v1353_v13  ;;  %v4351_v6 = vadd.f32 0.00028619796, %v1858_v39  ;;  %2023 = vadd.xlane.f32.xlu2 %v2022_v47  ;;  %v680_v41 = vmul.f32 %v3110_v4, %v4329_v33  ;;  %v690_v7 = vand.u32 2147483648, %v4329_v33 }
 0x166   :  { %v717_v46 = vmul.f32 %v716_v3, %v3628_v10  ;;  %v756_v58 = vadd.f32 0.4994258, %v755_v63  ;;  %v1393_v29 = vmul.f32 %v1392_v50, %v5813_v20  ;;  %v792_v0 = vadd.f32 0.014752088, %v791_v48 }
 0x167   :  { %v1355_v16 = vmul.f32 %v1354_v55, %v5812_v53  ;;  %v681_v56 = vsub.f32 1.0, %v680_v41  ;;  %v1896_v21 = vadd.f32 1.0, %v3043_v62  ;;  %v831_v39 = vmul.f32 %v830_v1, %v5819_v36  ;;  %v5820_v41 = vld [vmem:[#allocation21_spill] sm:$0xff] }
 0x168   :  { %v4358_v26 = vadd.f32 1.0, %v717_v46  ;;  %v757_v13 = vmul.f32 %v756_v58, %v5809_v34  ;;  %v1394_v30 = vadd.f32 0.112945676, %v1393_v29  ;;  %v793_v37 = vmul.f32 %v792_v0, %v5816_v24 }
 0x169   :  { %v1356_v35 = vadd.f32 0.4994258, %v1355_v16  ;;  %v682_v47 = vmul.f32 %v3110_v4, %v681_v56  ;;  %vm685_vm3 = vweird.f32 %v3110_v4  ;;  %v688_v10 = vand.u32 2147483647, %v4329_v33 }
 0x16a   :  { %3111 = vrcp.f32 %v4358_v26  ;;  %v4366_v3 = vmul.f32 %v1819_v57, %v4275_v27  ;;  %vm684_vm4 = vweird.f32 %v4329_v33  ;;  %v4369_v62 = vadd.f32 1.0, %v757_v13 }
 0x16b   :  { %v1357_v63 = vmul.f32 %v1356_v35, %v5812_v53  ;;  %v683_v34 = vadd.f32 %v3110_v4, %v682_v47  ;;  %v1395_v55 = vmul.f32 %v1394_v30, %v5813_v20  ;;  %v794_v50 = vadd.f32 0.112945676, %v793_v37  ;;  %vm686_vm5 = vmor %vm684_vm4, %vm685_vm3 }
 0x16c   :  { %v832_v48 = vadd.f32 0.014752088, %v831_v39  ;;  %v691_v1 = vor.u32 1.1754944e-38, %v690_v7  ;;  %v1928_v46 = vmul.f32 %v1896_v21, %v5820_v41  ;;  %v728_v58 = vand.u32 2147483647, %v4358_v26  ;;  %v5821_v7 = vld [vmem:[#allocation42_spill] sm:$0xff] }
 0x16d   :  { %3113 = vrcp.f32 %v4369_v62  ;;  %v687_v57 = vsel %vm686_vm5, %v3110_v4, %v683_v34  ;;  %vm689_vm6 = vcmp.eq.f32.partialorder %v688_v10, 8.507059e+37  ;;  %v730_v33 = vand.u32 2147483648, %v4358_v26 }
 0x16e   :  { %v4377_v16 = vadd.f32 1.0, %v1357_v63  ;;  %v692_v53 = vsel %vm689_vm6, %v691_v1, %v687_v57  ;;  %v770_v29 = vand.u32 2147483648, %v4369_v62  ;;  %v1396_v0 = vadd.f32 0.4994258, %v1395_v55 }
 0x16f   :  { %v795_v56 = vmul.f32 %v794_v50, %v5816_v24  ;;  %v693_v13 = vmul.f32 %v692_v53, %v5821_v7  ;;  %v768_v21 = vand.u32 2147483647, %v4369_v62  ;;  %v833_v4 = vmul.f32 %v832_v48, %v5819_v36 }
 0x170   :  { %v3112_v39 = vpop.eup %3111  ;;  %3115 = vrcp.f32 %v4377_v16  ;;  %v1966_v35 = vmul.f32 %v4262_v32, %v1928_v46  ;;  %vm724_vm7 = vweird.f32 %v4358_v26  ;;  %vm4388_vm8 = vcmp.eq.f32.partialorder %v728_v58, 8.507059e+37 }
 0x171   :  { %v720_v30 = vmul.f32 %v3112_v39, %v4358_v26  ;;  %v3044_v47 = vclamps-f32 %v693_v13, 1.0  ;;  %v731_v10 = vor.u32 1.1754944e-38, %v730_v33  ;;  %v1397_v63 = vmul.f32 %v1396_v0, %v5813_v20 }
 0x172   :  { %v796_v34 = vadd.f32 0.4994258, %v795_v56  ;;  %vm764_vm9 = vweird.f32 %v4369_v62  ;;  %v771_v48 = vor.u32 1.1754944e-38, %v770_v29  ;;  %v1368_v1 = vand.u32 2147483647, %v4377_v16  ;;  %v5826_v29 = vld [vmem:[#allocation23_spill] sm:$0xff] }
 0x173   :  { %v3114_v55 = vpop.eup %3113  ;;  %v721_v50 = vsub.f32 1.0, %v720_v30  ;;  %v1897_v41 = vadd.f32 1.0, %v3044_v47  ;;  %vm4396_vm10 = vcmp.eq.f32.partialorder %v768_v21, 8.507059e+37  ;;  %v1370_v57 = vand.u32 2147483648, %v4377_v16 }
 0x174   :  { %v760_v46 = vmul.f32 %v3114_v55, %v4369_v62  ;;  %v834_v33 = vadd.f32 0.112945676, %v833_v4  ;;  %vm725_vm15 = vweird.f32 %v3112_v39  ;;  %v4401_v20 = vadd.f32 1.0, %v1397_v63  ;;  %v5830_v62 = vld [vmem:[#allocation51_spill] sm:$0xff] }
 0x175   :  { %v722_v53 = vmul.f32 %v3112_v39, %v721_v50  ;;  %v797_v0 = vmul.f32 %v796_v34, %v5816_v24  ;;  %v1929_v7 = vmul.f32 %v1897_v41, %v5826_v29  ;;  %vm1364_vm0 = vweird.f32 %v4377_v16  ;;  %vm726_vm5 = vmor %vm724_vm7, %vm725_vm15 }
 0x176   :  { %v3116_v56 = vpop.eup %3115  ;;  %v761_v13 = vsub.f32 1.0, %v760_v46  ;;  %v1509_v21 = vmul.f32 3.8918573e-05, %v3865_v43  ;;  %vm765_vm3 = vweird.f32 %v3114_v55  ;;  %vm4408_vm4 = vcmp.eq.f32.partialorder %v1368_v1, 8.507059e+37 }
 0x177   :  { %v723_v30 = vadd.f32 %v3112_v39, %v722_v53  ;;  %v1360_v47 = vmul.f32 %v3116_v56, %v4377_v16  ;;  %3117 = vrcp.f32 %v4401_v20  ;;  %v1967_v24 = vmul.f32 %v4267_v42, %v1929_v7  ;;  %vm766_vm6 = vmor %vm764_vm9, %vm765_vm3 }
 0x178   :  { %v762_v63 = vmul.f32 %v3114_v55, %v761_v13  ;;  %v1371_v34 = vor.u32 1.1754944e-38, %v1370_v57  ;;  %v835_v50 = vmul.f32 %v834_v33, %v5819_v36  ;;  %v1408_v53 = vand.u32 2147483647, %v4401_v20 }
 0x179   :  { %v727_v41 = vsel %vm726_vm5, %v3112_v39, %v723_v30  ;;  %v1361_v46 = vsub.f32 1.0, %v1360_v47  ;;  %v4418_v29 = vadd.f32 1.0, %v797_v0  ;;  %v1998_v1 = vadd.f32 %v1967_v24, %v1966_v35 }
 0x17a   :  { %v732_v51 = vsel %vm4388_vm8, %v731_v10, %v727_v41  ;;  %v763_v31 = vadd.f32 %v3114_v55, %v762_v63  ;;  %v1410_v7 = vand.u32 2147483648, %v4401_v20  ;;  %vm1365_vm7 = vweird.f32 %v3116_v56 }
 0x17b   :  { %v733_v26 = vmul.f32 %v732_v51, %v5829_v18  ;;  %v1362_v57 = vmul.f32 %v3116_v56, %v1361_v46  ;;  %3119 = vrcp.f32 %v4418_v29  ;;  %1999 = vadd.xlane.f32.xlu0 %v1998_v1  ;;  %vm1404_vm15 = vweird.f32 %v4401_v20  ;;  %vm1366_vm8 = vmor %vm1364_vm0, %vm1365_vm7 }
 0x17c   :  { %v767_v39 = vsel %vm766_vm6, %v3114_v55, %v763_v31  ;;  %v1510_v35 = vadd.f32 0.001143296, %v1509_v21  ;;  %v1549_v37 = vmul.f32 3.8918573e-05, %v3883_v28  ;;  %v836_v0 = vadd.f32 0.4994258, %v835_v50 }
 0x17d   :  { %v3118_v10 = vpop.eup %3117  ;;  %v3045_v33 = vclamps-f32 %v733_v26, 1.0  ;;  %v772_v51 = vsel %vm4396_vm10, %v771_v48, %v767_v39  ;;  %v1363_v18 = vadd.f32 %v3116_v56, %v1362_v57  ;;  %vm4436_vm9 = vcmp.eq.f32.partialorder %v1408_v53, 8.507059e+37  ;;  %v5833_v53 = vld [vmem:[#allocation26_spill] sm:$0xff] }
 0x17e   :  { %v773_v13 = vmul.f32 %v772_v51, %v5830_v62  ;;  %v1400_v30 = vmul.f32 %v3118_v10, %v4401_v20  ;;  %v1411_v55 = vor.u32 1.1754944e-38, %v1410_v7  ;;  %v808_v21 = vand.u32 2147483647, %v4418_v29  ;;  %v5834_v7 = vld [vmem:[#allocation49_spill] sm:$0xff] }
 0x17f   :  { %v1898_v47 = vadd.f32 1.0, %v3045_v33  ;;  %v1367_v24 = vsel %vm1366_vm8, %v3116_v56, %v1363_v18  ;;  %v810_v48 = vand.u32 2147483648, %v4418_v29  ;;  %v837_v58 = vmul.f32 %v836_v0, %v5819_v36 }
 0x180   :  { %v3046_v63 = vclamps-f32 %v773_v13, 1.0  ;;  %v1372_v16 = vsel %vm4408_vm4, %v1371_v34, %v1367_v24  ;;  %v1401_v50 = vsub.f32 1.0, %v1400_v30  ;;  %vm804_vm10 = vweird.f32 %v4418_v29 }
 0x181   :  { %v1511_v41 = vmul.f32 %v1510_v35, %v3865_v43  ;;  %v3120_v46 = vpop.eup %3119  ;;  %v1930_v1 = vmul.f32 %v1898_v47, %v5833_v53  ;;  %v1373_v26 = vmul.f32 %v1372_v16, %v5834_v7  ;;  %v4449_v57 = vadd.f32 1.0, %v837_v58  ;;  %v5837_v35 = vld [vmem:[#allocation38_spill] sm:$0xff]  ;;  %v5838_v16 = vld [vmem:[#allocation29_spill] sm:$0xff]  ;;  %v5839_v7 = vld [vmem:[#allocation52_spill] sm:$0xff] }
 0x182   :  { %v1550_v56 = vadd.f32 0.001143296, %v1549_v37  ;;  %v1899_v39 = vadd.f32 1.0, %v3046_v63  ;;  %v1402_v33 = vmul.f32 %v3118_v10, %v1401_v50  ;;  %vm1405_vm0 = vweird.f32 %v3118_v10 }
 0x183   :  { %v800_v36 = vmul.f32 %v3120_v46, %v4418_v29  ;;  %v3061_v4 = vclamps-f32 %v1373_v26, 1.0  ;;  %vm4452_vm3 = vcmp.eq.f32.partialorder %v808_v21, 8.507059e+37  ;;  %v811_v51 = vor.u32 1.1754944e-38, %v810_v48  ;;  %vm1406_vm4 = vmor %vm1404_vm15, %vm1405_vm0 }
 0x184   :  { %3121 = vrcp.f32 %v4449_v57  ;;  %v1931_v18 = vmul.f32 %v1899_v39, %v5837_v35  ;;  %v1968_v0 = vmul.f32 %v4262_v32, %v1930_v1  ;;  %v1403_v62 = vadd.f32 %v3118_v10, %v1402_v33 }
 0x185   :  { %v801_v13 = vsub.f32 1.0, %v800_v36  ;;  %v1914_v37 = vadd.f32 1.0, %v3061_v4  ;;  %vm805_vm5 = vweird.f32 %v3120_v46  ;;  %v1512_v30 = vadd.f32 0.014752088, %v1511_v41  ;;  %v5841_v36 = vld [vmem:[#allocation37_spill] sm:$0xff] }
 0x186   :  { %v1551_v21 = vmul.f32 %v1550_v56, %v3883_v28  ;;  %v1969_v47 = vmul.f32 %v4267_v42, %v1931_v18  ;;  %v1407_v24 = vsel %vm1406_vm4, %v3118_v10, %v1403_v62  ;;  %v848_v58 = vand.u32 2147483647, %v4449_v57  ;;  %vm806_vm7 = vmor %vm804_vm10, %vm805_vm5 }
 0x187   :  { %v802_v48 = vmul.f32 %v3120_v46, %v801_v13  ;;  %v1412_v63 = vsel %vm4436_vm9, %v1411_v55, %v1407_v24  ;;  %v1946_v50 = vmul.f32 %v1914_v37, %v5838_v16  ;;  %v850_v53 = vand.u32 2147483648, %v4449_v57  ;;  %v5840_v55 = vld [vmem:[#allocation34_spill] sm:$0xff] }
 0x188   :  { %v1513_v20 = vmul.f32 %v1512_v30, %v3865_v43  ;;  %v2001_v1 = vadd.f32 %v1969_v47, %v1968_v0  ;;  %v1413_v41 = vmul.f32 %v1412_v63, %v5839_v7  ;;  %vm844_vm6 = vweird.f32 %v4449_v57  ;;  %v5844_v47 = vld [vmem:[#allocation55_spill] sm:$0xff] }
 0x189   :  { %v803_v26 = vadd.f32 %v3120_v46, %v802_v48  ;;  %v1552_v56 = vadd.f32 0.014752088, %v1551_v21  ;;  %v1984_v39 = vmul.f32 %v4262_v32, %v1946_v50  ;;  %v1429_v33 = vmul.f32 3.8918573e-05, %v5840_v55 }
 0x18a   :  { %v3122_v10 = vpop.eup %3121  ;;  %v1514_v31 = vadd.f32 0.112945676, %v1513_v20  ;;  %v1469_v4 = vmul.f32 3.8918573e-05, %v5841_v36  ;;  %2002 = vadd.xlane.f32.xlu0 %v2001_v1  ;;  %v3062_v35 = vclamps-f32 %v1413_v41, 1.0  ;;  %vm4478_vm8 = vcmp.eq.f32.partialorder %v848_v58, 8.507059e+37 }
 0x18b   :  { %v807_v18 = vsel %vm806_vm7, %v3120_v46, %v803_v26  ;;  %v840_v0 = vmul.f32 %v3122_v10, %v4449_v57  ;;  %vm845_vm15 = vweird.f32 %v3122_v10  ;;  %v1553_v37 = vmul.f32 %v1552_v56, %v3883_v28  ;;  %v5845_v20 = vld [vmem:[#allocation39_spill] sm:$0xff] }
 0x18c   :  { %v812_v13 = vsel %vm4452_vm3, %v811_v51, %v807_v18  ;;  %v1515_v29 = vmul.f32 %v1514_v31, %v3865_v43  ;;  %v1430_v30 = vadd.f32 0.001143296, %v1429_v33  ;;  %v1915_v21 = vadd.f32 1.0, %v3062_v35  ;;  %vm846_vm9 = vmor %vm844_vm6, %vm845_vm15 }
 0x18d   :  { %v813_v24 = vmul.f32 %v812_v13, %v5844_v47  ;;  %v841_v48 = vsub.f32 1.0, %v840_v0  ;;  %v1470_v46 = vadd.f32 0.001143296, %v1469_v4  ;;  %v1554_v16 = vadd.f32 0.112945676, %v1553_v37 }
 0x18e   :  { %v1516_v63 = vadd.f32 0.4994258, %v1515_v29  ;;  %v1431_v58 = vmul.f32 %v1430_v30, %v5840_v55  ;;  %v1589_v50 = vmul.f32 3.8918573e-05, %v3927_v2  ;;  %v1947_v1 = vmul.f32 %v1915_v21, %v5845_v20 }
 0x18f   :  { %v3047_v34 = vclamps-f32 %v813_v24, 1.0  ;;  %v842_v51 = vmul.f32 %v3122_v10, %v841_v48  ;;  %v1471_v7 = vmul.f32 %v1470_v46, %v5841_v36  ;;  %v1555_v26 = vmul.f32 %v1554_v16, %v3883_v28  ;;  %v5847_v46 = vld [vmem:[#allocation44_spill] sm:$0xff] }
 0x190   :  { %v1517_v41 = vmul.f32 %v1516_v63, %v3865_v43  ;;  %v1432_v56 = vadd.f32 0.014752088, %v1431_v58  ;;  %v1590_v31 = vadd.f32 0.001143296, %v1589_v50  ;;  %v1985_v33 = vmul.f32 %v4267_v42, %v1947_v1 }
 0x191   :  { %v843_v4 = vadd.f32 %v3122_v10, %v842_v51  ;;  %v1900_v35 = vadd.f32 1.0, %v3047_v34  ;;  %v1472_v18 = vadd.f32 0.014752088, %v1471_v7  ;;  %v851_v0 = vor.u32 1.1754944e-38, %v850_v53 }
 0x192   :  { %v4497_v13 = vadd.f32 1.0, %v1517_v41  ;;  %v1556_v29 = vadd.f32 0.4994258, %v1555_v26  ;;  %v1433_v37 = vmul.f32 %v1432_v56, %v5840_v55  ;;  %v2025_v43 = vadd.f32 %v1985_v33, %v1984_v39  ;;  %v5846_v39 = vld [vmem:[#allocation30_spill] sm:$0xff] }
 0x193   :  { %v847_v30 = vsel %vm846_vm9, %v3122_v10, %v843_v4  ;;  %v1473_v21 = vmul.f32 %v1472_v18, %v5841_v36  ;;  %v1591_v47 = vmul.f32 %v1590_v31, %v3927_v2  ;;  %v1821_v24 = vadd.f32 0.0036580483, %v4366_v3  ;;  %v5848_v4 = vld [vmem:[#allocation46_spill] sm:$0xff] }
 0x194   :  { %v1860_v48 = vmul.f32 %v4351_v6, %v4299_v23  ;;  %v852_v57 = vsel %vm4478_vm8, %v851_v0, %v847_v30  ;;  %3123 = vrcp.f32 %v4497_v13  ;;  %v4509_v53 = vadd.f32 0.18741608, %v4222_v22  ;;  %2026 = vadd.xlane.f32.xlu0 %v2025_v43 }
 0x195   :  { %v853_v10 = vmul.f32 %v852_v57, %v5846_v39  ;;  %v1932_v63 = vmul.f32 %v1900_v35, %v5847_v46  ;;  %v1557_v16 = vmul.f32 %v1556_v29, %v3883_v28  ;;  %v4516_v3 = vmul.f32 %v4294_v60, %v4082_v11  ;;  %v5851_v29 = vld [vmem:[#allocation41_spill] sm:$0xff] }
 0x196   :  { %v4519_v6 = vadd.f32 1.1283791, %v4297_v61  ;;  %v1434_v62 = vadd.f32 0.112945676, %v1433_v37  ;;  %v1474_v58 = vadd.f32 0.112945676, %v1473_v21  ;;  %v4525_v34 = vmul.f32 %v1821_v24, %v4275_v27 }
 0x197   :  { %v3048_v50 = vclamps-f32 %v853_v10, 1.0  ;;  %v1528_v22 = vand.u32 2147483647, %v4497_v13  ;;  %v4522_v20 = vadd.f32 1.0, %v1557_v16  ;;  %v1592_v1 = vadd.f32 0.014752088, %v1591_v47 }
 0x198   :  { %v4527_v51 = vadd.f32 0.0036580483, %v1860_v48  ;;  %v1435_v28 = vmul.f32 %v1434_v62, %v5840_v55  ;;  %v1475_v11 = vmul.f32 %v1474_v58, %v5841_v36  ;;  %v1970_v61 = vmul.f32 %v4262_v32, %v1932_v63 }
 0x199   :  { %v1901_v60 = vadd.f32 1.0, %v3048_v50  ;;  %vm1524_vm10 = vweird.f32 %v4497_v13  ;;  %3125 = vrcp.f32 %v4522_v20  ;;  %v1629_v7 = vmul.f32 3.8918573e-05, %v3988_v44 }
 0x19a   :  { %v3124_v41 = vpop.eup %3123  ;;  %v1530_v26 = vand.u32 2147483648, %v4497_v13  ;;  %v1436_v56 = vadd.f32 0.4994258, %v1435_v28  ;;  %v1476_v31 = vadd.f32 0.4994258, %v1475_v11  ;;  %v1593_v33 = vmul.f32 %v1592_v1, %v3927_v2 }
 0x19b   :  { %v1933_v35 = vmul.f32 %v1901_v60, %v5848_v4  ;;  %v1520_v18 = vmul.f32 %v3124_v41, %v4497_v13  ;;  %vm4539_vm0 = vcmp.eq.f32.partialorder %v1528_v22, 8.507059e+37  ;;  %v869_v37 = vmul.f32 3.8918573e-05, %v5851_v29 }
 0x19c   :  { %v1568_v43 = vand.u32 2147483647, %v4522_v20  ;;  %v1437_v30 = vmul.f32 %v1436_v56, %v5840_v55  ;;  %v1477_v21 = vmul.f32 %v1476_v31, %v5841_v36  ;;  %v1594_v47 = vadd.f32 0.112945676, %v1593_v33 }
 0x19d   :  { %v1971_v24 = vmul.f32 %v4267_v42, %v1933_v35  ;;  %v1521_v48 = vsub.f32 1.0, %v1520_v18  ;;  %v1570_v57 = vand.u32 2147483648, %v4522_v20  ;;  %v1630_v39 = vadd.f32 0.001143296, %v1629_v7 }
 0x19e   :  { %vm1525_vm3 = vweird.f32 %v3124_v41  ;;  %v1531_v10 = vor.u32 1.1754944e-38, %v1530_v26  ;;  %v4549_v46 = vadd.f32 1.0, %v1437_v30  ;;  %v4551_v63 = vadd.f32 1.0, %v1477_v21 }
 0x19f   :  { %v3126_v16 = vpop.eup %3125  ;;  %v2004_v62 = vadd.f32 %v1971_v24, %v1970_v61  ;;  %v1522_v58 = vmul.f32 %v3124_v41, %v1521_v48  ;;  %v1595_v55 = vmul.f32 %v1594_v47, %v3927_v2  ;;  %v870_v50 = vadd.f32 0.001143296, %v869_v37  ;;  %vm1526_vm6 = vmor %vm1524_vm10, %vm1525_vm3 }
 0x1a0   :  { %v1560_v36 = vmul.f32 %v3126_v16, %v4522_v20  ;;  %vm1564_vm4 = vweird.f32 %v4522_v20  ;;  %vm4556_vm5 = vcmp.eq.f32.partialorder %v1568_v43, 8.507059e+37  ;;  %3127 = vrcp.f32 %v4549_v46 }
 0x1a1   :  { %2005 = vadd.xlane.f32.xlu1 %v2004_v62  ;;  %v1523_v1 = vadd.f32 %v3124_v41, %v1522_v58  ;;  %v1571_v28 = vor.u32 1.1754944e-38, %v1570_v57  ;;  %3129 = vrcp.f32 %v4551_v63  ;;  %v1631_v11 = vmul.f32 %v1630_v39, %v3988_v44 }
 0x1a2   :  { %v1561_v60 = vsub.f32 1.0, %v1560_v36  ;;  %v1450_v61 = vand.u32 2147483648, %v4549_v46  ;;  %v1490_v7 = vand.u32 2147483648, %v4551_v63  ;;  %v909_v26 = vmul.f32 3.8918573e-05, %v3875_v54 }
 0x1a3   :  { %v1527_v56 = vsel %vm1526_vm6, %v3124_v41, %v1523_v1  ;;  %v1448_v31 = vand.u32 2147483647, %v4549_v46  ;;  %v1596_v33 = vadd.f32 0.4994258, %v1595_v55  ;;  %v871_v4 = vmul.f32 %v870_v50, %v5851_v29 }
 0x1a4   :  { %v1532_v35 = vsel %vm4539_vm0, %v1531_v10, %v1527_v56  ;;  %v1562_v18 = vmul.f32 %v3126_v16, %v1561_v60  ;;  %vm1565_vm7 = vweird.f32 %v3126_v16  ;;  %v1488_v13 = vand.u32 2147483647, %v4551_v63 }
 0x1a5   :  { %v1533_v37 = vmul.f32 %v1532_v35, %v4109_v25  ;;  %vm1444_vm15 = vweird.f32 %v4549_v46  ;;  %v1597_v43 = vmul.f32 %v1596_v33, %v3927_v2  ;;  %v1632_v30 = vadd.f32 0.014752088, %v1631_v11  ;;  %vm1566_vm9 = vmor %vm1564_vm4, %vm1565_vm7 }
 0x1a6   :  { %v3128_v41 = vpop.eup %3127  ;;  %v1563_v21 = vadd.f32 %v3126_v16, %v1562_v18  ;;  %v1451_v47 = vor.u32 1.1754944e-38, %v1450_v61  ;;  %vm1484_vm8 = vweird.f32 %v4551_v63  ;;  %v1491_v24 = vor.u32 1.1754944e-38, %v1490_v7  ;;  %v5858_v7 = vld [vmem:[#allocation53_spill] sm:$0xff] }
 0x1a7   :  { %v3130_v48 = vpop.eup %3129  ;;  %v3065_v0 = vclamps-f32 %v1533_v37, 1.0  ;;  %v1440_v57 = vmul.f32 %v3128_v41, %v4549_v46  ;;  %vm4581_vm10 = vcmp.eq.f32.partialorder %v1448_v31, 8.507059e+37  ;;  %v4585_v39 = vadd.f32 1.0, %v1597_v43 }
 0x1a8   :  { %v872_v2 = vadd.f32 0.014752088, %v871_v4  ;;  %v1567_v10 = vsel %vm1566_vm9, %v3126_v16, %v1563_v21  ;;  %v1480_v62 = vmul.f32 %v3130_v48, %v4551_v63  ;;  %vm4588_vm0 = vcmp.eq.f32.partialorder %v1488_v13, 8.507059e+37 }
 0x1a9   :  { %v1633_v55 = vmul.f32 %v1632_v30, %v3988_v44  ;;  %v910_v20 = vadd.f32 0.001143296, %v909_v26  ;;  %v1572_v50 = vsel %vm4556_vm5, %v1571_v28, %v1567_v10  ;;  %v1918_v36 = vadd.f32 1.0, %v3065_v0 }
 0x1aa   :  { %v1441_v1 = vsub.f32 1.0, %v1440_v57  ;;  %3131 = vrcp.f32 %v4585_v39  ;;  %v1573_v11 = vmul.f32 %v1572_v50, %v4119_v5  ;;  %v1481_v60 = vsub.f32 1.0, %v1480_v62  ;;  %v5859_v62 = vld [vmem:[#allocation56_spill] sm:$0xff] }
 0x1ab   :  { %v949_v16 = vmul.f32 3.8918573e-05, %v3890_v40  ;;  %v989_v61 = vmul.f32 3.8918573e-05, %v3984_v17  ;;  %v1950_v56 = vmul.f32 %v1918_v36, %v5858_v7  ;;  %vm1445_vm3 = vweird.f32 %v3128_v41 }
 0x1ac   :  { %v1442_v31 = vmul.f32 %v3128_v41, %v1441_v1  ;;  %v1634_v33 = vadd.f32 0.112945676, %v1633_v55  ;;  %v3066_v26 = vclamps-f32 %v1573_v11, 1.0  ;;  %v1482_v4 = vmul.f32 %v3130_v48, %v1481_v60  ;;  %vm1446_vm5 = vmor %vm1444_vm15, %vm1445_vm3  ;;  %v5860_v1 = vld [vmem:[#allocation57_spill] sm:$0xff] }
 0x1ad   :  { %vm1485_vm4 = vweird.f32 %v3130_v48  ;;  %v873_v22 = vmul.f32 %v872_v2, %v5851_v29  ;;  %v1608_v35 = vand.u32 2147483647, %v4585_v39  ;;  %v1610_v5 = vand.u32 2147483648, %v4585_v39 }
 0x1ae   :  { %v1443_v28 = vadd.f32 %v3128_v41, %v1442_v31  ;;  %v1635_v18 = vmul.f32 %v1634_v33, %v3988_v44  ;;  %v1919_v13 = vadd.f32 1.0, %v3066_v26  ;;  %v1988_v37 = vmul.f32 %v4262_v32, %v1950_v56  ;;  %vm1486_vm6 = vmor %vm1484_vm8, %vm1485_vm4 }
 0x1af   :  { %v1483_v43 = vadd.f32 %v3130_v48, %v1482_v4  ;;  %v874_v30 = vadd.f32 0.112945676, %v873_v22  ;;  %v911_v2 = vmul.f32 %v910_v20, %v3875_v54  ;;  %v950_v10 = vadd.f32 0.001143296, %v949_v16  ;;  %v5861_v20 = vld [vmem:[#allocation14_spill] sm:$0xff] }
 0x1b0   :  { %v3132_v21 = vpop.eup %3131  ;;  %v1447_v0 = vsel %vm1446_vm5, %v3128_v41, %v1443_v28  ;;  %v1636_v57 = vadd.f32 0.4994258, %v1635_v18  ;;  %v1951_v55 = vmul.f32 %v1919_v13, %v5859_v62  ;;  %vm1604_vm15 = vweird.f32 %v4585_v39 }
 0x1b1   :  { %v1452_v50 = vsel %vm4581_vm10, %v1451_v47, %v1447_v0  ;;  %v1487_v36 = vsel %vm1486_vm6, %v3130_v48, %v1483_v43  ;;  %v1600_v46 = vmul.f32 %v3132_v21, %v4585_v39  ;;  %vm1605_vm7 = vweird.f32 %v3132_v21  ;;  %v5864_v43 = vld [vmem:[#allocation45_spill] sm:$0xff] }
 0x1b2   :  { %v1453_v11 = vmul.f32 %v1452_v50, %v5860_v1  ;;  %v1492_v41 = vsel %vm4588_vm0, %v1491_v24, %v1487_v36  ;;  %v1637_v63 = vmul.f32 %v1636_v57, %v3988_v44  ;;  %v1989_v60 = vmul.f32 %v4267_v42, %v1951_v55  ;;  %vm1606_vm9 = vmor %vm1604_vm15, %vm1605_vm7  ;;  %v5866_v1 = vld [vmem:[#allocation69_spill] sm:$0xff] }
 0x1b3   :  { %v1493_v16 = vmul.f32 %v1492_v41, %v5861_v20  ;;  %v1601_v7 = vsub.f32 1.0, %v1600_v46  ;;  %v875_v56 = vmul.f32 %v874_v30, %v5851_v29  ;;  %v912_v48 = vadd.f32 0.014752088, %v911_v2 }
 0x1b4   :  { %v3063_v25 = vclamps-f32 %v1453_v11, 1.0  ;;  %v4621_v47 = vadd.f32 1.0, %v1637_v63  ;;  %v951_v31 = vmul.f32 %v950_v10, %v3890_v40  ;;  %v2031_v33 = vadd.f32 %v1989_v60, %v1988_v37 }
 0x1b5   :  { %v3064_v26 = vclamps-f32 %v1493_v16, 1.0  ;;  %v1602_v58 = vmul.f32 %v3132_v21, %v1601_v7  ;;  %v876_v24 = vadd.f32 0.4994258, %v875_v56  ;;  %vm4625_vm8 = vcmp.eq.f32.partialorder %v1608_v35, 8.507059e+37  ;;  %v5865_v35 = vld [vmem:[#allocation47_spill] sm:$0xff] }
 0x1b6   :  { %v1916_v4 = vadd.f32 1.0, %v3063_v25  ;;  %3133 = vrcp.f32 %v4621_v47  ;;  %2032 = vadd.xlane.f32.xlu2 %v2031_v33  ;;  %v1611_v18 = vor.u32 1.1754944e-38, %v1610_v5  ;;  %v913_v30 = vmul.f32 %v912_v48, %v3875_v54 }
 0x1b7   :  { %v1917_v22 = vadd.f32 1.0, %v3064_v26  ;;  %v1603_v28 = vadd.f32 %v3132_v21, %v1602_v58  ;;  %v877_v13 = vmul.f32 %v876_v24, %v5851_v29  ;;  %v952_v0 = vadd.f32 0.014752088, %v951_v31 }
 0x1b8   :  { %v1948_v37 = vmul.f32 %v1916_v4, %v5864_v43  ;;  %v990_v39 = vadd.f32 0.001143296, %v989_v61  ;;  %v1648_v10 = vand.u32 2147483647, %v4621_v47  ;;  %v914_v5 = vadd.f32 0.112945676, %v913_v30 }
 0x1b9   :  { %v1949_v57 = vmul.f32 %v1917_v22, %v5865_v35  ;;  %v1607_v2 = vsel %vm1606_vm9, %v3132_v21, %v1603_v28  ;;  %v4636_v62 = vadd.f32 1.0, %v877_v13  ;;  %v953_v50 = vmul.f32 %v952_v0, %v3890_v40 }
 0x1ba   :  { %v1986_v55 = vmul.f32 %v4262_v32, %v1948_v37  ;;  %v1612_v29 = vsel %vm4625_vm8, %v1611_v18, %v1607_v2  ;;  %v1650_v61 = vand.u32 2147483648, %v4621_v47  ;;  %v4648_v11 = vmul.f32 %v4519_v6, %v5866_v1 }
 0x1bb   :  { %v1987_v36 = vmul.f32 %v4267_v42, %v1949_v57  ;;  %v1613_v46 = vmul.f32 %v1612_v29, %v4161_v14  ;;  %3135 = vrcp.f32 %v4636_v62  ;;  %v4652_v41 = vmul.f32 %v4527_v51, %v4299_v23  ;;  %v5870_v29 = vld [vmem:[#allocation58_spill] sm:$0xff] }
 0x1bc   :  { %v3134_v21 = vpop.eup %3133  ;;  %v915_v63 = vmul.f32 %v914_v5, %v3875_v54  ;;  %v954_v60 = vadd.f32 0.112945676, %v953_v50  ;;  %v4656_v20 = vadd.f32 0.05243302, %v4525_v34  ;;  %vm1644_vm10 = vweird.f32 %v4621_v47 }
 0x1bd   :  { %v2028_v14 = vadd.f32 %v1987_v36, %v1986_v55  ;;  %v3067_v16 = vclamps-f32 %v1613_v46, 1.0  ;;  %v1640_v7 = vmul.f32 %v3134_v21, %v4621_v47  ;;  %vm4660_vm0 = vcmp.eq.f32.partialorder %v1648_v10, 8.507059e+37 }
 0x1be   :  { %v916_v6 = vadd.f32 0.4994258, %v915_v63  ;;  %v955_v51 = vmul.f32 %v954_v60, %v3890_v40  ;;  %v1651_v48 = vor.u32 1.1754944e-38, %v1650_v61  ;;  %v991_v31 = vmul.f32 %v990_v39, %v3984_v17  ;;  %v5869_v39 = vld [vmem:[#allocation35_spill] sm:$0xff] }
 0x1bf   :  { %2029 = vadd.xlane.f32.xlu1 %v2028_v14  ;;  %v1641_v25 = vsub.f32 1.0, %v1640_v7  ;;  %v1669_v34 = vmul.f32 3.8918573e-05, %v4036_v49  ;;  %v1920_v33 = vadd.f32 1.0, %v3067_v16  ;;  %vm884_vm3 = vweird.f32 %v4636_v62 }
 0x1c0   :  { %v917_v26 = vmul.f32 %v916_v6, %v3875_v54  ;;  %v956_v58 = vadd.f32 0.4994258, %v955_v51  ;;  %vm1645_vm4 = vweird.f32 %v3134_v21  ;;  %v992_v44 = vadd.f32 0.014752088, %v991_v31 }
 0x1c1   :  { %v3136_v24 = vpop.eup %3135  ;;  %v1642_v4 = vmul.f32 %v3134_v21, %v1641_v25  ;;  %v1670_v22 = vadd.f32 0.001143296, %v1669_v34  ;;  %v888_v18 = vand.u32 2147483647, %v4636_v62  ;;  %v890_v30 = vand.u32 2147483648, %v4636_v62  ;;  %vm1646_vm5 = vmor %vm1644_vm10, %vm1645_vm4 }
 0x1c2   :  { %v880_v28 = vmul.f32 %v3136_v24, %v4636_v62  ;;  %v4671_v13 = vadd.f32 1.0, %v917_v26  ;;  %v957_v43 = vmul.f32 %v956_v58, %v3890_v40  ;;  %v993_v0 = vmul.f32 %v992_v44, %v3984_v17  ;;  %v5875_v26 = vld [vmem:[#allocation61_spill] sm:$0xff] }
 0x1c3   :  { %v1643_v37 = vadd.f32 %v3134_v21, %v1642_v4  ;;  %v1671_v54 = vmul.f32 %v1670_v22, %v4036_v49  ;;  %v1952_v35 = vmul.f32 %v1920_v33, %v5869_v39  ;;  %v1709_v2 = vmul.f32 3.8918573e-05, %v4052_v52 }
 0x1c4   :  { %v881_v57 = vsub.f32 1.0, %v880_v28  ;;  %3137 = vrcp.f32 %v4671_v13  ;;  %v4682_v55 = vadd.f32 1.0, %v957_v43  ;;  %v994_v40 = vadd.f32 0.112945676, %v993_v0  ;;  %v5876_v28 = vld [vmem:[#allocation67_spill] sm:$0xff] }
 0x1c5   :  { %v1647_v10 = vsel %vm1646_vm5, %v3134_v21, %v1643_v37  ;;  %v1029_v5 = vmul.f32 3.8918573e-05, %v5870_v29  ;;  %vm885_vm6 = vweird.f32 %v3136_v24  ;;  %v1672_v47 = vadd.f32 0.014752088, %v1671_v54 }
 0x1c6   :  { %v1652_v50 = vsel %vm4660_vm0, %v1651_v48, %v1647_v10  ;;  %v882_v36 = vmul.f32 %v3136_v24, %v881_v57  ;;  %vm4688_vm7 = vcmp.eq.f32.partialorder %v888_v18, 8.507059e+37  ;;  %v928_v1 = vand.u32 2147483647, %v4671_v13  ;;  %vm886_vm15 = vmor %vm884_vm3, %vm885_vm6 }
 0x1c7   :  { %v1653_v46 = vmul.f32 %v1652_v50, %v4201_v15  ;;  %3139 = vrcp.f32 %v4682_v55  ;;  %v1990_v21 = vmul.f32 %v4262_v32, %v1952_v35  ;;  %v891_v60 = vor.u32 1.1754944e-38, %v890_v30 }
 0x1c8   :  { %v883_v63 = vadd.f32 %v3136_v24, %v882_v36  ;;  %v995_v14 = vmul.f32 %v994_v40, %v3984_v17  ;;  %vm924_vm8 = vweird.f32 %v4671_v13  ;;  %v1673_v15 = vmul.f32 %v1672_v47, %v4036_v49 }
 0x1c9   :  { %v3068_v16 = vclamps-f32 %v1653_v46, 1.0  ;;  %v1710_v7 = vadd.f32 0.001143296, %v1709_v2  ;;  %v930_v51 = vand.u32 2147483648, %v4671_v13  ;;  %v1030_v48 = vadd.f32 0.001143296, %v1029_v5 }
 0x1ca   :  { %v3138_v56 = vpop.eup %3137  ;;  %v887_v6 = vsel %vm886_vm15, %v3136_v24, %v883_v63  ;;  %v996_v25 = vadd.f32 0.4994258, %v995_v14  ;;  %vm4704_vm9 = vcmp.eq.f32.partialorder %v928_v1, 8.507059e+37  ;;  %v1674_v44 = vadd.f32 0.112945676, %v1673_v15 }
 0x1cb   :  { %v1921_v31 = vadd.f32 1.0, %v3068_v16  ;;  %v892_v34 = vsel %vm4688_vm7, %v891_v60, %v887_v6  ;;  %v920_v33 = vmul.f32 %v3138_v56, %v4671_v13  ;;  %v1711_v24 = vmul.f32 %v1710_v7, %v4052_v52  ;;  %v5879_v6 = vld [vmem:[#allocation68_spill] sm:$0xff] }
 0x1cc   :  { %v893_v58 = vmul.f32 %v892_v34, %v5875_v26  ;;  %v997_v4 = vmul.f32 %v996_v25, %v3984_v17  ;;  %vm925_vm10 = vweird.f32 %v3138_v56  ;;  %v968_v37 = vand.u32 2147483647, %v4682_v55  ;;  %v5880_v25 = vld [vmem:[#allocation50_spill] sm:$0xff] }
 0x1cd   :  { %v3140_v22 = vpop.eup %3139  ;;  %v1953_v18 = vmul.f32 %v1921_v31, %v5876_v28  ;;  %v921_v43 = vsub.f32 1.0, %v920_v33  ;;  %v1031_v39 = vmul.f32 %v1030_v48, %v5870_v29  ;;  %v1675_v57 = vmul.f32 %v1674_v44, %v4036_v49  ;;  %vm926_vm0 = vmor %vm924_vm8, %vm925_vm10  ;;  %v5881_v44 = vld [vmem:[#allocation70_spill] sm:$0xff] }
 0x1ce   :  { %v3049_v30 = vclamps-f32 %v893_v58, 1.0  ;;  %v960_v0 = vmul.f32 %v3140_v22, %v4682_v55  ;;  %v4714_v54 = vadd.f32 1.0, %v997_v4  ;;  %v1712_v2 = vadd.f32 0.014752088, %v1711_v24 }
 0x1cf   :  { %v1991_v35 = vmul.f32 %v4267_v42, %v1953_v18  ;;  %v922_v17 = vmul.f32 %v3138_v56, %v921_v43  ;;  %v931_v10 = vor.u32 1.1754944e-38, %v930_v51  ;;  %v970_v5 = vand.u32 2147483648, %v4682_v55 }
 0x1d0   :  { %v961_v40 = vsub.f32 1.0, %v960_v0  ;;  %3141 = vrcp.f32 %v4714_v54  ;;  %v1902_v47 = vadd.f32 1.0, %v3049_v30  ;;  %v1069_v46 = vmul.f32 3.8918573e-05, %v4047_v8 }
 0x1d1   :  { %v2034_v50 = vadd.f32 %v1991_v35, %v1990_v21  ;;  %v923_v36 = vadd.f32 %v3138_v56, %v922_v17  ;;  %vm965_vm3 = vweird.f32 %v3140_v22  ;;  %v1676_v1 = vadd.f32 0.4994258, %v1675_v57  ;;  %v5884_v57 = vld [vmem:[#allocation54_spill] sm:$0xff] }
 0x1d2   :  { %v962_v61 = vmul.f32 %v3140_v22, %v961_v40  ;;  %v1713_v63 = vmul.f32 %v1712_v2, %v4052_v52  ;;  %vm964_vm4 = vweird.f32 %v4682_v55  ;;  %vm4727_vm5 = vcmp.eq.f32.partialorder %v968_v37, 8.507059e+37 }
 0x1d3   :  { %2035 = vadd.xlane.f32.xlu0 %v2034_v50  ;;  %v927_v60 = vsel %vm926_vm0, %v3138_v56, %v923_v36  ;;  %v1032_v21 = vadd.f32 0.014752088, %v1031_v39  ;;  %v971_v13 = vor.u32 1.1754944e-38, %v970_v5  ;;  %v1677_v7 = vmul.f32 %v1676_v1, %v4036_v49  ;;  %vm966_vm6 = vmor %vm964_vm4, %vm965_vm3 }
 0x1d4   :  { %v932_v16 = vsel %vm4704_vm9, %v931_v10, %v927_v60  ;;  %v963_v15 = vadd.f32 %v3140_v22, %v962_v61  ;;  %v1934_v48 = vmul.f32 %v1902_v47, %v5880_v25  ;;  %v1008_v56 = vand.u32 2147483647, %v4714_v54 }
 0x1d5   :  { %v933_v51 = vmul.f32 %v932_v16, %v5879_v6  ;;  %v1714_v55 = vadd.f32 0.112945676, %v1713_v63  ;;  %v4737_v33 = vadd.f32 1.0, %v1677_v7  ;;  %v1033_v26 = vmul.f32 %v1032_v21, %v5870_v29 }
 0x1d6   :  { %v3142_v31 = vpop.eup %3141  ;;  %v967_v34 = vsel %vm966_vm6, %v3140_v22, %v963_v15  ;;  %v1070_v62 = vadd.f32 0.001143296, %v1069_v46  ;;  %vm1004_vm7 = vweird.f32 %v4714_v54  ;;  %v1010_v28 = vand.u32 2147483648, %v4714_v54 }
 0x1d7   :  { %v3050_v58 = vclamps-f32 %v933_v51, 1.0  ;;  %v972_v4 = vsel %vm4727_vm5, %v971_v13, %v967_v34  ;;  %v1000_v49 = vmul.f32 %v3142_v31, %v4714_v54  ;;  %3143 = vrcp.f32 %v4737_v33 }
 0x1d8   :  { %v973_v24 = vmul.f32 %v972_v4, %v5881_v44  ;;  %v1749_v22 = vmul.f32 3.8918573e-05, %v4097_v59  ;;  %vm4748_vm15 = vcmp.eq.f32.partialorder %v1008_v56, 8.507059e+37  ;;  %v1715_v30 = vmul.f32 %v1714_v55, %v4052_v52 }
 0x1d9   :  { %v1903_v18 = vadd.f32 1.0, %v3050_v58  ;;  %v1001_v43 = vsub.f32 1.0, %v1000_v49  ;;  %v1972_v0 = vmul.f32 %v4262_v32, %v1934_v48  ;;  %v1034_v35 = vadd.f32 0.112945676, %v1033_v26 }
 0x1da   :  { %v3051_v39 = vclamps-f32 %v973_v24, 1.0  ;;  %v1071_v17 = vmul.f32 %v1070_v62, %v4047_v8  ;;  %vm1005_vm8 = vweird.f32 %v3142_v31  ;;  %v1716_v40 = vadd.f32 0.4994258, %v1715_v30  ;;  %v5885_v62 = vld [vmem:[#allocation13_spill] sm:$0xff] }
 0x1db   :  { %v1935_v2 = vmul.f32 %v1903_v18, %v5884_v57  ;;  %v1002_v10 = vmul.f32 %v3142_v31, %v1001_v43  ;;  %v1035_v5 = vmul.f32 %v1034_v35, %v5870_v29  ;;  %v1750_v36 = vadd.f32 0.001143296, %v1749_v22  ;;  %vm1006_vm9 = vmor %vm1004_vm7, %vm1005_vm8 }
 0x1dc   :  { %v1072_v50 = vadd.f32 0.014752088, %v1071_v17  ;;  %v1789_v47 = vmul.f32 3.8918573e-05, %v4137_v38  ;;  %v1011_v1 = vor.u32 1.1754944e-38, %v1010_v28  ;;  %v1717_v63 = vmul.f32 %v1716_v40, %v4052_v52 }
 0x1dd   :  { %v1973_v46 = vmul.f32 %v4267_v42, %v1935_v2  ;;  %v1003_v61 = vadd.f32 %v3142_v31, %v1002_v10  ;;  %v3144_v60 = vpop.eup %3143  ;;  %v1904_v14 = vadd.f32 1.0, %v3051_v39  ;;  %v1036_v21 = vadd.f32 0.4994258, %v1035_v5  ;;  %v5888_v39 = vld [vmem:[#allocation59_spill] sm:$0xff] }
 0x1de   :  { %v1073_v16 = vmul.f32 %v1072_v50, %v4047_v8  ;;  %v1751_v15 = vmul.f32 %v1750_v36, %v4097_v59  ;;  %v1680_v6 = vmul.f32 %v3144_v60, %v4737_v33  ;;  %v1688_v51 = vand.u32 2147483647, %v4737_v33 }
 0x1df   :  { %v2007_v13 = vadd.f32 %v1973_v46, %v1972_v0  ;;  %v1007_v7 = vsel %vm1006_vm9, %v3142_v31, %v1003_v61  ;;  %v4768_v52 = vadd.f32 1.0, %v1717_v63  ;;  %v1037_v54 = vmul.f32 %v1036_v21, %v5870_v29 }
 0x1e0   :  { %v1012_v25 = vsel %vm4748_vm15, %v1011_v1, %v1007_v7  ;;  %v1790_v48 = vadd.f32 0.001143296, %v1789_v47  ;;  %v1681_v55 = vsub.f32 1.0, %v1680_v6  ;;  %v1074_v34 = vadd.f32 0.112945676, %v1073_v16 }
 0x1e1   :  { %2008 = vadd.xlane.f32.xlu1 %v2007_v13  ;;  %v1013_v56 = vmul.f32 %v1012_v25, %v4197_v12  ;;  %v1752_v26 = vadd.f32 0.014752088, %v1751_v15  ;;  %v1936_v31 = vmul.f32 %v1904_v14, %v5885_v62  ;;  %vm1685_vm10 = vweird.f32 %v3144_v60 }
 0x1e2   :  { %v1690_v58 = vand.u32 2147483648, %v4737_v33  ;;  %3145 = vrcp.f32 %v4768_v52  ;;  %v1682_v49 = vmul.f32 %v3144_v60, %v1681_v55  ;;  %v4775_v44 = vadd.f32 1.0, %v1037_v54 }
 0x1e3   :  { %v3052_v4 = vclamps-f32 %v1013_v56, 1.0  ;;  %v1075_v29 = vmul.f32 %v1074_v34, %v4047_v8  ;;  %vm1684_vm0 = vweird.f32 %v4737_v33  ;;  %vm4779_vm3 = vcmp.eq.f32.partialorder %v1688_v51, 8.507059e+37 }
 0x1e4   :  { %v1753_v24 = vmul.f32 %v1752_v26, %v4097_v59  ;;  %v1791_v28 = vmul.f32 %v1790_v48, %v4137_v38  ;;  %v1683_v18 = vadd.f32 %v3144_v60, %v1682_v49  ;;  %v1728_v43 = vand.u32 2147483647, %v4768_v52  ;;  %vm1686_vm4 = vmor %vm1684_vm0, %vm1685_vm10 }
 0x1e5   :  { %v1905_v22 = vadd.f32 1.0, %v3052_v4  ;;  %3147 = vrcp.f32 %v4775_v44  ;;  %v1974_v37 = vmul.f32 %v4262_v32, %v1936_v31  ;;  %v1691_v30 = vor.u32 1.1754944e-38, %v1690_v58 }
 0x1e6   :  { %v1730_v33 = vand.u32 2147483648, %v4768_v52  ;;  %v1076_v0 = vadd.f32 0.4994258, %v1075_v29  ;;  %v1687_v17 = vsel %vm1686_vm4, %v3144_v60, %v1683_v18  ;;  %v1754_v57 = vadd.f32 0.112945676, %v1753_v24 }
 0x1e7   :  { %v1937_v35 = vmul.f32 %v1905_v22, %v5888_v39  ;;  %v1792_v2 = vadd.f32 0.014752088, %v1791_v28  ;;  %v4792_v40 = vadd.f32 0.05243302, %v4652_v41  ;;  %v1692_v5 = vsel %vm4779_vm3, %v1691_v30, %v1687_v17 }
 0x1e8   :  { %v3146_v10 = vpop.eup %3145  ;;  %vm1724_vm5 = vweird.f32 %v4768_v52  ;;  %v1077_v50 = vmul.f32 %v1076_v0, %v4047_v8  ;;  %v1693_v47 = vmul.f32 %v1692_v5, %v4207_v45  ;;  %vm4801_vm6 = vcmp.eq.f32.partialorder %v1728_v43, 8.507059e+37  ;;  %v5893_v43 = vld [vmem:[#allocation73_spill] sm:$0xff]  ;;  %v5894_v0 = vld [vmem:[#allocation72_spill] sm:$0xff] }
 0x1e9   :  { %v1975_v36 = vmul.f32 %v4267_v42, %v1937_v35  ;;  %v1720_v46 = vmul.f32 %v3146_v10, %v4768_v52  ;;  %v1048_v41 = vand.u32 2147483647, %v4775_v44  ;;  %v1755_v63 = vmul.f32 %v1754_v57, %v4097_v59  ;;  %v5897_v5 = vld [vmem:[#allocation17_spill] sm:$0xff] }
 0x1ea   :  { %v4806_v1 = vadd.f32 1.0, %v1077_v50  ;;  %v1793_v60 = vmul.f32 %v1792_v2, %v4137_v38  ;;  %v3069_v21 = vclamps-f32 %v1693_v47, 1.0  ;;  %v1731_v15 = vor.u32 1.1754944e-38, %v1730_v33 }
 0x1eb   :  { %v3148_v14 = vpop.eup %3147  ;;  %v2010_v8 = vadd.f32 %v1975_v36, %v1974_v37  ;;  %v1721_v16 = vsub.f32 1.0, %v1720_v46  ;;  %vm1044_vm7 = vweird.f32 %v4775_v44  ;;  %v1109_v13 = vmul.f32 3.8918573e-05, %v4085_v19 }
 0x1ec   :  { %v1040_v45 = vmul.f32 %v3148_v14, %v4775_v44  ;;  %3149 = vrcp.f32 %v4806_v1  ;;  %vm1725_vm15 = vweird.f32 %v3146_v10  ;;  %v1050_v6 = vand.u32 2147483648, %v4775_v44 }
 0x1ed   :  { %2011 = vadd.xlane.f32.xlu2 %v2010_v8  ;;  %v1722_v7 = vmul.f32 %v3146_v10, %v1721_v16  ;;  %v1149_v51 = vmul.f32 3.8918573e-05, %v4126_v9  ;;  %vm4816_vm8 = vcmp.eq.f32.partialorder %v1048_v41, 8.507059e+37  ;;  %v1756_v48 = vadd.f32 0.4994258, %v1755_v63  ;;  %vm1726_vm10 = vmor %vm1724_vm5, %vm1725_vm15  ;;  %v5898_v16 = vld [vmem:[#allocation16_spill] sm:$0xff] }
 0x1ee   :  { %v1041_v25 = vsub.f32 1.0, %v1040_v45  ;;  %v1794_v56 = vadd.f32 0.112945676, %v1793_v60  ;;  %v1922_v34 = vadd.f32 1.0, %v3069_v21  ;;  %vm1045_vm9 = vweird.f32 %v3148_v14 }
 0x1ef   :  { %v1723_v55 = vadd.f32 %v3146_v10, %v1722_v7  ;;  %v1088_v26 = vand.u32 2147483647, %v4806_v1  ;;  %v1757_v31 = vmul.f32 %v1756_v48, %v4097_v59  ;;  %v1110_v4 = vadd.f32 0.001143296, %v1109_v13  ;;  %vm1046_vm3 = vmor %vm1044_vm7, %vm1045_vm9 }
 0x1f0   :  { %v1042_v62 = vmul.f32 %v3148_v14, %v1041_v25  ;;  %v1795_v58 = vmul.f32 %v1794_v56, %v4137_v38  ;;  %v1051_v29 = vor.u32 1.1754944e-38, %v1050_v6  ;;  %vm1084_vm0 = vweird.f32 %v4806_v1 }
 0x1f1   :  { %v1727_v49 = vsel %vm1726_vm10, %v3146_v10, %v1723_v55  ;;  %v1090_v12 = vand.u32 2147483648, %v4806_v1  ;;  %v4829_v18 = vadd.f32 1.0, %v1757_v31  ;;  %v1111_v30 = vmul.f32 %v1110_v4, %v4085_v19 }
 0x1f2   :  { %v3150_v24 = vpop.eup %3149  ;;  %v1732_v28 = vsel %vm4801_vm6, %v1731_v15, %v1727_v49  ;;  %v1043_v22 = vadd.f32 %v3148_v14, %v1042_v62  ;;  %v1796_v52 = vadd.f32 0.4994258, %v1795_v58  ;;  %v1150_v33 = vadd.f32 0.001143296, %v1149_v51  ;;  %v5902_v58 = vld [vmem:[#allocation18_spill] sm:$0xff] }
 0x1f3   :  { %v1733_v37 = vmul.f32 %v1732_v28, %v5893_v43  ;;  %v1080_v59 = vmul.f32 %v3150_v24, %v4806_v1  ;;  %v1954_v39 = vmul.f32 %v1922_v34, %v5894_v0  ;;  %vm4838_vm4 = vcmp.eq.f32.partialorder %v1088_v26, 8.507059e+37  ;;  %v5899_v34 = vld [vmem:[#allocation71_spill] sm:$0xff]  ;;  %v5904_v1 = vld [vmem:[#allocation74_spill] sm:$0xff] }
 0x1f4   :  { %v1047_v35 = vsel %vm1046_vm3, %v3148_v14, %v1043_v22  ;;  %3151 = vrcp.f32 %v4829_v18  ;;  %v1091_v10 = vor.u32 1.1754944e-38, %v1090_v12  ;;  %v1797_v36 = vmul.f32 %v1796_v52, %v4137_v38 }
 0x1f5   :  { %v3070_v57 = vclamps-f32 %v1733_v37, 1.0  ;;  %v1052_v2 = vsel %vm4816_vm8, %v1051_v29, %v1047_v35  ;;  %v1081_v44 = vsub.f32 1.0, %v1080_v59  ;;  %v1112_v47 = vadd.f32 0.014752088, %v1111_v30 }
 0x1f6   :  { %v1053_v50 = vmul.f32 %v1052_v2, %v5897_v5  ;;  %v1829_v46 = vmul.f32 3.8918573e-05, %v4275_v27  ;;  %vm1085_vm5 = vweird.f32 %v3150_v24  ;;  %v1151_v63 = vmul.f32 %v1150_v33, %v4126_v9 }
 0x1f7   :  { %v1923_v61 = vadd.f32 1.0, %v3070_v57  ;;  %v1082_v41 = vmul.f32 %v3150_v24, %v1081_v44  ;;  %v1992_v60 = vmul.f32 %v4262_v32, %v1954_v39  ;;  %v1768_v8 = vand.u32 2147483647, %v4829_v18  ;;  %vm1086_vm7 = vmor %vm1084_vm0, %vm1085_vm5 }
 0x1f8   :  { %v3053_v14 = vclamps-f32 %v1053_v50, 1.0  ;;  %v4851_v21 = vadd.f32 1.0, %v1797_v36  ;;  %vm1764_vm6 = vweird.f32 %v4829_v18  ;;  %v1113_v38 = vmul.f32 %v1112_v47, %v4085_v19  ;;  %v5903_v36 = vld [vmem:[#allocation15_spill] sm:$0xff] }
 0x1f9   :  { %v1955_v15 = vmul.f32 %v1923_v61, %v5898_v16  ;;  %v1083_v45 = vadd.f32 %v3150_v24, %v1082_v41  ;;  %v1152_v6 = vadd.f32 0.014752088, %v1151_v63  ;;  %v1830_v51 = vadd.f32 0.001143296, %v1829_v46 }
 0x1fa   :  { %v3152_v13 = vpop.eup %3151  ;;  %v1906_v7 = vadd.f32 1.0, %v3053_v14  ;;  %3153 = vrcp.f32 %v4851_v21  ;;  %v1869_v56 = vmul.f32 3.8918573e-05, %v4299_v23  ;;  %vm4865_vm15 = vcmp.eq.f32.partialorder %v1768_v8, 8.507059e+37 }
 0x1fb   :  { %v1993_v25 = vmul.f32 %v4267_v42, %v1955_v15  ;;  %v1087_v54 = vsel %vm1086_vm7, %v3150_v24, %v1083_v45  ;;  %v1760_v48 = vmul.f32 %v3152_v13, %v4829_v18  ;;  %v1770_v62 = vand.u32 2147483648, %v4829_v18 }
 0x1fc   :  { %v1092_v55 = vsel %vm4838_vm4, %v1091_v10, %v1087_v54  ;;  %v1938_v26 = vmul.f32 %v1906_v7, %v5899_v34  ;;  %v1114_v29 = vadd.f32 0.112945676, %v1113_v38  ;;  %vm1765_vm8 = vweird.f32 %v3152_v13 }
 0x1fd   :  { %v2037_v31 = vadd.f32 %v1993_v25, %v1992_v60  ;;  %v1093_v4 = vmul.f32 %v1092_v55, %v5902_v58  ;;  %v1761_v49 = vsub.f32 1.0, %v1760_v48  ;;  %v1808_v12 = vand.u32 2147483647, %v4851_v21  ;;  %vm1766_vm9 = vmor %vm1764_vm6, %vm1765_vm8 }
 0x1fe   :  { %v1153_v24 = vmul.f32 %v1152_v6, %v4126_v9  ;;  %v1831_v28 = vmul.f32 %v1830_v51, %v4275_v27  ;;  %v1115_v43 = vmul.f32 %v1114_v29, %v4085_v19  ;;  %v1870_v37 = vadd.f32 0.001143296, %v1869_v56 }
 0x1ff   :  { %2038 = vadd.xlane.f32.xlu1 %v2037_v31  ;;  %v3054_v22 = vclamps-f32 %v1093_v4, 1.0  ;;  %v1762_v52 = vmul.f32 %v3152_v13, %v1761_v49  ;;  %v1771_v30 = vor.u32 1.1754944e-38, %v1770_v62  ;;  %v1810_v33 = vand.u32 2147483648, %v4851_v21 }
 0x200   :  { %v3154_v59 = vpop.eup %3153  ;;  %v1154_v0 = vadd.f32 0.112945676, %v1153_v24  ;;  %v1832_v39 = vadd.f32 0.014752088, %v1831_v28  ;;  %v1976_v17 = vmul.f32 %v4262_v32, %v1938_v26  ;;  %v1116_v44 = vadd.f32 0.4994258, %v1115_v43 }
 0x201   :  { %v1907_v35 = vadd.f32 1.0, %v3054_v22  ;;  %v1763_v57 = vadd.f32 %v3152_v13, %v1762_v52  ;;  %v1800_v2 = vmul.f32 %v3154_v59, %v4851_v21  ;;  %v1871_v50 = vmul.f32 %v1870_v37, %v4299_v23  ;;  %v5906_v28 = vld [vmem:[#allocation60_spill] sm:$0xff] }
 0x202   :  { %v1155_v10 = vmul.f32 %v1154_v0, %v4126_v9  ;;  %v1833_v5 = vmul.f32 %v1832_v39, %v4275_v27  ;;  %vm1805_vm10 = vweird.f32 %v3154_v59  ;;  %v1117_v63 = vmul.f32 %v1116_v44, %v4085_v19  ;;  %v5907_v37 = vld [vmem:[#allocation64_spill] sm:$0xff]  ;;  %v5909_v39 = vld [vmem:[#allocation62_spill] sm:$0xff] }
 0x203   :  { %v1939_v47 = vmul.f32 %v1907_v35, %v5903_v36  ;;  %v1767_v46 = vsel %vm1766_vm9, %v3152_v13, %v1763_v57  ;;  %v1801_v61 = vsub.f32 1.0, %v1800_v2  ;;  %v1872_v15 = vadd.f32 0.014752088, %v1871_v50  ;;  %v5910_v36 = vld [vmem:[#allocation65_spill] sm:$0xff] }
 0x204   :  { %v1772_v41 = vsel %vm4865_vm15, %v1771_v30, %v1767_v46  ;;  %v1156_v60 = vadd.f32 0.4994258, %v1155_v10  ;;  %v1834_v18 = vadd.f32 0.112945676, %v1833_v5  ;;  %vm1804_vm0 = vweird.f32 %v4851_v21  ;;  %v5908_v30 = vld [vmem:[#allocation66_spill] sm:$0xff] }
 0x205   :  { %v1977_v14 = vmul.f32 %v4267_v42, %v1939_v47  ;;  %v1773_v8 = vmul.f32 %v1772_v41, %v4516_v3  ;;  %v1802_v16 = vmul.f32 %v3154_v59, %v1801_v61  ;;  %v4891_v45 = vadd.f32 1.0, %v1117_v63  ;;  %vm1806_vm3 = vmor %vm1804_vm0, %vm1805_vm10 }
 0x206   :  { %v1157_v38 = vmul.f32 %v1156_v60, %v4126_v9  ;;  %v1835_v13 = vmul.f32 %v1834_v18, %v4275_v27  ;;  %v1873_v19 = vmul.f32 %v1872_v15, %v4299_v23  ;;  %v1824_v25 = vmul.f32 %v4656_v20, %v4275_v27  ;;  %v5905_v20 = vld [vmem:[#allocation63_spill] sm:$0xff] }
 0x207   :  { %v2013_v7 = vadd.f32 %v1977_v14, %v1976_v17  ;;  %v3071_v6 = vclamps-f32 %v1773_v8, 1.0  ;;  %v1803_v51 = vadd.f32 %v3154_v59, %v1802_v16  ;;  %vm1809_vm4 = vcmp.eq.f32.partialorder %v1808_v12, 8.507059e+37 }
 0x208   :  { %v1811_v3 = vor.u32 1.1754944e-38, %v1810_v33  ;;  %3155 = vrcp.f32 %v4891_v45  ;;  %v4900_v48 = vadd.f32 1.0, %v1157_v38  ;;  %v1836_v56 = vadd.f32 0.4994258, %v1835_v13 }
 0x209   :  { %2014 = vadd.xlane.f32.xlu2 %v2013_v7  ;;  %v1807_v21 = vsel %vm1806_vm3, %v3154_v59, %v1803_v51  ;;  %v1924_v54 = vadd.f32 1.0, %v3071_v6  ;;  %v1146_v55 = vmul.f32 %v4509_v53, %v4126_v9  ;;  %v1874_v26 = vadd.f32 0.112945676, %v1873_v19 }
 0x20a   :  { %v1812_v34 = vsel %vm1809_vm4, %v1811_v3, %v1807_v21  ;;  %v1107_v62 = vadd.f32 1.1283791, %v5904_v1  ;;  %v580_v31 = vmul.f32 0.5, %v5905_v20  ;;  %3157 = vrcp.f32 %v4900_v48 }
 0x20b   :  { %v1813_v58 = vmul.f32 %v1812_v34, %v4648_v11  ;;  %v1825_v4 = vadd.f32 0.18741608, %v1824_v25  ;;  %v1864_v49 = vmul.f32 %v4792_v40, %v4299_v23  ;;  %v1837_v29 = vmul.f32 %v1836_v56, %v4275_v27 }
 0x20c   :  { %v1875_v12 = vmul.f32 %v1874_v26, %v4299_v23  ;;  %v1956_v9 = vmul.f32 %v1924_v54, %v580_v31  ;;  %v4913_v22 = vmul.f32 0.5, %v5906_v28  ;;  %v1147_v52 = vadd.f32 1.1283791, %v1146_v55  ;;  %v5911_v26 = vld [vmem:[#allocation77_spill] sm:$0xff] }
 0x20d   :  { %v3072_v24 = vclamps-f32 %v1813_v58, 1.0  ;;  %v4915_v43 = vadd.f32 1.0, %v1837_v29  ;;  %v4918_v59 = vmul.f32 0.5, %v5907_v37  ;;  %v581_v33 = vmul.f32 0.5, %v5908_v30 }
 0x20e   :  { %v3156_v53 = vpop.eup %3155  ;;  %v1876_v11 = vadd.f32 0.4994258, %v1875_v12  ;;  %v1108_v35 = vmul.f32 %v1107_v62, %v5909_v39  ;;  %v1826_v17 = vmul.f32 %v1825_v4, %v4275_v27  ;;  %v1865_v57 = vadd.f32 0.18741608, %v1864_v49 }
 0x20f   :  { %v1925_v40 = vadd.f32 1.0, %v3072_v24  ;;  %v1120_v0 = vmul.f32 %v3156_v53, %v4891_v45  ;;  %3159 = vrcp.f32 %v4915_v43  ;;  %v1994_v10 = vmul.f32 %v4262_v32, %v1956_v9 }
 0x210   :  { %v3158_v2 = vpop.eup %3157  ;;  %v1877_v50 = vmul.f32 %v1876_v11, %v4299_v23  ;;  %v1148_v47 = vmul.f32 %v1147_v52, %v5910_v36  ;;  %v1128_v46 = vand.u32 2147483647, %v4891_v45  ;;  %v1130_v61 = vand.u32 2147483648, %v4891_v45 }
 0x211   :  { %v1957_v44 = vmul.f32 %v1925_v40, %v581_v33  ;;  %v1121_v5 = vsub.f32 1.0, %v1120_v0  ;;  %v1160_v41 = vmul.f32 %v3158_v2, %v4900_v48  ;;  %vm1125_vm5 = vweird.f32 %v3156_v53 }
 0x212   :  { %v4932_v60 = vadd.f32 1.0, %v1877_v50  ;;  %v1827_v18 = vadd.f32 1.1283791, %v1826_v17  ;;  %v1866_v14 = vmul.f32 %v1865_v57, %v4299_v23  ;;  %vm1124_vm6 = vweird.f32 %v4891_v45  ;;  %v5914_v50 = vld [vmem:[#allocation78_spill] sm:$0xff] }
 0x213   :  { %v1995_v27 = vmul.f32 %v4267_v42, %v1957_v44  ;;  %v1122_v63 = vmul.f32 %v3156_v53, %v1121_v5  ;;  %v1161_v8 = vsub.f32 1.0, %v1160_v41  ;;  %v1170_v38 = vand.u32 2147483648, %v4900_v48  ;;  %vm1126_vm7 = vmor %vm1124_vm6, %vm1125_vm5 }
 0x214   :  { %3161 = vrcp.f32 %v4932_v60  ;;  %v1131_v7 = vor.u32 1.1754944e-38, %v1130_v61  ;;  %vm1165_vm15 = vweird.f32 %v3158_v2  ;;  %v1168_v51 = vand.u32 2147483647, %v4900_v48 }
 0x215   :  { %v2040_v16 = vadd.f32 %v1995_v27, %v1994_v10  ;;  %v1123_v15 = vadd.f32 %v3156_v53, %v1122_v63  ;;  %v3160_v13 = vpop.eup %3159  ;;  %v1162_v6 = vmul.f32 %v3158_v2, %v1161_v8  ;;  %vm1129_vm8 = vcmp.eq.f32.partialorder %v1128_v46, 8.507059e+37  ;;  %v5915_v27 = vld [vmem:[#allocation75_spill] sm:$0xff] }
 0x216   :  { %vm1164_vm9 = vweird.f32 %v4900_v48  ;;  %v1840_v23 = vmul.f32 %v3160_v13, %v4915_v43  ;;  %v1848_v3 = vand.u32 2147483647, %v4915_v43  ;;  %v1850_v21 = vand.u32 2147483648, %v4915_v43 }
 0x217   :  { %2041 = vadd.xlane.f32.xlu2 %v2040_v16  ;;  %v1127_v19 = vsel %vm1126_vm7, %v3156_v53, %v1123_v15  ;;  %v1163_v25 = vadd.f32 %v3158_v2, %v1162_v6  ;;  %v1867_v54 = vadd.f32 1.1283791, %v1866_v14  ;;  %vm1166_vm10 = vmor %vm1164_vm9, %vm1165_vm15  ;;  %v1171_v55 = vor.u32 1.1754944e-38, %v1170_v38  ;;  %v4950_v53 = vld [vmem:[#allocation4 + $0x40] sm:$0xff]  ;;  %v5916_v16 = vld [vmem:[#allocation76_spill] sm:$0xff] }
 0x218   :  { %v1132_v45 = vsel %vm1129_vm8, %v1131_v7, %v1127_v19  ;;  %v1841_v34 = vsub.f32 1.0, %v1840_v23  ;;  %v1828_v1 = vmul.f32 %v1827_v18, %v5911_v26  ;;  %vm1169_vm0 = vcmp.eq.f32.partialorder %v1168_v51, 8.507059e+37  ;;  %v4972_v51 = vpop.permute.xlu1 %2643 }
 0x219   :  { %v1133_v56 = vmul.f32 %v1132_v45, %v1108_v35  ;;  %v1167_v62 = vsel %vm1166_vm10, %v3158_v2, %v1163_v25  ;;  %vm1844_vm3 = vweird.f32 %v4915_v43  ;;  %vm1845_vm4 = vweird.f32 %v3160_v13 }
 0x21a   :  { %v3162_v48 = vpop.eup %3161  ;;  %v1172_v31 = vsel %vm1169_vm0, %v1171_v55, %v1167_v62  ;;  %v1842_v58 = vmul.f32 %v3160_v13, %v1841_v34  ;;  %vm4945_vm5 = vcmp.eq.f32.partialorder %v1848_v3, 8.507059e+37  ;;  %v1851_v29 = vor.u32 1.1754944e-38, %v1850_v21  ;;  %vm1846_vm7 = vmor %vm1844_vm3, %vm1845_vm4  ;;  %v4984_v21 = vpop.permute.xlu0 %2657 }
 0x21b   :  { %v3055_v20 = vclamps-f32 %v1133_v56, 1.0  ;;  %v1173_v4 = vmul.f32 %v1172_v31, %v1148_v47  ;;  %v1880_v12 = vmul.f32 %v3162_v48, %v4932_v60  ;;  %vm2571_vm6 = vcmp.lt.f32.partialorder %v4950_v53, 0.0  ;;  %5918 = vst [vmem:[#allocation33_spill] sm:$0xff] %v4984_v21 }
 0x21c   :  { %v1843_v9 = vadd.f32 %v3160_v13, %v1842_v58  ;;  %v2587_v28 = vceil.f32 %v4950_v53  ;;  %v1888_v37 = vand.u32 2147483647, %v4932_v60  ;;  %v2603_v30 = vfloor.f32 %v4950_v53 }
 0x21d   :  { %v1908_v24 = vadd.f32 1.0, %v3055_v20  ;;  %v3056_v52 = vclamps-f32 %v1173_v4, 1.0  ;;  %v1881_v11 = vsub.f32 1.0, %v1880_v12  ;;  %vm1885_vm15 = vweird.f32 %v3162_v48 }
 0x21e   :  { %v1847_v40 = vsel %vm1846_vm7, %v3160_v13, %v1843_v9  ;;  %v1890_v0 = vand.u32 2147483648, %v4932_v60  ;;  %v2619_v57 = vsel %vm2571_vm6, %v2587_v28, %v2603_v30  ;;  %vm1884_vm8 = vweird.f32 %v4932_v60 }
 0x21f   :  { %v1940_v33 = vmul.f32 %v1908_v24, %v4913_v22  ;;  %v1909_v39 = vadd.f32 1.0, %v3056_v52  ;;  %v1852_v35 = vsel %vm4945_vm5, %v1851_v29, %v1847_v40  ;;  %v1882_v17 = vmul.f32 %v3162_v48, %v1881_v11  ;;  %2659 = vrot.lane.b32.xlu1 %v2619_v57, %s3378_s2  ;;  %vm1886_vm9 = vmor %vm1884_vm8, %vm1885_vm15 }
 0x220   :  { %v1853_v2 = vmul.f32 %v1852_v35, %v1828_v1  ;;  %v1891_v5 = vor.u32 1.1754944e-38, %v1890_v0  ;;  %v1868_v36 = vmul.f32 %v1867_v54, %v5914_v50  ;;  %vm1889_vm10 = vcmp.eq.f32.partialorder %v1888_v37, 8.507059e+37  ;;  %v4974_v19 = vpop.permute.xlu1 %2645  ;;  %v4986_v54 = vpop.permute.xlu2 %2655 }
 0x221   :  { %v1941_v43 = vmul.f32 %v1909_v39, %v4918_v59  ;;  %v1978_v44 = vmul.f32 %v4262_v32, %v1940_v33  ;;  %v1883_v10 = vadd.f32 %v3162_v48, %v1882_v17  ;;  %v582_v63 = vmul.f32 0.5, %v5915_v27  ;;  %5919 = vst [vmem:[#allocation19_spill] sm:$0xff] %v4986_v54 }
 0x222   :  { %v3073_v22 = vclamps-f32 %v1853_v2, 1.0  ;;  %v583_v60 = vmul.f32 0.5, %v5916_v16  ;;  %v2062_v20 = vlaneseq  ;;  %vm5707_vm0 = vcmask 1047559  }
 0x223   :  { %v1979_v47 = vmul.f32 %v4267_v42, %v1941_v43  ;;  %v1887_v46 = vsel %vm1886_vm9, %v3162_v48, %v1883_v10  ;;  %vm2097_vm3 = vcmask 64512  }
 0x224   :  { %v1892_v61 = vsel %vm1889_vm10, %v1891_v5, %v1887_v46  ;;  %v1926_v41 = vadd.f32 1.0, %v3073_v22  ;;  %v5002_v31 = vand.u32 127, %v2062_v20 }
 0x225   :  { %v2016_v18 = vadd.f32 %v1979_v47, %v1978_v44  ;;  %v1893_v59 = vmul.f32 %v1892_v61, %v1868_v36 }
 0x226   :  { %v1958_v8 = vmul.f32 %v1926_v41, %v582_v63  ;;  %vm5714_vm10 = vcmp.lt.s32.totalorder %v5002_v31, 4 }
 0x227   :  { %2017 = vadd.xlane.f32.xlu0 %v2016_v18  ;;  %v3074_v14 = vclamps-f32 %v1893_v59, 1.0 }
 0x228   :  { %v1996_v13 = vmul.f32 %v4262_v32, %v1958_v8  ;;  %v4976_v23 = vpop.permute.xlu1 %2647  ;;  %v4992_v56 = vpop.xlane.xlu2 %2023 }
 0x229   :  { %v1927_v15 = vadd.f32 1.0, %v3074_v14  ;;  %v2072_v2 = vperm.slane %v4992_v56, %v5002_v31 }
 0x22b   :  { %v1959_v38 = vmul.f32 %v1927_v15, %v583_v60  ;;  %v3379_v15 = vmov 0  }
 0x22c   :  { %3098 = vset.pattern.permute.xlu2 %v3379_v15  ;;  %3097 = vset.pattern.permute.xlu1 %v3379_v15 }
 0x22d   :  { %v1997_v7 = vmul.f32 %v4267_v42, %v1959_v38  ;;  %v4990_v42 = vpop.xlane.xlu0 %1999  ;;  %3096 = vset.pattern.permute.xlu0 %v3379_v15 }
 0x22e   :  { %v2064_v12 = vperm.slane %v4990_v42, %v5002_v31 }
 0x22f   :  { %v2043_v6 = vadd.f32 %v1997_v7, %v1996_v13 }
 0x230   :  { %v4978_v45 = vpop.permute.xlu1 %2649  ;;  %v4994_v26 = vpop.xlane.xlu2 %2032 }
 0x231   :  { %2044 = vadd.xlane.f32.xlu0 %v2043_v6  ;;  %v2075_v5 = vperm.slane %v4994_v26, %v5002_v31 }
 0x235   :  { %v2003_v34 = vpop.xlane.xlu0 %2002 }
 0x236   :  { %v2065_v4 = vperm.slane %v2003_v34, %v5002_v31 }
 0x238   :  { %v4980_v25 = vpop.permute.xlu1 %2651  ;;  %v2080_v28 = vsel %vm5713_vm11, %v2065_v4, %v2064_v12 }
 0x23d   :  { %v4998_v62 = vpop.xlane.xlu0 %2026 }
 0x23e   :  { %v2073_v40 = vperm.slane %v4998_v62, %v5002_v31 }
 0x240   :  { %v4982_v3 = vpop.permute.xlu1 %2653  ;;  %v2088_v22 = vsel %vm5713_vm11, %v2073_v40, %v2072_v2 }
 0x241   :  { %5917 = vst [vmem:[#allocation31_spill] sm:$0xff] %v4982_v3 }
 0x246   :  { %v5007_v49 = vpop.xlane.xlu0 %2035 }
 0x247   :  { %v2076_v46 = vperm.slane %v5007_v49, %v5002_v31 }
 0x248   :  { %v4988_v32 = vpop.xlane.xlu1 %2020 }
 0x249   :  { %v2071_v35 = vperm.slane %v4988_v32, %v5002_v31 }
 0x250   :  { %v2006_v55 = vpop.xlane.xlu1 %2005 }
 0x251   :  { %v2066_v29 = vperm.slane %v2006_v55, %v5002_v31 }
 0x253   :  { %v2081_v52 = vsel %vm5712_vm12, %v2066_v29, %v2080_v28 }
 0x258   :  { %v4996_v1 = vpop.xlane.xlu1 %2029 }
 0x259   :  { %v2074_v17 = vperm.slane %v4996_v1, %v5002_v31 }
 0x25b   :  { %v2089_v47 = vsel %vm5712_vm12, %v2074_v17, %v2088_v22 }
 0x25c   :  { %v2090_v27 = vsel %vm5711_vm13, %v2075_v5, %v2089_v47 }
 0x25d   :  { %v2091_v63 = vsel %vm5710_vm14, %v2076_v46, %v2090_v27 }
 0x260   :  { %v5000_v48 = vpop.xlane.xlu2 %2011  ;;  %v5004_v58 = vpop.xlane.xlu1 %2008 }
 0x261   :  { %v2067_v24 = vperm.slane %v5004_v58, %v5002_v31  ;;  %v2068_v11 = vperm.slane %v5000_v48, %v5002_v31 }
 0x263   :  { %v2082_v37 = vsel %vm5711_vm13, %v2067_v24, %v2081_v52 }
 0x264   :  { %v2083_v0 = vsel %vm5710_vm14, %v2068_v11, %v2082_v37 }
 0x272   :  { %v5038_v44 = vpop.xlane.xlu1 %2038 }
 0x273   :  { %v2077_v61 = vperm.slane %v5038_v44, %v5002_v31 }
 0x275   :  { %v2092_v14 = vsel %vm5709_vm1, %v2077_v61, %v2091_v63 }
 0x27c   :  { %v5014_v9 = vpop.xlane.xlu2 %2014 }
 0x27d   :  { %v2069_v30 = vperm.slane %v5014_v9, %v5002_v31 }
 0x27f   :  { %v2084_v57 = vsel %vm5709_vm1, %v2069_v30, %v2083_v0 }
 0x28a   :  { %v5044_v50 = vpop.xlane.xlu2 %2041 }
 0x28b   :  { %v2078_v41 = vperm.slane %v5044_v50, %v5002_v31 }
 0x28d   :  { %v2093_v8 = vsel %vm5708_vm2, %v2078_v41, %v2092_v14 }
 0x291   :  { %v5064_v38 = vpop.permute.xlu1 %2659 }
 0x292   :  { %5920 = vst [vmem:[#allocation20_spill] sm:$0xff] %v5064_v38 }
 0x29a   :  { %v5023_v33 = vpop.xlane.xlu0 %2017 }
 0x29b   :  { %v2070_v39 = vperm.slane %v5023_v33, %v5002_v31 }
 0x29d   :  { %v2085_v43 = vsel %vm5708_vm2, %v2070_v39, %v2084_v57 }
 0x29e   :  { %v2087_v10 = vsel %vm5707_vm0, %v2071_v35, %v2085_v43 }
 0x29f   :  { %v2098_v36 = vsel %vm2097_vm3, %v2087_v10, -inf }
 0x2a0   :  { %2099 = vmax.xlane.f32.xlu1 %v2098_v36 }
 0x2a4   :  { %v5056_v18 = vpop.xlane.xlu0 %2044 }
 0x2a5   :  { %v2079_v59 = vperm.slane %v5056_v18, %v5002_v31 }
 0x2a7   :  { %v2094_v16 = vsel %vm5707_vm0, %v2079_v59, %v2093_v8 }
 0x2a8   :  { %v2101_v60 = vsel %vm2097_vm3, %v2094_v16, -inf }
 0x2a9   :  { %2102 = vmax.xlane.f32.xlu2 %v2101_v60 }
 0x313   :  { %v2100_v13 = vpop.xlane.xlu1 %2099 }
 0x314   :  { %v2107_v7 = vperm.slane %v2100_v13, 1  ;;  %v2106_v6 = vperm.slane %v2100_v13, 0  ;;  %v2108_v20 = vperm.slane %v2100_v13, 2  ;;  %v2110_v24 = vperm.slane %v2100_v13, 4 }
 0x315   :  { %v2113_v28 = vperm.slane %v2100_v13, 7  ;;  %v2109_v52 = vperm.slane %v2100_v13, 3  ;;  %v2111_v43 = vperm.slane %v2100_v13, 5 }
 0x316   :  { %v2139_v4 = vsub.f32 %v2003_v34, %v2107_v7  ;;  %v2138_v29 = vsub.f32 %v4990_v42, %v2106_v6  ;;  %v2140_v12 = vsub.f32 %v2006_v55, %v2108_v20  ;;  %v2142_v40 = vsub.f32 %v5000_v48, %v2110_v24 }
 0x317   :  { %v2145_v0 = vsub.f32 %v4988_v32, %v2113_v28  ;;  %v2141_v34 = vsub.f32 %v5004_v58, %v2109_v52  ;;  %v2112_v42 = vperm.slane %v2100_v13, 6  ;;  %v2143_v22 = vsub.f32 %v5014_v9, %v2111_v43 }
 0x318   :  { %v2156_v11 = vmul.f32 1.442695, %v2139_v4  ;;  %v2154_v37 = vmul.f32 1.442695, %v2138_v29  ;;  %v2158_v30 = vmul.f32 1.442695, %v2140_v12 }
 0x319   :  { %v2162_v35 = vmul.f32 1.442695, %v2142_v40  ;;  %v2168_v55 = vmul.f32 1.442695, %v2145_v0  ;;  %v2160_v2 = vmul.f32 1.442695, %v2141_v34  ;;  %v2144_v32 = vsub.f32 %v5023_v33, %v2112_v42 }
 0x31a   :  { %3163 = vpow2.f32 %v2156_v11  ;;  %v2164_v41 = vmul.f32 1.442695, %v2143_v22  ;;  %v5138_v34 = vld [vmem:[#allocation4 + $0x68] sm:$0xff] }
 0x31b   :  { %3165 = vpow2.f32 %v2154_v37  ;;  %v2166_v5 = vmul.f32 1.442695, %v2144_v32  ;;  %vm2576_vm5 = vcmp.lt.f32.partialorder %v5138_v34, 0.0 }
 0x31c   :  { %v5069_v39 = vpop.xlane.xlu2 %2102  ;;  %3167 = vpow2.f32 %v2158_v30 }
 0x31d   :  { %v2116_v17 = vperm.slane %v5069_v39, 2  ;;  %3169 = vpow2.f32 %v2162_v35  ;;  %v2115_v36 = vperm.slane %v5069_v39, 1  ;;  %v2119_v46 = vperm.slane %v5069_v39, 5 }
 0x31e   :  { %3171 = vpow2.f32 %v2168_v55  ;;  %v2114_v27 = vperm.slane %v5069_v39, 0  ;;  %v2118_v8 = vperm.slane %v5069_v39, 4  ;;  %v2117_v13 = vperm.slane %v5069_v39, 3 }
 0x31f   :  { %v2148_v58 = vsub.f32 %v4996_v1, %v2116_v17  ;;  %3173 = vpow2.f32 %v2160_v2  ;;  %v2147_v1 = vsub.f32 %v4998_v62, %v2115_v36  ;;  %v2151_v9 = vsub.f32 %v5038_v44, %v2119_v46  ;;  %v3230_v2 = vld [vmem:[#allocation4 + $0x48] sm:$0xff]  ;;  %v3232_v46 = vld [vmem:[#allocation4] sm:$0xff] }
 0x320   :  { %v5073_v57 = vpop.eup %3163  ;;  %3175 = vpow2.f32 %v2166_v5  ;;  %v2146_v59 = vsub.f32 %v4992_v56, %v2114_v27  ;;  %v2150_v56 = vsub.f32 %v5007_v49, %v2118_v8  ;;  %v2149_v44 = vsub.f32 %v4994_v26, %v2117_v13  ;;  %v5125_v26 = vld [vmem:[#allocation4 + $0x50] sm:$0xff] }
 0x321   :  { %v5075_v10 = vpop.eup %3165  ;;  %2206 = vperm.xlu1 %3097, %v5073_v57   ;;  %v2174_v47 = vmul.f32 1.442695, %v2148_v58  ;;  %v2172_v14 = vmul.f32 1.442695, %v2147_v1  ;;  %v2180_v16 = vmul.f32 1.442695, %v2151_v9  ;;  %v2589_v52 = vceil.f32 %v5125_v26 }
 0x322   :  { %v5078_v48 = vpop.eup %3167  ;;  %2203 = vperm.xlu0 %3096, %v5075_v10   ;;  %v2170_v15 = vmul.f32 1.442695, %v2146_v59  ;;  %v2178_v6 = vmul.f32 1.442695, %v2150_v56  ;;  %v2121_v20 = vperm.slane %v5069_v39, 7  ;;  %v2120_v12 = vperm.slane %v5069_v39, 6 }
 0x323   :  { %2209 = vperm.xlu2 %3098, %v5078_v48   ;;  %v5087_v61 = vpop.eup %3169  ;;  %3177 = vpow2.f32 %v2174_v47  ;;  %v2176_v29 = vmul.f32 1.442695, %v2149_v44  ;;  %v2605_v11 = vfloor.f32 %v5125_v26  ;;  %vm2573_vm4 = vcmp.lt.f32.partialorder %v5125_v26, 0.0  ;;  %v3231_v58 = vld [vmem:[#allocation4 + $0x60] sm:$0xff]  ;;  %v3234_v9 = vld [vmem:[#allocation4 + $0x78] sm:$0xff]  ;;  %v3236_v13 = vld [vmem:[#allocation4 + $0x70] sm:$0xff] }
 0x324   :  { %v5090_v33 = vpop.eup %3171  ;;  %3179 = vpow2.f32 %v2164_v41  ;;  %v2153_v49 = vsub.f32 %v5056_v18, %v2121_v20  ;;  %v2152_v37 = vsub.f32 %v5044_v50, %v2120_v12  ;;  %v2592_v35 = vceil.f32 %v5138_v34  ;;  %v3233_v41 = vld [vmem:[#allocation4 + $0x58] sm:$0xff]  ;;  %v3237_v20 = vld [vmem:[#allocation4 + $0x30] sm:$0xff]  ;;  %v3239_v12 = vld [vmem:[#allocation4 + $0x8] sm:$0xff] }
 0x325   :  { %v5093_v63 = vpop.eup %3173  ;;  %3181 = vpow2.f32 %v2172_v14  ;;  %v2621_v40 = vsel %vm2573_vm4, %v2589_v52, %v2605_v11  ;;  %v2608_v50 = vfloor.f32 %v5138_v34  ;;  %v2588_v43 = vceil.f32 %v3230_v2  ;;  %v3241_v52 = vld [vmem:[#allocation4 + $0x20] sm:$0xff]  ;;  %v3242_v11 = vld [vmem:[#allocation4 + $0x38] sm:$0xff] }
 0x326   :  { %v5101_v60 = vpop.eup %3175  ;;  %3183 = vpow2.f32 %v2180_v16  ;;  %v2184_v30 = vmul.f32 1.442695, %v2153_v49  ;;  %v2182_v39 = vmul.f32 1.442695, %v2152_v37  ;;  %v2604_v32 = vfloor.f32 %v3230_v2  ;;  %v3240_v49 = vld [vmem:[#allocation4 + $0x28] sm:$0xff] }
 0x327   :  { %3185 = vpow2.f32 %v2170_v15  ;;  %v2624_v42 = vsel %vm2576_vm5, %v2592_v35, %v2608_v50  ;;  %vm2572_vm6 = vcmp.lt.f32.partialorder %v3230_v2, 0.0  ;;  %v2591_v22 = vceil.f32 %v3231_v58  ;;  %v3235_v15 = vld [vmem:[#allocation4 + $0x18] sm:$0xff] }
 0x328   :  { %3187 = vpow2.f32 %v2178_v6  ;;  %v2607_v5 = vfloor.f32 %v3231_v58  ;;  %vm2575_vm7 = vcmp.lt.f32.partialorder %v3231_v58, 0.0  ;;  %v2620_v36 = vsel %vm2572_vm6, %v2588_v43, %v2604_v32 }
 0x329   :  { %2215 = vperm.xlu1 %3097, %v5087_v61   ;;  %v5104_v7 = vpop.eup %3177  ;;  %3189 = vpow2.f32 %v2176_v29  ;;  %v2590_v27 = vceil.f32 %v3233_v41  ;;  %v2606_v1 = vfloor.f32 %v3233_v41  ;;  %vm2574_vm15 = vcmp.lt.f32.partialorder %v3233_v41, 0.0  ;;  %v3238_v29 = vld [vmem:[#allocation4 + $0x10] sm:$0xff] }
 0x32a   :  { %2224 = vperm.xlu0 %3096, %v5090_v33   ;;  %v5107_v62 = vpop.eup %3179  ;;  %3191 = vpow2.f32 %v2184_v30  ;;  %v2623_v47 = vsel %vm2575_vm7, %v2591_v22, %v2607_v5  ;;  %v2594_v59 = vceil.f32 %v3234_v9  ;;  %v2610_v14 = vfloor.f32 %v3234_v9 }
 0x32b   :  { %2212 = vperm.xlu2 %3098, %v5093_v63   ;;  %v5114_v4 = vpop.eup %3181  ;;  %3193 = vpow2.f32 %v2182_v39  ;;  %vm2578_vm8 = vcmp.lt.f32.partialorder %v3234_v9, 0.0  ;;  %v2622_v8 = vsel %vm2574_vm15, %v2590_v27, %v2606_v1  ;;  %v2593_v56 = vceil.f32 %v3236_v13 }
 0x32c   :  { %v5117_v24 = vpop.eup %3183  ;;  %v2626_v16 = vsel %vm2578_vm8, %v2594_v59, %v2610_v14  ;;  %v2609_v44 = vfloor.f32 %v3236_v13  ;;  %vm2577_vm9 = vcmp.lt.f32.partialorder %v3236_v13, 0.0 }
 0x32d   :  { %v5120_v28 = vpop.eup %3185 }
 0x32e   :  { %v5131_v0 = vpop.eup %3187  ;;  %v2625_v6 = vsel %vm2577_vm9, %v2593_v56, %v2609_v44 }
 0x32f   :  { %v5134_v18 = vpop.eup %3189 }
 0x330   :  { %v5143_v55 = vpop.eup %3191 }
 0x331   :  { %2221 = vperm.xlu1 %3097, %v5101_v60   ;;  %v5146_v17 = vpop.eup %3193 }
 0x332   :  { %2233 = vperm.xlu0 %3096, %v5104_v7  }
 0x333   :  { %2218 = vperm.xlu2 %3098, %v5107_v62  }
 0x339   :  { %2230 = vperm.xlu1 %3097, %v5114_v4  }
 0x33a   :  { %2242 = vperm.xlu0 %3096, %v5117_v24  }
 0x33b   :  { %2227 = vperm.xlu2 %3098, %v5120_v28  }
 0x341   :  { %2239 = vperm.xlu1 %3097, %v5131_v0  }
 0x342   :  { %2663 = vrot.lane.b32.xlu0 %v2621_v40, %s3378_s2 }
 0x343   :  { %2236 = vperm.xlu2 %3098, %v5134_v18  }
 0x349   :  { %2248 = vperm.xlu1 %3097, %v5143_v55  }
 0x34a   :  { %2669 = vrot.lane.b32.xlu0 %v2624_v42, %s3378_s2 }
 0x34b   :  { %2245 = vperm.xlu2 %3098, %v5146_v17  }
 0x351   :  { %2661 = vrot.lane.b32.xlu1 %v2620_v36, %s3378_s2 }
 0x352   :  { %2691 = vrot.lane.b32.xlu0 %v3232_v46, %s3378_s2 }
 0x353   :  { %2667 = vrot.lane.b32.xlu2 %v2623_v47, %s3378_s2 }
 0x359   :  { %2665 = vrot.lane.b32.xlu1 %v2622_v8, %s3378_s2 }
 0x35a   :  { %2697 = vrot.lane.b32.xlu0 %v3235_v15, %s3378_s2 }
 0x35b   :  { %2673 = vrot.lane.b32.xlu2 %v2626_v16, %s3378_s2 }
 0x361   :  { %2671 = vrot.lane.b32.xlu1 %v2625_v6, %s3378_s2 }
 0x362   :  { %2703 = vrot.lane.b32.xlu0 %v3237_v20, %s3378_s2 }
 0x363   :  { %2695 = vrot.lane.b32.xlu2 %v3238_v29, %s3378_s2 }
 0x369   :  { %2693 = vrot.lane.b32.xlu1 %v3239_v12, %s3378_s2 }
 0x36a   :  { %2709 = vrot.lane.b32.xlu0 %v3230_v2, %s3378_s2 }
 0x36b   :  { %2701 = vrot.lane.b32.xlu2 %v3240_v49, %s3378_s2 }
 0x371   :  { %2699 = vrot.lane.b32.xlu1 %v3241_v52, %s3378_s2 }
 0x372   :  { %2715 = vrot.lane.b32.xlu0 %v3231_v58, %s3378_s2 }
 0x373   :  { %2707 = vrot.lane.b32.xlu2 %v4950_v53, %s3378_s2 }
 0x379   :  { %2705 = vrot.lane.b32.xlu1 %v3242_v11, %s3378_s2 }
 0x37a   :  { %2721 = vrot.lane.b32.xlu0 %v3234_v9, %s3378_s2 }
 0x37b   :  { %2713 = vrot.lane.b32.xlu2 %v3233_v41, %s3378_s2 }
 0x37d   :  { %v2210_v37 = vpop.permute.xlu2 %2209 }
 0x37e   :  { %v2252_v43 = vperm.slane %v2210_v37, %v5002_v31 }
 0x381   :  { %2711 = vrot.lane.b32.xlu1 %v5125_v26, %s3378_s2 }
 0x383   :  { %2719 = vrot.lane.b32.xlu2 %v3236_v13, %s3378_s2 }
 0x385   :  { %v2213_v30 = vpop.permute.xlu2 %2212 }
 0x389   :  { %2717 = vrot.lane.b32.xlu1 %v5138_v34, %s3378_s2  ;;  %v2253_v34 = vperm.slane %v2213_v30, %v5002_v31 }
 0x38d   :  { %v2219_v50 = vpop.permute.xlu2 %2218 }
 0x38e   :  { %v2255_v36 = vperm.slane %v2219_v50, %v5002_v31 }
 0x393   :  { %v2207_v40 = vpop.permute.xlu1 %2206 }
 0x394   :  { %v2204_v39 = vpop.permute.xlu0 %2203  ;;  %v2251_v53 = vperm.slane %v2207_v40, %v5002_v31 }
 0x395   :  { %v2250_v35 = vperm.slane %v2204_v39, %v5002_v31  ;;  %v2228_v46 = vpop.permute.xlu2 %2227 }
 0x396   :  { %v2258_v56 = vperm.slane %v2228_v46, %v5002_v31 }
 0x397   :  { %v2266_v42 = vsel %vm5713_vm11, %v2251_v53, %v2250_v35 }
 0x398   :  { %v2267_v32 = vsel %vm5712_vm12, %v2252_v43, %v2266_v42 }
 0x399   :  { %v2268_v22 = vsel %vm5711_vm13, %v2253_v34, %v2267_v32 }
 0x39b   :  { %v2216_v2 = vpop.permute.xlu1 %2215 }
 0x39c   :  { %v2225_v26 = vpop.permute.xlu0 %2224  ;;  %v2254_v58 = vperm.slane %v2216_v2, %v5002_v31 }
 0x39d   :  { %v2257_v1 = vperm.slane %v2225_v26, %v5002_v31  ;;  %v2237_v44 = vpop.permute.xlu2 %2236 }
 0x39e   :  { %v2269_v5 = vsel %vm5710_vm14, %v2254_v58, %v2268_v22  ;;  %v2261_v49 = vperm.slane %v2237_v44, %v5002_v31 }
 0x39f   :  { %v2270_v9 = vsel %vm5709_vm1, %v2255_v36, %v2269_v5 }
 0x3a3   :  { %v2222_v47 = vpop.permute.xlu1 %2221 }
 0x3a4   :  { %v2256_v41 = vperm.slane %v2222_v47, %v5002_v31  ;;  %v2234_v27 = vpop.permute.xlu0 %2233 }
 0x3a5   :  { %v2260_v20 = vperm.slane %v2234_v27, %v5002_v31  ;;  %v2246_v40 = vpop.permute.xlu2 %2245 }
 0x3a6   :  { %v2271_v59 = vsel %vm5708_vm2, %v2256_v41, %v2270_v9  ;;  %v2264_v35 = vperm.slane %v2246_v40, %v5002_v31 }
 0x3a7   :  { %v2272_v14 = vsel %vm5707_vm0, %v2257_v1, %v2271_v59 }
 0x3a8   :  { %v2282_v8 = vsel %vm2097_vm3, %v2272_v14, 0.0 }
 0x3a9   :  { %2283 = vadd.xlane.f32.xlu0 %v2282_v8 }
 0x3ab   :  { %v2231_v16 = vpop.permute.xlu1 %2230 }
 0x3ac   :  { %v2259_v15 = vperm.slane %v2231_v16, %v5002_v31  ;;  %v2243_v13 = vpop.permute.xlu0 %2242 }
 0x3ad   :  { %v2263_v39 = vperm.slane %v2243_v13, %v5002_v31  ;;  %v2668_v58 = vpop.permute.xlu2 %2667 }
 0x3ae   :  { %v2273_v6 = vsel %vm5713_vm11, %v2259_v15, %v2258_v56 }
 0x3af   :  { %v2274_v29 = vsel %vm5712_vm12, %v2260_v20, %v2273_v6 }
 0x3b0   :  { %v2275_v37 = vsel %vm5711_vm13, %v2261_v49, %v2274_v29 }
 0x3b3   :  { %v2240_v12 = vpop.permute.xlu1 %2239 }
 0x3b4   :  { %v2262_v52 = vperm.slane %v2240_v12, %v5002_v31  ;;  %v5197_v11 = vpop.permute.xlu0 %2663 }
 0x3b5   :  { %5921 = vst [vmem:[#allocation27_spill] sm:$0xff] %v5197_v11  ;;  %v2674_v22 = vpop.permute.xlu2 %2673 }
 0x3b6   :  { %v2276_v30 = vsel %vm5710_vm14, %v2262_v52, %v2275_v37 }
 0x3b7   :  { %v2277_v53 = vsel %vm5709_vm1, %v2263_v39, %v2276_v30 }
 0x3b8   :  { %v2278_v43 = vsel %vm5708_vm2, %v2264_v35, %v2277_v53 }
 0x3bb   :  { %v2249_v50 = vpop.permute.xlu1 %2248 }
 0x3bc   :  { %v2265_v42 = vperm.slane %v2249_v50, %v5002_v31  ;;  %v5205_v2 = vpop.permute.xlu0 %2669 }
 0x3bd   :  { %5922 = vst [vmem:[#allocation43_spill] sm:$0xff] %v5205_v2  ;;  %v5214_v36 = vpop.permute.xlu2 %2695 }
 0x3be   :  { %v2279_v26 = vsel %vm5707_vm0, %v2265_v42, %v2278_v43 }
 0x3bf   :  { %v2285_v32 = vsel %vm2097_vm3, %v2279_v26, 0.0 }
 0x3c0   :  { %2286 = vadd.xlane.f32.xlu2 %v2285_v32 }
 0x3c3   :  { %v2662_v27 = vpop.permute.xlu1 %2661 }
 0x3c4   :  { %v5210_v34 = vpop.permute.xlu0 %2691 }
 0x3c5   :  { %v5218_v46 = vpop.permute.xlu2 %2701 }
 0x3c6   :  { %5924 = vst [vmem:[#allocation25_spill] sm:$0xff] %v5218_v46 }
 0x3cb   :  { %v2666_v16 = vpop.permute.xlu1 %2665 }
 0x3cc   :  { %v5212_v5 = vpop.permute.xlu0 %2697 }
 0x3cd   :  { %v5220_v1 = vpop.permute.xlu2 %2707 }
 0x3ce   :  { %5925 = vst [vmem:[#allocation28_spill] sm:$0xff] %v5220_v1 }
 0x3d3   :  { %v2672_v6 = vpop.permute.xlu1 %2671 }
 0x3d4   :  { %v5216_v47 = vpop.permute.xlu0 %2703 }
 0x3d5   :  { %5923 = vst [vmem:[#allocation22_spill] sm:$0xff] %v5216_v47  ;;  %v2714_v8 = vpop.permute.xlu2 %2713 }
 0x3d6   :  { %v5233_v13 = vsel %vm5714_vm10, %v2666_v16, %v2714_v8 }
 0x3d7   :  { %5928 = vst [vmem:[#allocation40_spill] sm:$0xff] %v5233_v13 }
 0x3dc   :  { %v2710_v41 = vpop.permute.xlu0 %2709 }
 0x3dd   :  { %v5225_v59 = vsel %vm5714_vm10, %v2662_v27, %v2710_v41  ;;  %v2720_v44 = vpop.permute.xlu2 %2719 }
 0x3de   :  { %5926 = vst [vmem:[#allocation32_spill] sm:$0xff] %v5225_v59  ;;  %v5241_v20 = vsel %vm5714_vm10, %v2672_v6, %v2720_v44 }
 0x3df   :  { %5930 = vst [vmem:[#allocation21_spill] sm:$0xff] %v5241_v20 }
 0x3e4   :  { %v2716_v9 = vpop.permute.xlu0 %2715 }
 0x3e5   :  { %v5229_v14 = vsel %vm5714_vm10, %v2668_v58, %v2716_v9 }
 0x3e6   :  { %5927 = vst [vmem:[#allocation24_spill] sm:$0xff] %v5229_v14 }
 0x3ec   :  { %v2722_v15 = vpop.permute.xlu0 %2721 }
 0x3ed   :  { %v5237_v56 = vsel %vm5714_vm10, %v2674_v22, %v2722_v15 }
 0x3ee   :  { %5929 = vst [vmem:[#allocation36_spill] sm:$0xff] %v5237_v56 }
 0x41c   :  { %v2284_v29 = vpop.xlane.xlu0 %2283 }
 0x41d   :  { %v5243_v12 = vperm.slane %v2284_v29, 0  ;;  %v5245_v49 = vperm.slane %v2284_v29, 1  ;;  %v5247_v52 = vperm.slane %v2284_v29, 2  ;;  %v5249_v37 = vperm.slane %v2284_v29, 3 }
 0x41e   :  { %v5251_v30 = vperm.slane %v2284_v29, 4  ;;  %v5254_v40 = vperm.slane %v2284_v29, 5  ;;  %v5260_v35 = vperm.slane %v2284_v29, 6  ;;  %v5264_v42 = vperm.slane %v2284_v29, 7 }
 0x41f   :  { %3195 = vrcp.f32 %v5243_v12  ;;  %v2363_v39 = vand.u32 2147483648, %v5247_v52  ;;  %v2348_v53 = vand.u32 2147483648, %v5245_v49  ;;  %v2331_v50 = vand.u32 2147483647, %v5243_v12 }
 0x420   :  { %3197 = vrcp.f32 %v5245_v49  ;;  %v2346_v43 = vand.u32 2147483647, %v5245_v49  ;;  %v2333_v26 = vand.u32 2147483648, %v5243_v12  ;;  %v2361_v32 = vand.u32 2147483647, %v5247_v52 }
 0x421   :  { %3199 = vrcp.f32 %v5247_v52  ;;  %v5271_v22 = vor.u32 1.1754944e-38, %v2363_v39  ;;  %vm2342_vm3 = vweird.f32 %v5245_v49  ;;  %v2349_v41 = vor.u32 1.1754944e-38, %v2348_v53 }
 0x422   :  { %3201 = vrcp.f32 %v5249_v37  ;;  %vm2327_vm4 = vweird.f32 %v5243_v12  ;;  %v2406_v27 = vand.u32 2147483647, %v5254_v40  ;;  %vm2357_vm5 = vweird.f32 %v5247_v52 }
 0x423   :  { %3203 = vrcp.f32 %v5251_v30  ;;  %vm5279_vm6 = vcmp.eq.f32.partialorder %v2331_v50, 8.507059e+37  ;;  %v2408_v15 = vand.u32 2147483648, %v5254_v40  ;;  %vm5286_vm7 = vcmp.eq.f32.partialorder %v2346_v43, 8.507059e+37 }
 0x424   :  { %3205 = vrcp.f32 %v5254_v40  ;;  %v2334_v39 = vor.u32 1.1754944e-38, %v2333_v26  ;;  %v2391_v53 = vand.u32 2147483647, %v5251_v30  ;;  %vm5294_vm15 = vcmp.eq.f32.partialorder %v2361_v32, 8.507059e+37 }
 0x425   :  { %v3196_v58 = vpop.eup %3195  ;;  %3207 = vrcp.f32 %v5260_v35  ;;  %vm2387_vm0 = vweird.f32 %v5251_v30  ;;  %v2393_v26 = vand.u32 2147483648, %v5251_v30  ;;  %vm5326_vm14 = vcmp.eq.f32.partialorder %v2406_v27, 8.507059e+37 }
 0x426   :  { %v3198_v9 = vpop.eup %3197  ;;  %v2323_v8 = vmul.f32 %v3196_v58, %v5243_v12  ;;  %3209 = vrcp.f32 %v5264_v42  ;;  %vm2328_vm9 = vweird.f32 %v3196_v58  ;;  %v2378_v12 = vand.u32 2147483648, %v5249_v37 }
 0x427   :  { %v3200_v44 = vpop.eup %3199  ;;  %v2338_v6 = vmul.f32 %v3198_v9, %v5245_v49  ;;  %vm2343_vm8 = vweird.f32 %v3198_v9  ;;  %vm2329_vm11 = vmor %vm2327_vm4, %vm2328_vm9  ;;  %v2409_v16 = vor.u32 1.1754944e-38, %v2408_v15 }
 0x428   :  { %v5291_v56 = vpop.eup %3201  ;;  %v2353_v50 = vmul.f32 %v3200_v44, %v5247_v52  ;;  %v2324_v13 = vsub.f32 1.0, %v2323_v8  ;;  %vm2358_vm2 = vweird.f32 %v3200_v44  ;;  %vm2344_vm1 = vmor %vm2342_vm3, %vm2343_vm8 }
 0x429   :  { %v5299_v43 = vpop.eup %3203  ;;  %v2339_v2 = vsub.f32 1.0, %v2338_v6  ;;  %v2368_v20 = vmul.f32 %v5291_v56, %v5249_v37  ;;  %vm2373_vm13 = vweird.f32 %v5291_v56  ;;  %vm2359_vm4 = vmor %vm2357_vm5, %vm2358_vm2  ;;  %vm5941_vm2 = vweird.f32 %v5249_v37 }
 0x42a   :  { %v5304_v11 = vpop.eup %3205  ;;  %v2354_v32 = vsub.f32 1.0, %v2353_v50  ;;  %v2325_v14 = vmul.f32 %v3196_v58, %v2324_v13  ;;  %v2383_v8 = vmul.f32 %v5299_v43, %v5251_v30  ;;  %vm2388_vm12 = vweird.f32 %v5299_v43  ;;  %vm5365_vm3 = vmor %vm5941_vm2, %vm2373_vm13 }
 0x42b   :  { %v2340_v38 = vmul.f32 %v3198_v9, %v2339_v2  ;;  %v2398_v6 = vmul.f32 %v5304_v11, %v5254_v40  ;;  %v2369_v1 = vsub.f32 1.0, %v2368_v20  ;;  %v5313_v54 = vpop.eup %3207  ;;  %vm2403_vm10 = vweird.f32 %v5304_v11 }
 0x42c   :  { %v2355_v47 = vmul.f32 %v3200_v44, %v2354_v32  ;;  %v2326_v59 = vadd.f32 %v3196_v58, %v2325_v14  ;;  %v2384_v50 = vsub.f32 1.0, %v2383_v8  ;;  %v5316_v13 = vpop.eup %3209 }
 0x42d   :  { %v2341_v3 = vadd.f32 %v3198_v9, %v2340_v38  ;;  %v2399_v2 = vsub.f32 1.0, %v2398_v6  ;;  %v2370_v20 = vmul.f32 %v5291_v56, %v2369_v1 }
 0x42e   :  { %v2356_v46 = vadd.f32 %v3200_v44, %v2355_v47  ;;  %v2330_v14 = vsel %vm2329_vm11, %v3196_v58, %v2326_v59  ;;  %v2385_v38 = vmul.f32 %v5299_v43, %v2384_v50  ;;  %vm5352_vm11 = vmor %vm2387_vm0, %vm2388_vm12  ;;  %vm5944_vm12 = vweird.f32 %v5254_v40 }
 0x42f   :  { %v2345_v8 = vsel %vm2344_vm1, %v3198_v9, %v2341_v3  ;;  %v2335_v47 = vsel %vm5279_vm6, %v2334_v39, %v2330_v14  ;;  %v2400_v1 = vmul.f32 %v5304_v11, %v2399_v2  ;;  %v2371_v59 = vadd.f32 %v5291_v56, %v2370_v20  ;;  %vm5373_vm0 = vmor %vm5944_vm12, %vm2403_vm10 }
 0x430   :  { %v2360_v49 = vsel %vm2359_vm4, %v3200_v44, %v2356_v46  ;;  %v2350_v58 = vsel %vm5286_vm7, %v2349_v41, %v2345_v8  ;;  %v2336_v27 = vmul.f32 %v5075_v10, %v2335_v47  ;;  %v2386_v6 = vadd.f32 %v5299_v43, %v2385_v38 }
 0x431   :  { %v2365_v52 = vsel %vm5294_vm15, %v5271_v22, %v2360_v49  ;;  %v2351_v3 = vmul.f32 %v5073_v57, %v2350_v58  ;;  %v2401_v9 = vadd.f32 %v5304_v11, %v2400_v1  ;;  %v2376_v10 = vand.u32 2147483647, %v5249_v37 }
 0x432   :  { %v2366_v41 = vmul.f32 %v5078_v48, %v2365_v52  ;;  %2757 = vperm.xlu1 %3097, %v2336_v27   ;;  %v2390_v21 = vsel %vm5352_vm11, %v5299_v43, %v2386_v6  ;;  %vm2392_vm1 = vcmp.eq.f32.partialorder %v2391_v53, 8.507059e+37  ;;  %v2394_v22 = vor.u32 1.1754944e-38, %v2393_v26 }
 0x433   :  { %2762 = vperm.xlu2 %3098, %v2351_v3   ;;  %v2287_v30 = vpop.xlane.xlu2 %2286  ;;  %v2375_v15 = vsel %vm5365_vm3, %v5291_v56, %v2371_v59  ;;  %v2379_v37 = vor.u32 1.1754944e-38, %v2378_v12  ;;  %v2413_v44 = vmul.f32 %v5313_v54, %v5260_v35  ;;  %v2405_v40 = vsel %vm5373_vm0, %v5304_v11, %v2401_v9 }
 0x434   :  { %2767 = vperm.xlu0 %3096, %v2366_v41   ;;  %v5382_v29 = vperm.slane %v2287_v30, 0  ;;  %v5384_v39 = vperm.slane %v2287_v30, 1  ;;  %v5386_v53 = vperm.slane %v2287_v30, 2  ;;  %v5391_v43 = vperm.slane %v2287_v30, 3 }
 0x435   :  { %v2395_v26 = vsel %vm2392_vm1, %v2394_v22, %v2390_v21  ;;  %vm2377_vm13 = vcmp.eq.f32.partialorder %v2376_v10, 8.507059e+37  ;;  %vm2418_vm10 = vweird.f32 %v5313_v54  ;;  %v5394_v56 = vperm.slane %v2287_v30, 4 }
 0x436   :  { %v5396_v50 = vperm.slane %v2287_v30, 5  ;;  %3211 = vrcp.f32 %v5382_v29  ;;  %v2380_v2 = vsel %vm2377_vm13, %v2379_v37, %v2375_v15  ;;  %v5399_v20 = vperm.slane %v2287_v30, 6 }
 0x437   :  { %3213 = vrcp.f32 %v5384_v39  ;;  %v2410_v11 = vsel %vm5326_vm14, %v2409_v16, %v2405_v40  ;;  %v2414_v14 = vsub.f32 1.0, %v2413_v44  ;;  %v2381_v38 = vmul.f32 %v5093_v63, %v2380_v2 }
 0x438   :  { %3215 = vrcp.f32 %v5386_v53  ;;  %v2421_v12 = vand.u32 2147483647, %v5260_v35  ;;  %v2423_v8 = vand.u32 2147483648, %v5260_v35  ;;  %v2396_v47 = vmul.f32 %v5087_v61, %v2395_v26 }
 0x439   :  { %3217 = vrcp.f32 %v5391_v43  ;;  %v2415_v1 = vmul.f32 %v5313_v54, %v2414_v14  ;;  %v2483_v59 = vand.u32 2147483648, %v5386_v53  ;;  %v5412_v49 = vperm.slane %v2287_v30, 7 }
 0x43a   :  { %3219 = vrcp.f32 %v5394_v56  ;;  %v2411_v32 = vmul.f32 %v5107_v62, %v2410_v11  ;;  %2772 = vperm.xlu1 %3097, %v2381_v38   ;;  %vm2417_vm14 = vweird.f32 %v5260_v35  ;;  %vm5419_vm5 = vcmp.eq.f32.partialorder %v2421_v12, 8.507059e+37 }
 0x43b   :  { %3221 = vrcp.f32 %v5396_v50  ;;  %2777 = vperm.xlu2 %3098, %v2396_v47   ;;  %v2416_v63 = vadd.f32 %v5313_v54, %v2415_v1  ;;  %v2481_v58 = vand.u32 2147483647, %v5386_v53  ;;  %vm2419_vm6 = vmor %vm2417_vm14, %vm2418_vm10  ;;  %v2424_v62 = vor.u32 1.1754944e-38, %v2423_v8 }
 0x43c   :  { %v5424_v27 = vpop.eup %3211  ;;  %3223 = vrcp.f32 %v5399_v20  ;;  %2782 = vperm.xlu0 %3096, %v2411_v32   ;;  %v2484_v35 = vor.u32 1.1754944e-38, %v2483_v59  ;;  %vm2462_vm7 = vweird.f32 %v5384_v39  ;;  %vm2477_vm15 = vweird.f32 %v5386_v53 }
 0x43d   :  { %v3214_v6 = vpop.eup %3213  ;;  %v2420_v52 = vsel %vm2419_vm6, %v5313_v54, %v2416_v63  ;;  %v2466_v3 = vand.u32 2147483647, %v5384_v39  ;;  %v2468_v9 = vand.u32 2147483648, %v5384_v39  ;;  %v2443_v46 = vmul.f32 %v5424_v27, %v5382_v29 }
 0x43e   :  { %v3216_v10 = vpop.eup %3215  ;;  %3225 = vrcp.f32 %v5412_v49  ;;  %v2425_v41 = vsel %vm5419_vm5, %v2424_v62, %v2420_v52  ;;  %v2458_v16 = vmul.f32 %v3214_v6, %v5384_v39  ;;  %vm2447_vm8 = vweird.f32 %v5382_v29 }
 0x43f   :  { %v5441_v54 = vpop.eup %3217  ;;  %v2426_v21 = vmul.f32 %v5101_v60, %v2425_v41  ;;  %v2473_v57 = vmul.f32 %v3216_v10, %v5386_v53  ;;  %vm5445_vm9 = vcmp.eq.f32.partialorder %v2481_v58, 8.507059e+37  ;;  %vm2463_vm4 = vweird.f32 %v3214_v6 }
 0x440   :  { %vm2448_vm11 = vweird.f32 %v5424_v27  ;;  %v5450_v48 = vpop.eup %3219  ;;  %v2459_v22 = vsub.f32 1.0, %v2458_v16  ;;  %v2444_v15 = vsub.f32 1.0, %v2443_v46  ;;  %v2451_v37 = vand.u32 2147483647, %v5382_v29  ;;  %vm2464_vm13 = vmor %vm2462_vm7, %vm2463_vm4 }
 0x441   :  { %v2453_v44 = vand.u32 2147483648, %v5382_v29  ;;  %v3222_v40 = vpop.eup %3221  ;;  %v2474_v26 = vsub.f32 1.0, %v2473_v57  ;;  %vm2478_vm1 = vweird.f32 %v3216_v10  ;;  %vm5454_vm2 = vcmp.eq.f32.partialorder %v2466_v3, 8.507059e+37  ;;  %vm5476_vm0 = vmor %vm2447_vm8, %vm2448_vm11 }
 0x442   :  { %v2469_v2 = vor.u32 1.1754944e-38, %v2468_v9  ;;  %v5458_v11 = vpop.eup %3223  ;;  %2787 = vperm.xlu1 %3097, %v2426_v21   ;;  %v2460_v14 = vmul.f32 %v3214_v6, %v2459_v22  ;;  %v2445_v38 = vmul.f32 %v5424_v27, %v2444_v15  ;;  %vm2522_vm3 = vweird.f32 %v5396_v50  ;;  %vm2479_vm5 = vmor %vm2477_vm15, %vm2478_vm1 }
 0x443   :  { %v2526_v12 = vand.u32 2147483647, %v5396_v50  ;;  %v2475_v8 = vmul.f32 %v3216_v10, %v2474_v26  ;;  %vm5463_vm12 = vcmp.eq.f32.partialorder %v2451_v37, 8.507059e+37  ;;  %v2518_v1 = vmul.f32 %v3222_v40, %v5396_v50 }
 0x444   :  { %v2528_v59 = vand.u32 2147483648, %v5396_v50  ;;  %v5469_v32 = vpop.eup %3225  ;;  %v2461_v63 = vadd.f32 %v3214_v6, %v2460_v14  ;;  %v2446_v61 = vadd.f32 %v5424_v27, %v2445_v38  ;;  %v2454_v62 = vor.u32 1.1754944e-38, %v2453_v44 }
 0x445   :  { %v2503_v52 = vmul.f32 %v5450_v48, %v5394_v56  ;;  %v2476_v3 = vadd.f32 %v3216_v10, %v2475_v8  ;;  %v2519_v9 = vsub.f32 1.0, %v2518_v1  ;;  %vm2523_vm10 = vweird.f32 %v3222_v40 }
 0x446   :  { %vm2508_vm14 = vweird.f32 %v5450_v48  ;;  %v2465_v29 = vsel %vm2464_vm13, %v3214_v6, %v2461_v63  ;;  %v2450_v46 = vsel %vm5476_vm0, %v5424_v27, %v2446_v61  ;;  %v2511_v16 = vand.u32 2147483647, %v5394_v56  ;;  %vm2524_vm7 = vmor %vm2522_vm3, %vm2523_vm10 }
 0x447   :  { %v2504_v41 = vsub.f32 1.0, %v2503_v52  ;;  %v2480_v21 = vsel %vm2479_vm5, %v3216_v10, %v2476_v3  ;;  %v2470_v39 = vsel %vm5454_vm2, %v2469_v2, %v2465_v29  ;;  %v2455_v57 = vsel %vm5463_vm12, %v2454_v62, %v2450_v46 }
 0x448   :  { %v2520_v22 = vmul.f32 %v3222_v40, %v2519_v9  ;;  %v2485_v53 = vsel %vm5445_vm9, %v2484_v35, %v2480_v21  ;;  %v2471_v6 = vmul.f32 %v5114_v4, %v2470_v39  ;;  %v2456_v15 = vmul.f32 %v5120_v28, %v2455_v57 }
 0x449   :  { %v2505_v27 = vmul.f32 %v5450_v48, %v2504_v41  ;;  %v2486_v37 = vmul.f32 %v5104_v7, %v2485_v53  ;;  %vm2527_vm6 = vcmp.eq.f32.partialorder %v2526_v12, 8.507059e+37  ;;  %v2513_v10 = vand.u32 2147483648, %v5394_v56 }
 0x44a   :  { %v2521_v44 = vadd.f32 %v3222_v40, %v2520_v22  ;;  %2802 = vperm.xlu2 %3098, %v2471_v6   ;;  %2797 = vperm.xlu1 %3097, %v2456_v15   ;;  %v2529_v30 = vor.u32 1.1754944e-38, %v2528_v59  ;;  %vm2507_vm15 = vweird.f32 %v5394_v56  ;;  %v2488_v4 = vmul.f32 %v5441_v54, %v5391_v43 }
 0x44b   :  { %v2506_v35 = vadd.f32 %v5450_v48, %v2505_v27  ;;  %2807 = vperm.xlu0 %3096, %v2486_v37   ;;  %vm2509_vm8 = vmor %vm2507_vm15, %vm2508_vm14  ;;  %vm2512_vm9 = vcmp.eq.f32.partialorder %v2511_v16, 8.507059e+37  ;;  %v2514_v28 = vor.u32 1.1754944e-38, %v2513_v10  ;;  %v2496_v26 = vand.u32 2147483647, %v5391_v43 }
 0x44c   :  { %v2525_v7 = vsel %vm2524_vm7, %v3222_v40, %v2521_v44  ;;  %v2489_v2 = vsub.f32 1.0, %v2488_v4  ;;  %v2428_v14 = vmul.f32 %v5316_v13, %v5264_v42  ;;  %vm2492_vm4 = vweird.f32 %v5391_v43 }
 0x44d   :  { %v2530_v60 = vsel %vm2527_vm6, %v2529_v30, %v2525_v7  ;;  %v2510_v50 = vsel %vm2509_vm8, %v5450_v48, %v2506_v35  ;;  %v2498_v38 = vand.u32 2147483648, %v5391_v43  ;;  %vm2493_vm11 = vweird.f32 %v5441_v54  ;;  %v2694_v30 = vpop.permute.xlu1 %2693 }
 0x44e   :  { %v2515_v56 = vsel %vm2512_vm9, %v2514_v28, %v2510_v50  ;;  %v2531_v40 = vmul.f32 %v5117_v24, %v2530_v60  ;;  %v2490_v12 = vmul.f32 %v5441_v54, %v2489_v2  ;;  %v2429_v8 = vsub.f32 1.0, %v2428_v14  ;;  %vm2494_vm3 = vmor %vm2492_vm4, %vm2493_vm11 }
 0x44f   :  { %v2516_v47 = vmul.f32 %v5131_v0, %v2515_v56  ;;  %vm5523_vm1 = vcmp.eq.f32.partialorder %v2496_v26, 8.507059e+37  ;;  %v2438_v1 = vand.u32 2147483648, %v5264_v42  ;;  %v2533_v59 = vmul.f32 %v5458_v11, %v5399_v20 }
 0x450   :  { %v2491_v43 = vadd.f32 %v5441_v54, %v2490_v12  ;;  %v2430_v24 = vmul.f32 %v5316_v13, %v2429_v8  ;;  %vm2433_vm2 = vweird.f32 %v5316_v13  ;;  %v2436_v63 = vand.u32 2147483647, %v5264_v42 }
 0x451   :  { %v2499_v61 = vor.u32 1.1754944e-38, %v2498_v38  ;;  %vm2432_vm12 = vweird.f32 %v5264_v42  ;;  %v2534_v0 = vsub.f32 1.0, %v2533_v59  ;;  %vm2538_vm0 = vweird.f32 %v5458_v11 }
 0x452   :  { %2817 = vperm.xlu2 %3098, %v2516_v47   ;;  %v2495_v58 = vsel %vm2494_vm3, %v5441_v54, %v2491_v43  ;;  %v2431_v62 = vadd.f32 %v5316_v13, %v2430_v24  ;;  %v2543_v52 = vand.u32 2147483648, %v5399_v20  ;;  %v2548_v3 = vmul.f32 %v5469_v32, %v5412_v49  ;;  %vm2434_vm13 = vmor %vm2432_vm12, %vm2433_vm2 }
 0x453   :  { %2822 = vperm.xlu0 %3096, %v2531_v40   ;;  %v2500_v9 = vsel %vm5523_vm1, %v2499_v61, %v2495_v58  ;;  %v2439_v29 = vor.u32 1.1754944e-38, %v2438_v1  ;;  %v2535_v42 = vmul.f32 %v5458_v11, %v2534_v0  ;;  %v2541_v46 = vand.u32 2147483647, %v5399_v20  ;;  %v5964_v58 = vld [vmem:[#allocation25_spill] sm:$0xff] }
 0x454   :  { %v2501_v41 = vmul.f32 %v5134_v18, %v2500_v9  ;;  %v2435_v54 = vsel %vm2434_vm13, %v5316_v13, %v2431_v62  ;;  %vm2437_vm10 = vcmp.eq.f32.partialorder %v2436_v63, 8.507059e+37  ;;  %v2549_v16 = vsub.f32 1.0, %v2548_v3  ;;  %v5965_v62 = vld [vmem:[#allocation31_spill] sm:$0xff] }
 0x455   :  { %v2440_v21 = vsel %vm2437_vm10, %v2439_v29, %v2435_v54  ;;  %v2536_v39 = vadd.f32 %v5458_v11, %v2535_v42  ;;  %vm2537_vm14 = vweird.f32 %v5399_v20  ;;  %v2544_v57 = vor.u32 1.1754944e-38, %v2543_v52  ;;  %v2700_v35 = vpop.permute.xlu1 %2699  ;;  %v5967_v29 = vld [vmem:[#allocation32_spill] sm:$0xff] }
 0x456   :  { %2812 = vperm.xlu1 %3097, %v2501_v41   ;;  %vm2539_vm5 = vmor %vm2537_vm14, %vm2538_vm0  ;;  %v2550_v22 = vmul.f32 %v5469_v32, %v2549_v16  ;;  %vm2553_vm6 = vweird.f32 %v5469_v32  ;;  %v2556_v18 = vand.u32 2147483647, %v5412_v49  ;;  %v2558_v13 = vand.u32 2147483648, %v5412_v49 }
 0x457   :  { %v2540_v53 = vsel %vm2539_vm5, %v5458_v11, %v2536_v39  ;;  %vm2542_vm7 = vcmp.eq.f32.partialorder %v2541_v46, 8.507059e+37  ;;  %vm2552_vm15 = vweird.f32 %v5412_v49  ;;  %v2441_v20 = vmul.f32 %v5090_v33, %v2440_v21 }
 0x458   :  { %v2545_v6 = vsel %vm2542_vm7, %v2544_v57, %v2540_v53  ;;  %v2551_v15 = vadd.f32 %v5469_v32, %v2550_v22  ;;  %vm2554_vm8 = vmor %vm2552_vm15, %vm2553_vm6  ;;  %v2559_v37 = vor.u32 1.1754944e-38, %v2558_v13  ;;  %vm2557_vm9 = vcmp.eq.f32.partialorder %v2556_v18, 8.507059e+37 }
 0x459   :  { %v2546_v27 = vmul.f32 %v5146_v17, %v2545_v6  ;;  %vm5959_vm4 = vcmp.lt.s32.totalorder %v5002_v31, 4  ;;  %vm2851_vm11 = vcmask 39936   ;;  %vm5968_vm13 = vcmask 1041409  }
 0x45a   :  { %v2555_v44 = vsel %vm2554_vm8, %v5469_v32, %v2551_v15  ;;  %v2740_v17 = vsel %vm5959_vm4, %v4974_v19, %v2694_v30  ;;  %vm5960_vm1 = vmmov %vm5959_vm4  ;;  %v5970_v30 = vld [vmem:[#allocation19_spill] sm:$0xff]  ;;  %vm5972_vm14 = vcmask 1042434   ;;  %vm5979_vm7 = vcmask 1043459  }
 0x45b   :  { %2792 = vperm.xlu0 %3096, %v2441_v20   ;;  %2827 = vperm.xlu2 %3098, %v2546_v27   ;;  %v2560_v10 = vsel %vm2557_vm9, %v2559_v37, %v2555_v44  ;;  %v2743_v60 = vsel %vm5960_vm1, %v4980_v25, %v2700_v35  ;;  %vm5961_vm2 = vmmov %vm5960_vm1  ;;  %vm5980_vm15 = vcmask 1044484   ;;  %vm5982_vm8 = vcmask 1045509  }
 0x45c   :  { %v2561_v11 = vmul.f32 %v5143_v55, %v2560_v10  ;;  %v2739_v14 = vsel %vm5961_vm2, %v4972_v51, %v5210_v34  ;;  %vm5962_vm3 = vmmov %vm5960_vm1  ;;  %vm5983_vm9 = vcmask 1046534  }
 0x45d   :  { %v5562_v4 = vpop.permute.xlu1 %2705  ;;  %v2741_v12 = vsel %vm5962_vm3, %v4976_v23, %v5214_v36  ;;  %vm5963_vm12 = vmmov %vm5960_vm1 }
 0x45e   :  { %2832 = vperm.xlu1 %3097, %v2561_v11   ;;  %v2742_v23 = vsel %vm5963_vm12, %v4978_v45, %v5212_v5  ;;  %vm5966_vm0 = vmmov %vm5960_vm1  ;;  %v5969_v11 = vld [vmem:[#allocation22_spill] sm:$0xff] }
 0x45f   :  { %v2744_v52 = vsel %vm5966_vm0, %v5965_v62, %v5964_v58  ;;  %vm5971_vm10 = vmmov %vm5966_vm0 }
 0x460   :  { %v2745_v35 = vsel %vm5971_vm10, %v5970_v30, %v5969_v11  ;;  %vm5975_vm5 = vmmov %vm5966_vm0 }
 0x461   :  { %vm5978_vm6 = vmmov %vm5966_vm0 }
 0x462   :  { %vm5985_vm4 = vmmov %vm5966_vm0 }
 0x463   :  { %vm5987_vm1 = vmmov %vm5968_vm13 }
 0x464   :  { %vm5989_vm2 = vmmov %vm5966_vm0 }
 0x465   :  { %v5564_v49 = vpop.permute.xlu1 %2711  ;;  %vm5991_vm3 = vmmov %vm5972_vm14 }
 0x466   :  { %vm5992_vm12 = vmmov %vm5979_vm7 }
 0x467   :  { %vm5993_vm0 = vmmov %vm5980_vm15 }
 0x468   :  { %vm5995_vm10 = vmmov %vm5983_vm9 }
 0x46d   :  { %v5570_v28 = vpop.permute.xlu1 %2717 }
 0x48d   :  { %v2763_v33 = vpop.permute.xlu2 %2762 }
 0x48e   :  { %v2836_v7 = vmul.f32 %v2763_v33, %v2740_v17 }
 0x490   :  { %v2859_v32 = vsel %vm2851_vm11, %v2836_v7, 0.0 }
 0x491   :  { %v2860_v26 = vrot.slane %v2859_v32, 4 }
 0x493   :  { %v2861_v2 = vadd.f32 %v2860_v26, %v2859_v32 }
 0x495   :  { %v2778_v55 = vpop.permute.xlu2 %2777  ;;  %v2862_v40 = vrot.slane %v2861_v2, 2 }
 0x496   :  { %v2839_v50 = vmul.f32 %v2778_v55, %v2743_v60 }
 0x497   :  { %v2863_v51 = vadd.f32 %v2862_v40, %v2861_v2 }
 0x498   :  { %v2880_v56 = vsel %vm2851_vm11, %v2839_v50, 0.0 }
 0x499   :  { %v2881_v1 = vrot.slane %v2880_v56, 4  ;;  %v2864_v9 = vrot.slane %v2863_v51, 1 }
 0x49b   :  { %v2882_v63 = vadd.f32 %v2881_v1, %v2880_v56  ;;  %v2865_v13 = vadd.f32 %v2864_v9, %v2863_v51  ;;  %v5974_v1 = vld [vmem:[#allocation20_spill] sm:$0xff]  ;;  %v5981_v9 = vld [vmem:[#allocation21_spill] sm:$0xff] }
 0x49c   :  { %v5976_v51 = vld [vmem:[#allocation24_spill] sm:$0xff] }
 0x49d   :  { %v2883_v39 = vrot.slane %v2882_v63, 2 }
 0x49f   :  { %v2884_v37 = vadd.f32 %v2883_v39, %v2882_v63  ;;  %v5977_v63 = vld [vmem:[#allocation27_spill] sm:$0xff] }
 0x4a4   :  { %v2758_v19 = vpop.permute.xlu1 %2757  ;;  %v2803_v47 = vpop.permute.xlu2 %2802 }
 0x4a5   :  { %v2835_v38 = vmul.f32 %v2758_v19, %v2739_v14  ;;  %v2844_v42 = vmul.f32 %v2803_v47, %v5967_v29  ;;  %v2885_v14 = vrot.slane %v2884_v37, 1 }
 0x4a6   :  { %v2768_v8 = vpop.permute.xlu0 %2767 }
 0x4a7   :  { %v2837_v25 = vmul.f32 %v2768_v8, %v2741_v12  ;;  %v2852_v48 = vsel %vm2851_vm11, %v2835_v38, 0.0  ;;  %v2915_v53 = vsel %vm2851_vm11, %v2844_v42, 0.0 }
 0x4a8   :  { %v2853_v59 = vrot.slane %v2852_v48, 4  ;;  %v2916_v17 = vrot.slane %v2915_v53, 4 }
 0x4a9   :  { %v2866_v43 = vsel %vm2851_vm11, %v2837_v25, 0.0 }
 0x4aa   :  { %v2867_v34 = vrot.slane %v2866_v43, 4  ;;  %v2854_v24 = vadd.f32 %v2853_v59, %v2852_v48  ;;  %v2917_v56 = vadd.f32 %v2916_v17, %v2915_v53  ;;  %v5973_v48 = vld [vmem:[#allocation28_spill] sm:$0xff] }
 0x4ab   :  { %v2747_v59 = vsel %vm5975_vm5, %v5974_v1, %v5973_v48 }
 0x4ac   :  { %v2868_v61 = vadd.f32 %v2867_v34, %v2866_v43  ;;  %v2855_v0 = vrot.slane %v2854_v24, 2  ;;  %v2773_v36 = vpop.permute.xlu1 %2772  ;;  %v2818_v45 = vpop.permute.xlu2 %2817  ;;  %v2886_v43 = vadd.f32 %v2885_v14, %v2884_v37 }
 0x4ad   :  { %v2838_v3 = vmul.f32 %v2773_v36, %v2742_v23  ;;  %v2847_v34 = vmul.f32 %v2818_v45, %v5976_v51  ;;  %v2918_v23 = vrot.slane %v2917_v56, 2 }
 0x4ae   :  { %v2869_v46 = vrot.slane %v2868_v61, 2  ;;  %v2856_v41 = vadd.f32 %v2855_v0, %v2854_v24  ;;  %v2783_v54 = vpop.permute.xlu0 %2782 }
 0x4af   :  { %v2840_v16 = vmul.f32 %v2783_v54, %v2744_v52  ;;  %v2873_v21 = vsel %vm2851_vm11, %v2838_v3, 0.0 }
 0x4b0   :  { %v2870_v57 = vadd.f32 %v2869_v46, %v2868_v61  ;;  %v2857_v22 = vrot.slane %v2856_v41, 1  ;;  %v2874_v18 = vrot.slane %v2873_v21, 4  ;;  %v2749_v61 = vsel %vm5978_vm6, %v5977_v63, %v5564_v49 }
 0x4b1   :  { %v2887_v5 = vsel %vm2851_vm11, %v2840_v16, 0.0  ;;  %v2936_v16 = vsel %vm2851_vm11, %v2847_v34, 0.0 }
 0x4b2   :  { %v2871_v6 = vrot.slane %v2870_v57, 1  ;;  %v2858_v15 = vadd.f32 %v2857_v22, %v2856_v41  ;;  %v2888_v20 = vrot.slane %v2887_v5, 4  ;;  %v2875_v27 = vadd.f32 %v2874_v18, %v2873_v21 }
 0x4b3   :  { %v2919_v22 = vadd.f32 %v2918_v23, %v2917_v56 }
 0x4b4   :  { %v2872_v44 = vadd.f32 %v2871_v6, %v2870_v57  ;;  %v2980_v10 = vsel %vm5968_vm13, %v2865_v13, %v2858_v15  ;;  %v2788_v33 = vpop.permute.xlu1 %2787  ;;  %v2889_v7 = vadd.f32 %v2888_v20, %v2887_v5  ;;  %v2876_v32 = vrot.slane %v2875_v27, 2  ;;  %vm5994_vm13 = vmmov %vm5982_vm8 }
 0x4b5   :  { %v2841_v26 = vmul.f32 %v2788_v33, %v2745_v35  ;;  %v2828_v25 = vpop.permute.xlu2 %2827  ;;  %v2937_v13 = vrot.slane %v2936_v16, 4 }
 0x4b6   :  { %v2981_v55 = vsel %vm5972_vm14, %v2872_v44, %v2980_v10  ;;  %v2890_v60 = vrot.slane %v2889_v7, 2  ;;  %v2877_v50 = vadd.f32 %v2876_v32, %v2875_v27  ;;  %v2849_v29 = vmul.f32 %v2828_v25, %v5981_v9  ;;  %v5984_v27 = vld [vmem:[#allocation43_spill] sm:$0xff]  ;;  %v5988_v25 = vld [vmem:[#allocation33_spill] sm:$0xff] }
 0x4b7   :  { %v2894_v2 = vsel %vm2851_vm11, %v2841_v26, 0.0  ;;  %v2752_v37 = vsel %vm5985_vm4, %v5984_v27, %v5570_v28  ;;  %v2920_v10 = vrot.slane %v2919_v22, 1  ;;  %v2938_v35 = vadd.f32 %v2937_v13, %v2936_v16 }
 0x4b8   :  { %v2895_v19 = vrot.slane %v2894_v2, 4  ;;  %v2891_v38 = vadd.f32 %v2890_v60, %v2889_v7  ;;  %v2878_v40 = vrot.slane %v2877_v50, 1  ;;  %v2950_v45 = vsel %vm2851_vm11, %v2849_v29, 0.0  ;;  %v5986_v60 = vld [vmem:[#allocation40_spill] sm:$0xff] }
 0x4b9   :  { %v2951_v15 = vrot.slane %v2950_v45, 4  ;;  %v2746_v48 = vsel %vm5989_vm2, %v5988_v25, %v5562_v4  ;;  %vm5996_vm14 = vcmask 1047559  }
 0x4ba   :  { %v2896_v12 = vadd.f32 %v2895_v19, %v2894_v2  ;;  %v2892_v8 = vrot.slane %v2891_v38, 1  ;;  %v2879_v47 = vadd.f32 %v2878_v40, %v2877_v50  ;;  %v2921_v2 = vadd.f32 %v2920_v10, %v2919_v22  ;;  %vm5997_vm5 = vmmov %vm5996_vm14 }
 0x4bb   :  { %v2952_v32 = vadd.f32 %v2951_v15, %v2950_v45  ;;  %v2939_v19 = vrot.slane %v2938_v35, 2 }
 0x4bc   :  { %v2897_v24 = vrot.slane %v2896_v12, 2  ;;  %v2798_v0 = vpop.permute.xlu1 %2797  ;;  %v2893_v36 = vadd.f32 %v2892_v8, %v2891_v38  ;;  %v2982_v58 = vsel %vm5979_vm7, %v2879_v47, %v2981_v55 }
 0x4bd   :  { %v2808_v62 = vpop.permute.xlu0 %2807  ;;  %v2843_v52 = vmul.f32 %v2798_v0, %v2747_v59  ;;  %v2983_v3 = vsel %vm5980_vm15, %v2886_v43, %v2982_v58  ;;  %v2940_v51 = vadd.f32 %v2939_v19, %v2938_v35  ;;  %v5990_v58 = vld [vmem:[#allocation36_spill] sm:$0xff] }
 0x4be   :  { %v2898_v42 = vadd.f32 %v2897_v24, %v2896_v12  ;;  %v2845_v46 = vmul.f32 %v2808_v62, %v2749_v61  ;;  %v2984_v41 = vsel %vm5982_vm8, %v2893_v36, %v2983_v3  ;;  %v2953_v12 = vrot.slane %v2952_v32, 2 }
 0x4bf   :  { %v2908_v54 = vsel %vm2851_vm11, %v2843_v52, 0.0  ;;  %v2941_v3 = vrot.slane %v2940_v51, 1 }
 0x4c0   :  { %v2899_v49 = vrot.slane %v2898_v42, 1  ;;  %v2922_v21 = vsel %vm2851_vm11, %v2845_v46, 0.0  ;;  %v2909_v39 = vrot.slane %v2908_v54, 4  ;;  %v2954_v0 = vadd.f32 %v2953_v12, %v2952_v32 }
 0x4c1   :  { %v2923_v57 = vrot.slane %v2922_v21, 4 }
 0x4c2   :  { %v2900_v5 = vadd.f32 %v2899_v49, %v2898_v42  ;;  %v2910_v18 = vadd.f32 %v2909_v39, %v2908_v54  ;;  %v2955_v46 = vrot.slane %v2954_v0, 1 }
 0x4c3   :  { %v2924_v20 = vadd.f32 %v2923_v57, %v2922_v21  ;;  %v2942_v21 = vadd.f32 %v2941_v3, %v2940_v51 }
 0x4c4   :  { %v5623_v53 = vsel %vm5983_vm9, %v2900_v5, %v2984_v41  ;;  %v2911_v6 = vrot.slane %v2910_v18, 2 }
 0x4c5   :  { %v2823_v44 = vpop.permute.xlu0 %2822  ;;  %v2925_v26 = vrot.slane %v2924_v20, 2 }
 0x4c6   :  { %v2912_v11 = vadd.f32 %v2911_v6, %v2910_v18  ;;  %v2848_v30 = vmul.f32 %v2823_v44, %v2752_v37  ;;  %v2956_v18 = vadd.f32 %v2955_v46, %v2954_v0 }
 0x4c7   :  { %v2926_v8 = vadd.f32 %v2925_v26, %v2924_v20 }
 0x4c8   :  { %v2913_v33 = vrot.slane %v2912_v11, 1  ;;  %v2943_v17 = vsel %vm2851_vm11, %v2848_v30, 0.0  ;;  %v2813_v7 = vpop.permute.xlu1 %2812 }
 0x4c9   :  { %v2944_v55 = vrot.slane %v2943_v17, 4  ;;  %v2846_v50 = vmul.f32 %v2813_v7, %v5986_v60  ;;  %v2927_v23 = vrot.slane %v2926_v8, 1 }
 0x4ca   :  { %v2914_v14 = vadd.f32 %v2913_v33, %v2912_v11 }
 0x4cb   :  { %v2945_v56 = vadd.f32 %v2944_v55, %v2943_v17  ;;  %v2929_v28 = vsel %vm2851_vm11, %v2846_v50, 0.0  ;;  %v2928_v41 = vadd.f32 %v2927_v23, %v2926_v8 }
 0x4cc   :  { %v2987_v38 = vsel %vm5987_vm1, %v2921_v2, %v2914_v14  ;;  %v2930_v40 = vrot.slane %v2929_v28, 4 }
 0x4cd   :  { %v2946_v47 = vrot.slane %v2945_v56, 2  ;;  %v2793_v1 = vpop.permute.xlu0 %2792  ;;  %v2988_v39 = vsel %vm5991_vm3, %v2928_v41, %v2987_v38 }
 0x4ce   :  { %v2931_v59 = vadd.f32 %v2930_v40, %v2929_v28  ;;  %v2842_v43 = vmul.f32 %v2793_v1, %v2746_v48 }
 0x4cf   :  { %v2947_v34 = vadd.f32 %v2946_v47, %v2945_v56 }
 0x4d0   :  { %v2932_v24 = vrot.slane %v2931_v59, 2  ;;  %v2901_v63 = vsel %vm2851_vm11, %v2842_v43, 0.0  ;;  %v2833_v61 = vpop.permute.xlu1 %2832 }
 0x4d1   :  { %v2902_v36 = vrot.slane %v2901_v63, 4  ;;  %v2850_v62 = vmul.f32 %v2833_v61, %v5990_v58  ;;  %v2948_v4 = vrot.slane %v2947_v34, 1 }
 0x4d2   :  { %v2933_v52 = vadd.f32 %v2932_v24, %v2931_v59 }
 0x4d3   :  { %v2903_v9 = vadd.f32 %v2902_v36, %v2901_v63  ;;  %v2957_v31 = vsel %vm2851_vm11, %v2850_v62, 0.0  ;;  %v2949_v22 = vadd.f32 %v2948_v4, %v2947_v34 }
 0x4d4   :  { %v2934_v29 = vrot.slane %v2933_v52, 1  ;;  %v2958_v42 = vrot.slane %v2957_v31, 4 }
 0x4d5   :  { %v2904_v54 = vrot.slane %v2903_v9, 2 }
 0x4d6   :  { %v2935_v16 = vadd.f32 %v2934_v29, %v2933_v52  ;;  %v2959_v49 = vadd.f32 %v2958_v42, %v2957_v31 }
 0x4d7   :  { %v2905_v57 = vadd.f32 %v2904_v54, %v2903_v9 }
 0x4d8   :  { %v2989_v45 = vsel %vm5992_vm12, %v2935_v16, %v2988_v39  ;;  %v2960_v5 = vrot.slane %v2959_v49, 2 }
 0x4d9   :  { %v2990_v13 = vsel %vm5993_vm0, %v2942_v21, %v2989_v45  ;;  %v2906_v6 = vrot.slane %v2905_v57, 1 }
 0x4da   :  { %v2991_v15 = vsel %vm5994_vm13, %v2949_v22, %v2990_v13  ;;  %v2961_v20 = vadd.f32 %v2960_v5, %v2959_v49 }
 0x4db   :  { %v2907_v27 = vadd.f32 %v2906_v6, %v2905_v57  ;;  %v2992_v37 = vsel %vm5995_vm10, %v2956_v18, %v2991_v15 }
 0x4dc   :  { %v2962_v44 = vrot.slane %v2961_v20, 1 }
 0x4dd   :  { %v2986_v10 = vsel %vm5996_vm14, %v2907_v27, %v5623_v53 }
 0x4de   :  { %2996 = vst.msk [vmem:[%s5662_s6] sm:$0xff] %vm2851_vm11, %v2986_v10  ;;  %v2963_v11 = vadd.f32 %v2962_v44, %v2961_v20 }
 0x4e0   :  { %v2993_v30 = vsel %vm5997_vm5, %v2963_v11, %v2992_v37 }
 0x4e1   :  { %2997 = vst.msk [vmem:[%s5662_s6 + $0x8] sm:$0xff] %vm2851_vm11, %v2993_v30 }
 0x4e2   :  { %3002 = vsyncpa [#allocation3], 1 }
 0x4e3   :  { %3003 = vsyncpa [#allocation5], 1 }
 0x4e4   :  { %3004 = vsyncpa [#allocation8], 1 }

</bundles_post_ra>
